<compile_context>
chip_gen: v5e
topology: v5e:2x2
jax: 0.10.0
libtpu: 0.0.40
codegen_flags: <defaults>
</compile_context>

<pallas_src>
import math

import jax
import jax.numpy as jnp
from jax.experimental import pallas as pl
from jax.experimental.pallas import tpu as pltpu

NHEAD = 2
LN_EPS = 1e-5
NEG_INF = float("-inf")


# ----------------------------------------------------------------------------
# In-kernel helpers (all operate on stacked 2D row-major tiles)
# ----------------------------------------------------------------------------
def _layer_norm(x, g, b):
    mu = jnp.mean(x, axis=-1, keepdims=True)
    xc = x - mu
    var = jnp.mean(xc * xc, axis=-1, keepdims=True)
    return xc * jax.lax.rsqrt(var + LN_EPS) * g + b


def _ffn(x, w1, b1, w2, b2):
    h = jnp.maximum(jnp.dot(x, w1, preferred_element_type=jnp.float32) + b1, 0.0)
    return jnp.dot(h, w2, preferred_element_type=jnp.float32) + b2


def _softmax_rows(s):
    m = jnp.max(s, axis=-1, keepdims=True)
    p = jnp.exp(s - m)
    inv = pl.reciprocal(jnp.sum(p, axis=-1, keepdims=True), approx=True)
    return p * inv


def _head_masks(rows, hidden):
    """Full-shape (rows, hidden) per-head lane masks (no lane slices needed)."""
    lane = jax.lax.broadcasted_iota(jnp.int32, (rows, hidden), 1)
    dh = hidden // NHEAD
    return [((lane >= h * dh) & (lane < (h + 1) * dh)).astype(jnp.float32)
            for h in range(NHEAD)]


def _mha_stacked(q_in, kv_in, wq, bq, wk, bk, wv, bv, wo, bo, mask, hm_q, hm_kv):
    """Batched MHA on batch-stacked rows.

    q_in (Rq, H), kv_in (Rk, H).  `mask` is an additive (Rq, Rk) tensor that
    already contains the cross-batch block-diagonal -inf plus any causal /
    key-padding terms.  The 1/sqrt(dh) scale is folded into wq/bq host-side.
    Heads are isolated by zeroing the other head's lanes of q (for scores) and
    v (for the context) with precomputed masks; summing the per-head context
    bands reconstructs the concatenated context, so a single out-proj matmul
    suffices.
    """
    q = jnp.dot(q_in, wq, preferred_element_type=jnp.float32) + bq
    k = jnp.dot(kv_in, wk, preferred_element_type=jnp.float32) + bk
    v = jnp.dot(kv_in, wv, preferred_element_type=jnp.float32) + bv
    ctx = None
    for mq, mv in zip(hm_q, hm_kv):
        s = jax.lax.dot_general(q * mq, k, (((1,), (1,)), ((), ())),
                                preferred_element_type=jnp.float32) + mask
        attn = _softmax_rows(s)
        c = jnp.dot(attn, v * mv, preferred_element_type=jnp.float32)
        ctx = c if ctx is None else ctx + c
    return jnp.dot(ctx, wo, preferred_element_type=jnp.float32) + bo


# ----------------------------------------------------------------------------
# Fused forward kernel (whole model, one pallas_call, single grid step)
# ----------------------------------------------------------------------------
def _build_fused_kernel(names):
    def kernel(*refs):
        ins = dict(zip(names, refs[:-1]))
        out_ref = refs[-1]
        w = {k: ins[k][...] for k in names}

        H = w["pre_w"].shape[1]
        r_enc = w["src_stack"].shape[0]          # B * L
        r_dec = w["tgt_sel"].shape[0]            # B * T_pad
        B, T_pad, L = w["ptr_mask"].shape

        hm_enc = _head_masks(r_enc, H)
        hm_dec = hm_enc if r_dec == r_enc else _head_masks(r_dec, H)

        # -------------- encoder layer (post-norm, no padding mask) --------------
        x = jnp.dot(w["src_stack"], w["pre_w"], preferred_element_type=jnp.float32)
        sa = _mha_stacked(x, x,
                          w["enc_wq"], w["enc_bq"], w["enc_wk"], w["enc_bk"],
                          w["enc_wv"], w["enc_bv"], w["enc_wo"], w["enc_bo"],
                          w["enc_mask"], hm_enc, hm_enc)
        x = _layer_norm(x + sa, w["enc_n1g"], w["enc_n1b"])
        ff = _ffn(x, w["enc_w1"], w["enc_b1"], w["enc_w2"], w["enc_b2"])
        mem = _layer_norm(x + ff, w["enc_n2g"], w["enc_n2b"])            # (B*L, H)

        # -------- memory gathers (block one-hot matmuls) + reduce projection ----
        # tgt id == L (pad row of memory_padded) is an all-zero one-hot row.
        tgt_vecs = jnp.dot(w["tgt_sel"], mem, preferred_element_type=jnp.float32)
        q_vecs = jnp.dot(w["q_sel"], mem, preferred_element_type=jnp.float32)
        dec_in = (jnp.dot(tgt_vecs, w["red_a"], preferred_element_type=jnp.float32)
                  + jnp.dot(q_vecs, w["red_b"], preferred_element_type=jnp.float32))

        # ---------------------- decoder layer (post-norm) -----------------------
        sa = _mha_stacked(dec_in, dec_in,
                          w["dsa_wq"], w["dsa_bq"], w["dsa_wk"], w["dsa_bk"],
                          w["dsa_wv"], w["dsa_bv"], w["dsa_wo"], w["dsa_bo"],
                          w["dec_sa_mask"], hm_dec, hm_dec)
        h = _layer_norm(dec_in + sa, w["dec_n1g"], w["dec_n1b"])
        ca = _mha_stacked(h, mem,
                          w["dca_wq"], w["dca_bq"], w["dca_wk"], w["dca_bk"],
                          w["dca_wv"], w["dca_bv"], w["dca_wo"], w["dca_bo"],
                          w["dec_ca_mask"], hm_dec, hm_enc)
        h = _layer_norm(h + ca, w["dec_n2g"], w["dec_n2b"])
        ff = _ffn(h, w["dec_w1"], w["dec_b1"], w["dec_w2"], w["dec_b2"])
        h = _layer_norm(h + ff, w["dec_n3g"], w["dec_n3b"])              # (B*T_pad, H)

        # --------------- pointer network + masked log-softmax -------------------
        enc_t = jnp.dot(mem, w["ptr_w1"], preferred_element_type=jnp.float32)   # (B*L, H)
        dec_t = jnp.dot(h, w["ptr_w2"], preferred_element_type=jnp.float32)     # (B*T_pad, H)
        v_full = jnp.broadcast_to(w["ptr_v"].reshape(1, 1, H), (T_pad, L, H))   # hoisted
        outs = []
        for b in range(B):                        # B is tiny & static -> unrolled
            enc_b = enc_t[b * L:(b + 1) * L, :]               # sublane-aligned slice
            dec_b = dec_t[b * T_pad:(b + 1) * T_pad, :]       # sublane-aligned slice
            tb = jnp.tanh(dec_b[:, None, :] + enc_b[None, :, :])       # (T_pad, L, H)
            scores = jnp.sum(tb * v_full, axis=-1) + w["ptr_mask"][b]  # (T_pad, L)
            mx = jnp.max(scores, axis=-1, keepdims=True)
            lse = mx + jnp.log(jnp.sum(jnp.exp(scores - mx), axis=-1, keepdims=True))
            outs.append(scores - lse)
        out_ref[...] = jnp.concatenate(outs, axis=0)           # single (B*T_pad, L) store

    return kernel


# ----------------------------------------------------------------------------
# One-time parameter preparation (all transposes/splits/scaling done host-side)
# ----------------------------------------------------------------------------
def _split_attn(prefix, in_w, in_b, out_w, out_b, H, scale):
    t = lambda a: jnp.asarray(a, jnp.float32).T
    row = lambda a: jnp.asarray(a, jnp.float32).reshape(1, -1)
    return {
        prefix + "_wq": t(in_w[0:H, :]) * scale,      # 1/sqrt(dh) folded in
        prefix + "_bq": row(in_b[0:H]) * scale,
        prefix + "_wk": t(in_w[H:2 * H, :]),
        prefix + "_bk": row(in_b[H:2 * H]),
        prefix + "_wv": t(in_w[2 * H:3 * H, :]),
        prefix + "_bv": row(in_b[2 * H:3 * H]),
        prefix + "_wo": t(out_w),
        prefix + "_bo": row(out_b),
    }


def prepare_params(raw):
    t = lambda a: jnp.asarray(a, jnp.float32).T
    row = lambda a: jnp.asarray(a, jnp.float32).reshape(1, -1)
    e, d = raw["enc"], raw["dec"]
    H = raw["pre_project"].shape[0]
    scale = 1.0 / math.sqrt(H // NHEAD)
    p = {}
    p["pre_w"] = t(raw["pre_project"])                        # (F+2, H)
    p.update(_split_attn("enc", e["sa_in_w"], e["sa_in_b"], e["sa_out_w"], e["sa_out_b"], H, scale))
    p["enc_w1"] = t(e["l1_w"]); p["enc_b1"] = row(e["l1_b"])
    p["enc_w2"] = t(e["l2_w"]); p["enc_b2"] = row(e["l2_b"])
    p["enc_n1g"] = row(e["n1_w"]); p["enc_n1b"] = row(e["n1_b"])
    p["enc_n2g"] = row(e["n2_w"]); p["enc_n2b"] = row(e["n2_b"])
    red_t = jnp.asarray(raw["reduce"], jnp.float32).T         # (2H, H)
    p["red_a"] = red_t[0:H, :]                                # tgt half
    p["red_b"] = red_t[H:2 * H, :]                            # query half
    p.update(_split_attn("dsa", d["sa_in_w"], d["sa_in_b"], d["sa_out_w"], d["sa_out_b"], H, scale))
    p.update(_split_attn("dca", d["ca_in_w"], d["ca_in_b"], d["ca_out_w"], d["ca_out_b"], H, scale))
    p["dec_w1"] = t(d["l1_w"]); p["dec_b1"] = row(d["l1_b"])
    p["dec_w2"] = t(d["l2_w"]); p["dec_b2"] = row(d["l2_b"])
    p["dec_n1g"] = row(d["n1_w"]); p["dec_n1b"] = row(d["n1_b"])
    p["dec_n2g"] = row(d["n2_w"]); p["dec_n2b"] = row(d["n2_b"])
    p["dec_n3g"] = row(d["n3_w"]); p["dec_n3b"] = row(d["n3_b"])
    p["ptr_w1"] = t(raw["ptr_w1"])
    p["ptr_w2"] = t(raw["ptr_w2"])
    p["ptr_v"] = row(raw["ptr_v"])
    return p


# ----------------------------------------------------------------------------
# Forward wrapper: tiny XLA prep (padding, one-hot gathers, additive masks) +
# one fused pallas_call for the whole model.
# ----------------------------------------------------------------------------
@jax.jit
def grouper_forward(prep, src, query_id, src_len, tgt_ids, tgt_len):
    B, S, F = src.shape
    H = prep["pre_w"].shape[1]
    L = S + 2
    T = tgt_ids.shape[1]
    T_pad = ((T + 7) // 8) * 8            # pad decoder rows to a sublane multiple

    query_id = query_id.astype(jnp.int32)
    src_len = src_len.astype(jnp.int32)
    tgt_ids = tgt_ids.astype(jnp.int32)
    tgt_len = tgt_len.astype(jnp.int32)

    # pad src with two special-token rows / feature columns, stack batch in rows
    src_padded = jnp.zeros((B, L, F + 2), jnp.float32)
    src_padded = src_padded.at[:, 0, F].set(1.0)
    src_padded = src_padded.at[:, 1, F + 1].set(1.0)
    src_padded = src_padded.at[:, 2:, :F].set(src.astype(jnp.float32))
    src_stack = src_padded.reshape(B * L, F + 2)

    row_b = jnp.repeat(jnp.arange(B, dtype=jnp.int32), T_pad)          # (B*T_pad,)
    row_t = jnp.tile(jnp.arange(T_pad, dtype=jnp.int32), B)            # (B*T_pad,)
    col_b = jnp.repeat(jnp.arange(B, dtype=jnp.int32), L)              # (B*L,)
    col_l = jnp.tile(jnp.arange(L, dtype=jnp.int32), B)                # (B*L,)

    # one-hot gather matrices (padded rows / id==L select nothing -> zero row,
    # matching the zero pad row of memory_padded in the reference)
    tgt_ids_pad = jnp.full((B, T_pad), L, jnp.int32).at[:, :T].set(tgt_ids)
    tgt_flat = tgt_ids_pad.reshape(-1)
    tgt_sel = ((row_b[:, None] == col_b[None, :]) &
               (tgt_flat[:, None] == col_l[None, :])).astype(jnp.float32)   # (B*T_pad, B*L)
    q_flat = query_id[row_b]
    q_sel = ((row_b[:, None] == col_b[None, :]) &
             (q_flat[:, None] == col_l[None, :])).astype(jnp.float32)       # (B*T_pad, B*L)

    neg = jnp.float32(NEG_INF)

    # additive masks with the cross-batch block-diagonal baked in
    enc_mask = jnp.where(col_b[:, None] == col_b[None, :], 0.0, neg)        # (B*L, B*L)

    same_bb = row_b[:, None] == row_b[None, :]
    causal = row_t[:, None] >= row_t[None, :]
    key_ok_t = row_t[None, :] <= tgt_len[row_b][None, :]      # keys >= tgt_len+1 masked
    dec_sa_mask = jnp.where(same_bb & causal & key_ok_t, 0.0, neg)          # (B*T_pad, B*T_pad)

    same_bc = row_b[:, None] == col_b[None, :]
    key_ok_m = col_l[None, :] < (src_len[col_b] + 2)[None, :]  # keys >= src_len+2 masked
    dec_ca_mask = jnp.where(same_bc & key_ok_m, 0.0, neg)                   # (B*T_pad, B*L)

    ptr_mask = jnp.where(
        jnp.arange(L, dtype=jnp.int32)[None, None, :] < (src_len + 2)[:, None, None],
        0.0, neg)
    ptr_mask = jnp.broadcast_to(ptr_mask, (B, T_pad, L)).astype(jnp.float32)

    data = {
        "src_stack": src_stack, "tgt_sel": tgt_sel, "q_sel": q_sel,
        "enc_mask": enc_mask, "dec_sa_mask": dec_sa_mask,
        "dec_ca_mask": dec_ca_mask, "ptr_mask": ptr_mask,
    }
    names = tuple(list(data.keys()) + list(prep.keys()))
    inputs = list(data.values()) + [prep[k] for k in prep]

    kernel = _build_fused_kernel(names)

    in_specs = [pl.BlockSpec(a.shape, lambda i, _nd=a.ndim: (0,) * _nd) for a in inputs]
    # TODO(synk): on v7x a grid=(B,) "parallel" split over the second TensorCore
    # would be preferable; grid=(1,) is kept for single-TC v5e/v6e.
    out = pl.pallas_call(
        kernel,
        out_shape=jax.ShapeDtypeStruct((B * T_pad, L), jnp.float32),
        grid=(1,),
        in_specs=in_specs,
        out_specs=pl.BlockSpec((B * T_pad, L), lambda i: (0, 0)),
        compiler_params=pltpu.CompilerParams(dimension_semantics=("arbitrary",)),
    )(*inputs)
    return out.reshape(B, T_pad, L)[:, :T, :]


# ----------------------------------------------------------------------------
# Deterministic parameter init (matches shapes of the PyTorch module)
# ----------------------------------------------------------------------------
def init_params(key, feature_dim=16, hidden_dim=64):
    H = hidden_dim
    keys = jax.random.split(key, 64)
    ctr = [0]

    def w(shape, scale=0.1):
        k = keys[ctr[0]]
        ctr[0] += 1
        return jax.random.normal(k, shape, jnp.float32) * scale

    def attn():
        return dict(in_w=w((3 * H, H)), in_b=w((3 * H,)),
                    out_w=w((H, H)), out_b=w((H,)))

    enc_sa, dec_sa, dec_ca = attn(), attn(), attn()
    params = {
        "pre_project": w((H, feature_dim + 2)),
        "enc": {
            "sa_in_w": enc_sa["in_w"], "sa_in_b": enc_sa["in_b"],
            "sa_out_w": enc_sa["out_w"], "sa_out_b": enc_sa["out_b"],
            "l1_w": w((2 * H, H)), "l1_b": w((2 * H,)),
            "l2_w": w((H, 2 * H)), "l2_b": w((H,)),
            "n1_w": jnp.ones((H,), jnp.float32), "n1_b": jnp.zeros((H,), jnp.float32),
            "n2_w": jnp.ones((H,), jnp.float32), "n2_b": jnp.zeros((H,), jnp.float32),
        },
        "reduce": w((H, 2 * H)),
        "dec": {
            "sa_in_w": dec_sa["in_w"], "sa_in_b": dec_sa["in_b"],
            "sa_out_w": dec_sa["out_w"], "sa_out_b": dec_sa["out_b"],
            "ca_in_w": dec_ca["in_w"], "ca_in_b": dec_ca["in_b"],
            "ca_out_w": dec_ca["out_w"], "ca_out_b": dec_ca["out_b"],
            "l1_w": w((2 * H, H)), "l1_b": w((2 * H,)),
            "l2_w": w((H, 2 * H)), "l2_b": w((H,)),
            "n1_w": jnp.ones((H,), jnp.float32), "n1_b": jnp.zeros((H,), jnp.float32),
            "n2_w": jnp.ones((H,), jnp.float32), "n2_b": jnp.zeros((H,), jnp.float32),
            "n3_w": jnp.ones((H,), jnp.float32), "n3_b": jnp.zeros((H,), jnp.float32),
        },
        "ptr_w1": w((H, H)),
        "ptr_w2": w((H, H)),
        "ptr_v": w((1, H)),
    }
    return params


# ----------------------------------------------------------------------------
if __name__ == "__main__":
    key = jax.random.PRNGKey(0)
    kp, kx = jax.random.split(key)

    feature_dim, hidden_dim = 16, 64
    B, S = 2, 6                      # encoder sequence after padding: L = S + 2 = 8
    T = 5                            # teacher-forced target length

    raw_params = init_params(kp, feature_dim, hidden_dim)
    prep = prepare_params(raw_params)          # one-time host-side weight prep

    src = jax.random.normal(kx, (B, S, feature_dim), jnp.float32)
    src_len = jnp.array([6, 4], jnp.int32)                 # valid src tokens per batch
    query_id = jnp.array([2, 3], jnp.int32)                # index into memory (0..L-1)
    tgt_ids = jnp.array([[2, 3, 4, 1, 8],
                         [3, 4, 1, 8, 8]], jnp.int32)      # index into memory_padded (0..L)
    tgt_len = jnp.array([3, 2], jnp.int32)

    out = grouper_forward(prep, src, query_id, src_len, tgt_ids, tgt_len)
    jax.block_until_ready(out)
    assert out.shape == (B, T, S + 2)
    # masked positions are -inf by construction; make sure nothing went NaN
    assert not bool(jnp.any(jnp.isnan(out)))
    print("KERNEL_OK")
</pallas_src>

<mosaic_0001>
module attributes {stable_mosaic.version = 11 : i64} {
  func.func @kernel(%arg0: i32, %arg1: memref<16x18xf32, #tpu.memory_space<vmem>>, %arg2: memref<16x16xf32, #tpu.memory_space<vmem>>, %arg3: memref<16x16xf32, #tpu.memory_space<vmem>>, %arg4: memref<16x16xf32, #tpu.memory_space<vmem>>, %arg5: memref<16x16xf32, #tpu.memory_space<vmem>>, %arg6: memref<16x16xf32, #tpu.memory_space<vmem>>, %arg7: memref<2x8x8xf32, #tpu.memory_space<vmem>>, %arg8: memref<1x64xf32, #tpu.memory_space<vmem>>, %arg9: memref<1x64xf32, #tpu.memory_space<vmem>>, %arg10: memref<1x64xf32, #tpu.memory_space<vmem>>, %arg11: memref<1x64xf32, #tpu.memory_space<vmem>>, %arg12: memref<64x64xf32, #tpu.memory_space<vmem>>, %arg13: memref<64x64xf32, #tpu.memory_space<vmem>>, %arg14: memref<64x64xf32, #tpu.memory_space<vmem>>, %arg15: memref<64x64xf32, #tpu.memory_space<vmem>>, %arg16: memref<1x128xf32, #tpu.memory_space<vmem>>, %arg17: memref<1x64xf32, #tpu.memory_space<vmem>>, %arg18: memref<1x64xf32, #tpu.memory_space<vmem>>, %arg19: memref<1x64xf32, #tpu.memory_space<vmem>>, %arg20: memref<1x64xf32, #tpu.memory_space<vmem>>, %arg21: memref<1x64xf32, #tpu.memory_space<vmem>>, %arg22: memref<1x64xf32, #tpu.memory_space<vmem>>, %arg23: memref<1x64xf32, #tpu.memory_space<vmem>>, %arg24: memref<64x128xf32, #tpu.memory_space<vmem>>, %arg25: memref<128x64xf32, #tpu.memory_space<vmem>>, %arg26: memref<1x64xf32, #tpu.memory_space<vmem>>, %arg27: memref<1x64xf32, #tpu.memory_space<vmem>>, %arg28: memref<1x64xf32, #tpu.memory_space<vmem>>, %arg29: memref<1x64xf32, #tpu.memory_space<vmem>>, %arg30: memref<64x64xf32, #tpu.memory_space<vmem>>, %arg31: memref<64x64xf32, #tpu.memory_space<vmem>>, %arg32: memref<64x64xf32, #tpu.memory_space<vmem>>, %arg33: memref<64x64xf32, #tpu.memory_space<vmem>>, %arg34: memref<1x128xf32, #tpu.memory_space<vmem>>, %arg35: memref<1x64xf32, #tpu.memory_space<vmem>>, %arg36: memref<1x64xf32, #tpu.memory_space<vmem>>, %arg37: memref<1x64xf32, #tpu.memory_space<vmem>>, %arg38: memref<1x64xf32, #tpu.memory_space<vmem>>, %arg39: memref<1x64xf32, #tpu.memory_space<vmem>>, %arg40: memref<1x64xf32, #tpu.memory_space<vmem>>, %arg41: memref<1x64xf32, #tpu.memory_space<vmem>>, %arg42: memref<1x64xf32, #tpu.memory_space<vmem>>, %arg43: memref<1x64xf32, #tpu.memory_space<vmem>>, %arg44: memref<64x128xf32, #tpu.memory_space<vmem>>, %arg45: memref<128x64xf32, #tpu.memory_space<vmem>>, %arg46: memref<64x64xf32, #tpu.memory_space<vmem>>, %arg47: memref<64x64xf32, #tpu.memory_space<vmem>>, %arg48: memref<64x64xf32, #tpu.memory_space<vmem>>, %arg49: memref<64x64xf32, #tpu.memory_space<vmem>>, %arg50: memref<18x64xf32, #tpu.memory_space<vmem>>, %arg51: memref<1x64xf32, #tpu.memory_space<vmem>>, %arg52: memref<64x64xf32, #tpu.memory_space<vmem>>, %arg53: memref<64x64xf32, #tpu.memory_space<vmem>>, %arg54: memref<64x64xf32, #tpu.memory_space<vmem>>, %arg55: memref<64x64xf32, #tpu.memory_space<vmem>>, %arg56: memref<16x8xf32, #tpu.memory_space<vmem>>) attributes {dimension_semantics = [#tpu.dimension_semantics<arbitrary>], iteration_bounds = array<i64: 1>, scalar_prefetch = 0 : i64, scratch_operands = 0 : i64, tpu.core_type = #tpu.core_type<tc>, window_params = [{pipeline_mode = #tpu.pipeline_mode<synchronous>, transform_indices = @transform_0, window_bounds = array<i64: 16, 18>}, {pipeline_mode = #tpu.pipeline_mode<synchronous>, transform_indices = @transform_1, window_bounds = array<i64: 16, 16>}, {pipeline_mode = #tpu.pipeline_mode<synchronous>, transform_indices = @transform_2, window_bounds = array<i64: 16, 16>}, {pipeline_mode = #tpu.pipeline_mode<synchronous>, transform_indices = @transform_3, window_bounds = array<i64: 16, 16>}, {pipeline_mode = #tpu.pipeline_mode<synchronous>, transform_indices = @transform_4, window_bounds = array<i64: 16, 16>}, {pipeline_mode = #tpu.pipeline_mode<synchronous>, transform_indices = @transform_5, window_bounds = array<i64: 16, 16>}, {pipeline_mode = #tpu.pipeline_mode<synchronous>, transform_indices = @transform_6, window_bounds = array<i64: 2, 8, 8>}, {pipeline_mode = #tpu.pipeline_mode<synchronous>, transform_indices = @transform_7, window_bounds = array<i64: 1, 64>}, {pipeline_mode = #tpu.pipeline_mode<synchronous>, transform_indices = @transform_8, window_bounds = array<i64: 1, 64>}, {pipeline_mode = #tpu.pipeline_mode<synchronous>, transform_indices = @transform_9, window_bounds = array<i64: 1, 64>}, {pipeline_mode = #tpu.pipeline_mode<synchronous>, transform_indices = @transform_10, window_bounds = array<i64: 1, 64>}, {pipeline_mode = #tpu.pipeline_mode<synchronous>, transform_indices = @transform_11, window_bounds = array<i64: 64, 64>}, {pipeline_mode = #tpu.pipeline_mode<synchronous>, transform_indices = @transform_12, window_bounds = array<i64: 64, 64>}, {pipeline_mode = #tpu.pipeline_mode<synchronous>, transform_indices = @transform_13, window_bounds = array<i64: 64, 64>}, {pipeline_mode = #tpu.pipeline_mode<synchronous>, transform_indices = @transform_14, window_bounds = array<i64: 64, 64>}, {pipeline_mode = #tpu.pipeline_mode<synchronous>, transform_indices = @transform_15, window_bounds = array<i64: 1, 128>}, {pipeline_mode = #tpu.pipeline_mode<synchronous>, transform_indices = @transform_16, window_bounds = array<i64: 1, 64>}, {pipeline_mode = #tpu.pipeline_mode<synchronous>, transform_indices = @transform_17, window_bounds = array<i64: 1, 64>}, {pipeline_mode = #tpu.pipeline_mode<synchronous>, transform_indices = @transform_18, window_bounds = array<i64: 1, 64>}, {pipeline_mode = #tpu.pipeline_mode<synchronous>, transform_indices = @transform_19, window_bounds = array<i64: 1, 64>}, {pipeline_mode = #tpu.pipeline_mode<synchronous>, transform_indices = @transform_20, window_bounds = array<i64: 1, 64>}, {pipeline_mode = #tpu.pipeline_mode<synchronous>, transform_indices = @transform_21, window_bounds = array<i64: 1, 64>}, {pipeline_mode = #tpu.pipeline_mode<synchronous>, transform_indices = @transform_22, window_bounds = array<i64: 1, 64>}, {pipeline_mode = #tpu.pipeline_mode<synchronous>, transform_indices = @transform_23, window_bounds = array<i64: 64, 128>}, {pipeline_mode = #tpu.pipeline_mode<synchronous>, transform_indices = @transform_24, window_bounds = array<i64: 128, 64>}, {pipeline_mode = #tpu.pipeline_mode<synchronous>, transform_indices = @transform_25, window_bounds = array<i64: 1, 64>}, {pipeline_mode = #tpu.pipeline_mode<synchronous>, transform_indices = @transform_26, window_bounds = array<i64: 1, 64>}, {pipeline_mode = #tpu.pipeline_mode<synchronous>, transform_indices = @transform_27, window_bounds = array<i64: 1, 64>}, {pipeline_mode = #tpu.pipeline_mode<synchronous>, transform_indices = @transform_28, window_bounds = array<i64: 1, 64>}, {pipeline_mode = #tpu.pipeline_mode<synchronous>, transform_indices = @transform_29, window_bounds = array<i64: 64, 64>}, {pipeline_mode = #tpu.pipeline_mode<synchronous>, transform_indices = @transform_30, window_bounds = array<i64: 64, 64>}, {pipeline_mode = #tpu.pipeline_mode<synchronous>, transform_indices = @transform_31, window_bounds = array<i64: 64, 64>}, {pipeline_mode = #tpu.pipeline_mode<synchronous>, transform_indices = @transform_32, window_bounds = array<i64: 64, 64>}, {pipeline_mode = #tpu.pipeline_mode<synchronous>, transform_indices = @transform_33, window_bounds = array<i64: 1, 128>}, {pipeline_mode = #tpu.pipeline_mode<synchronous>, transform_indices = @transform_34, window_bounds = array<i64: 1, 64>}, {pipeline_mode = #tpu.pipeline_mode<synchronous>, transform_indices = @transform_35, window_bounds = array<i64: 1, 64>}, {pipeline_mode = #tpu.pipeline_mode<synchronous>, transform_indices = @transform_36, window_bounds = array<i64: 1, 64>}, {pipeline_mode = #tpu.pipeline_mode<synchronous>, transform_indices = @transform_37, window_bounds = array<i64: 1, 64>}, {pipeline_mode = #tpu.pipeline_mode<synchronous>, transform_indices = @transform_38, window_bounds = array<i64: 1, 64>}, {pipeline_mode = #tpu.pipeline_mode<synchronous>, transform_indices = @transform_39, window_bounds = array<i64: 1, 64>}, {pipeline_mode = #tpu.pipeline_mode<synchronous>, transform_indices = @transform_40, window_bounds = array<i64: 1, 64>}, {pipeline_mode = #tpu.pipeline_mode<synchronous>, transform_indices = @transform_41, window_bounds = array<i64: 1, 64>}, {pipeline_mode = #tpu.pipeline_mode<synchronous>, transform_indices = @transform_42, window_bounds = array<i64: 1, 64>}, {pipeline_mode = #tpu.pipeline_mode<synchronous>, transform_indices = @transform_43, window_bounds = array<i64: 64, 128>}, {pipeline_mode = #tpu.pipeline_mode<synchronous>, transform_indices = @transform_44, window_bounds = array<i64: 128, 64>}, {pipeline_mode = #tpu.pipeline_mode<synchronous>, transform_indices = @transform_45, window_bounds = array<i64: 64, 64>}, {pipeline_mode = #tpu.pipeline_mode<synchronous>, transform_indices = @transform_46, window_bounds = array<i64: 64, 64>}, {pipeline_mode = #tpu.pipeline_mode<synchronous>, transform_indices = @transform_47, window_bounds = array<i64: 64, 64>}, {pipeline_mode = #tpu.pipeline_mode<synchronous>, transform_indices = @transform_48, window_bounds = array<i64: 64, 64>}, {pipeline_mode = #tpu.pipeline_mode<synchronous>, transform_indices = @transform_49, window_bounds = array<i64: 18, 64>}, {pipeline_mode = #tpu.pipeline_mode<synchronous>, transform_indices = @transform_50, window_bounds = array<i64: 1, 64>}, {pipeline_mode = #tpu.pipeline_mode<synchronous>, transform_indices = @transform_51, window_bounds = array<i64: 64, 64>}, {pipeline_mode = #tpu.pipeline_mode<synchronous>, transform_indices = @transform_52, window_bounds = array<i64: 64, 64>}, {pipeline_mode = #tpu.pipeline_mode<synchronous>, transform_indices = @transform_53, window_bounds = array<i64: 64, 64>}, {pipeline_mode = #tpu.pipeline_mode<synchronous>, transform_indices = @transform_54, window_bounds = array<i64: 64, 64>}, {pipeline_mode = #tpu.pipeline_mode<synchronous>, transform_indices = @transform_55, window_bounds = array<i64: 16, 8>}]} {
    %c0 = arith.constant 0 : index
    %c0_0 = arith.constant 0 : index
    %0 = vector.load %arg1[%c0, %c0_0] : memref<16x18xf32, #tpu.memory_space<vmem>>, vector<16x18xf32>
    %c0_1 = arith.constant 0 : index
    %c0_2 = arith.constant 0 : index
    %1 = vector.load %arg2[%c0_1, %c0_2] : memref<16x16xf32, #tpu.memory_space<vmem>>, vector<16x16xf32>
    %c0_3 = arith.constant 0 : index
    %c0_4 = arith.constant 0 : index
    %2 = vector.load %arg3[%c0_3, %c0_4] : memref<16x16xf32, #tpu.memory_space<vmem>>, vector<16x16xf32>
    %c0_5 = arith.constant 0 : index
    %c0_6 = arith.constant 0 : index
    %3 = vector.load %arg4[%c0_5, %c0_6] : memref<16x16xf32, #tpu.memory_space<vmem>>, vector<16x16xf32>
    %c0_7 = arith.constant 0 : index
    %c0_8 = arith.constant 0 : index
    %4 = vector.load %arg5[%c0_7, %c0_8] : memref<16x16xf32, #tpu.memory_space<vmem>>, vector<16x16xf32>
    %c0_9 = arith.constant 0 : index
    %c0_10 = arith.constant 0 : index
    %5 = vector.load %arg6[%c0_9, %c0_10] : memref<16x16xf32, #tpu.memory_space<vmem>>, vector<16x16xf32>
    %c0_11 = arith.constant 0 : index
    %c0_12 = arith.constant 0 : index
    %c0_13 = arith.constant 0 : index
    %6 = vector.load %arg7[%c0_11, %c0_12, %c0_13] : memref<2x8x8xf32, #tpu.memory_space<vmem>>, vector<2x8x8xf32>
    %c0_14 = arith.constant 0 : index
    %c0_15 = arith.constant 0 : index
    %7 = vector.load %arg8[%c0_14, %c0_15] : memref<1x64xf32, #tpu.memory_space<vmem>>, vector<1x64xf32>
    %c0_16 = arith.constant 0 : index
    %c0_17 = arith.constant 0 : index
    %8 = vector.load %arg9[%c0_16, %c0_17] : memref<1x64xf32, #tpu.memory_space<vmem>>, vector<1x64xf32>
    %c0_18 = arith.constant 0 : index
    %c0_19 = arith.constant 0 : index
    %9 = vector.load %arg10[%c0_18, %c0_19] : memref<1x64xf32, #tpu.memory_space<vmem>>, vector<1x64xf32>
    %c0_20 = arith.constant 0 : index
    %c0_21 = arith.constant 0 : index
    %10 = vector.load %arg11[%c0_20, %c0_21] : memref<1x64xf32, #tpu.memory_space<vmem>>, vector<1x64xf32>
    %c0_22 = arith.constant 0 : index
    %c0_23 = arith.constant 0 : index
    %11 = vector.load %arg12[%c0_22, %c0_23] : memref<64x64xf32, #tpu.memory_space<vmem>>, vector<64x64xf32>
    %c0_24 = arith.constant 0 : index
    %c0_25 = arith.constant 0 : index
    %12 = vector.load %arg13[%c0_24, %c0_25] : memref<64x64xf32, #tpu.memory_space<vmem>>, vector<64x64xf32>
    %c0_26 = arith.constant 0 : index
    %c0_27 = arith.constant 0 : index
    %13 = vector.load %arg14[%c0_26, %c0_27] : memref<64x64xf32, #tpu.memory_space<vmem>>, vector<64x64xf32>
    %c0_28 = arith.constant 0 : index
    %c0_29 = arith.constant 0 : index
    %14 = vector.load %arg15[%c0_28, %c0_29] : memref<64x64xf32, #tpu.memory_space<vmem>>, vector<64x64xf32>
    %c0_30 = arith.constant 0 : index
    %c0_31 = arith.constant 0 : index
    %15 = vector.load %arg16[%c0_30, %c0_31] : memref<1x128xf32, #tpu.memory_space<vmem>>, vector<1x128xf32>
    %c0_32 = arith.constant 0 : index
    %c0_33 = arith.constant 0 : index
    %16 = vector.load %arg17[%c0_32, %c0_33] : memref<1x64xf32, #tpu.memory_space<vmem>>, vector<1x64xf32>
    %c0_34 = arith.constant 0 : index
    %c0_35 = arith.constant 0 : index
    %17 = vector.load %arg18[%c0_34, %c0_35] : memref<1x64xf32, #tpu.memory_space<vmem>>, vector<1x64xf32>
    %c0_36 = arith.constant 0 : index
    %c0_37 = arith.constant 0 : index
    %18 = vector.load %arg19[%c0_36, %c0_37] : memref<1x64xf32, #tpu.memory_space<vmem>>, vector<1x64xf32>
    %c0_38 = arith.constant 0 : index
    %c0_39 = arith.constant 0 : index
    %19 = vector.load %arg20[%c0_38, %c0_39] : memref<1x64xf32, #tpu.memory_space<vmem>>, vector<1x64xf32>
    %c0_40 = arith.constant 0 : index
    %c0_41 = arith.constant 0 : index
    %20 = vector.load %arg21[%c0_40, %c0_41] : memref<1x64xf32, #tpu.memory_space<vmem>>, vector<1x64xf32>
    %c0_42 = arith.constant 0 : index
    %c0_43 = arith.constant 0 : index
    %21 = vector.load %arg22[%c0_42, %c0_43] : memref<1x64xf32, #tpu.memory_space<vmem>>, vector<1x64xf32>
    %c0_44 = arith.constant 0 : index
    %c0_45 = arith.constant 0 : index
    %22 = vector.load %arg23[%c0_44, %c0_45] : memref<1x64xf32, #tpu.memory_space<vmem>>, vector<1x64xf32>
    %c0_46 = arith.constant 0 : index
    %c0_47 = arith.constant 0 : index
    %23 = vector.load %arg24[%c0_46, %c0_47] : memref<64x128xf32, #tpu.memory_space<vmem>>, vector<64x128xf32>
    %c0_48 = arith.constant 0 : index
    %c0_49 = arith.constant 0 : index
    %24 = vector.load %arg25[%c0_48, %c0_49] : memref<128x64xf32, #tpu.memory_space<vmem>>, vector<128x64xf32>
    %c0_50 = arith.constant 0 : index
    %c0_51 = arith.constant 0 : index
    %25 = vector.load %arg26[%c0_50, %c0_51] : memref<1x64xf32, #tpu.memory_space<vmem>>, vector<1x64xf32>
    %c0_52 = arith.constant 0 : index
    %c0_53 = arith.constant 0 : index
    %26 = vector.load %arg27[%c0_52, %c0_53] : memref<1x64xf32, #tpu.memory_space<vmem>>, vector<1x64xf32>
    %c0_54 = arith.constant 0 : index
    %c0_55 = arith.constant 0 : index
    %27 = vector.load %arg28[%c0_54, %c0_55] : memref<1x64xf32, #tpu.memory_space<vmem>>, vector<1x64xf32>
    %c0_56 = arith.constant 0 : index
    %c0_57 = arith.constant 0 : index
    %28 = vector.load %arg29[%c0_56, %c0_57] : memref<1x64xf32, #tpu.memory_space<vmem>>, vector<1x64xf32>
    %c0_58 = arith.constant 0 : index
    %c0_59 = arith.constant 0 : index
    %29 = vector.load %arg30[%c0_58, %c0_59] : memref<64x64xf32, #tpu.memory_space<vmem>>, vector<64x64xf32>
    %c0_60 = arith.constant 0 : index
    %c0_61 = arith.constant 0 : index
    %30 = vector.load %arg31[%c0_60, %c0_61] : memref<64x64xf32, #tpu.memory_space<vmem>>, vector<64x64xf32>
    %c0_62 = arith.constant 0 : index
    %c0_63 = arith.constant 0 : index
    %31 = vector.load %arg32[%c0_62, %c0_63] : memref<64x64xf32, #tpu.memory_space<vmem>>, vector<64x64xf32>
    %c0_64 = arith.constant 0 : index
    %c0_65 = arith.constant 0 : index
    %32 = vector.load %arg33[%c0_64, %c0_65] : memref<64x64xf32, #tpu.memory_space<vmem>>, vector<64x64xf32>
    %c0_66 = arith.constant 0 : index
    %c0_67 = arith.constant 0 : index
    %33 = vector.load %arg34[%c0_66, %c0_67] : memref<1x128xf32, #tpu.memory_space<vmem>>, vector<1x128xf32>
    %c0_68 = arith.constant 0 : index
    %c0_69 = arith.constant 0 : index
    %34 = vector.load %arg35[%c0_68, %c0_69] : memref<1x64xf32, #tpu.memory_space<vmem>>, vector<1x64xf32>
    %c0_70 = arith.constant 0 : index
    %c0_71 = arith.constant 0 : index
    %35 = vector.load %arg36[%c0_70, %c0_71] : memref<1x64xf32, #tpu.memory_space<vmem>>, vector<1x64xf32>
    %c0_72 = arith.constant 0 : index
    %c0_73 = arith.constant 0 : index
    %36 = vector.load %arg37[%c0_72, %c0_73] : memref<1x64xf32, #tpu.memory_space<vmem>>, vector<1x64xf32>
    %c0_74 = arith.constant 0 : index
    %c0_75 = arith.constant 0 : index
    %37 = vector.load %arg38[%c0_74, %c0_75] : memref<1x64xf32, #tpu.memory_space<vmem>>, vector<1x64xf32>
    %c0_76 = arith.constant 0 : index
    %c0_77 = arith.constant 0 : index
    %38 = vector.load %arg39[%c0_76, %c0_77] : memref<1x64xf32, #tpu.memory_space<vmem>>, vector<1x64xf32>
    %c0_78 = arith.constant 0 : index
    %c0_79 = arith.constant 0 : index
    %39 = vector.load %arg40[%c0_78, %c0_79] : memref<1x64xf32, #tpu.memory_space<vmem>>, vector<1x64xf32>
    %c0_80 = arith.constant 0 : index
    %c0_81 = arith.constant 0 : index
    %40 = vector.load %arg41[%c0_80, %c0_81] : memref<1x64xf32, #tpu.memory_space<vmem>>, vector<1x64xf32>
    %c0_82 = arith.constant 0 : index
    %c0_83 = arith.constant 0 : index
    %41 = vector.load %arg42[%c0_82, %c0_83] : memref<1x64xf32, #tpu.memory_space<vmem>>, vector<1x64xf32>
    %c0_84 = arith.constant 0 : index
    %c0_85 = arith.constant 0 : index
    %42 = vector.load %arg43[%c0_84, %c0_85] : memref<1x64xf32, #tpu.memory_space<vmem>>, vector<1x64xf32>
    %c0_86 = arith.constant 0 : index
    %c0_87 = arith.constant 0 : index
    %43 = vector.load %arg44[%c0_86, %c0_87] : memref<64x128xf32, #tpu.memory_space<vmem>>, vector<64x128xf32>
    %c0_88 = arith.constant 0 : index
    %c0_89 = arith.constant 0 : index
    %44 = vector.load %arg45[%c0_88, %c0_89] : memref<128x64xf32, #tpu.memory_space<vmem>>, vector<128x64xf32>
    %c0_90 = arith.constant 0 : index
    %c0_91 = arith.constant 0 : index
    %45 = vector.load %arg46[%c0_90, %c0_91] : memref<64x64xf32, #tpu.memory_space<vmem>>, vector<64x64xf32>
    %c0_92 = arith.constant 0 : index
    %c0_93 = arith.constant 0 : index
    %46 = vector.load %arg47[%c0_92, %c0_93] : memref<64x64xf32, #tpu.memory_space<vmem>>, vector<64x64xf32>
    %c0_94 = arith.constant 0 : index
    %c0_95 = arith.constant 0 : index
    %47 = vector.load %arg48[%c0_94, %c0_95] : memref<64x64xf32, #tpu.memory_space<vmem>>, vector<64x64xf32>
    %c0_96 = arith.constant 0 : index
    %c0_97 = arith.constant 0 : index
    %48 = vector.load %arg49[%c0_96, %c0_97] : memref<64x64xf32, #tpu.memory_space<vmem>>, vector<64x64xf32>
    %c0_98 = arith.constant 0 : index
    %c0_99 = arith.constant 0 : index
    %49 = vector.load %arg50[%c0_98, %c0_99] : memref<18x64xf32, #tpu.memory_space<vmem>>, vector<18x64xf32>
    %c0_100 = arith.constant 0 : index
    %c0_101 = arith.constant 0 : index
    %50 = vector.load %arg51[%c0_100, %c0_101] : memref<1x64xf32, #tpu.memory_space<vmem>>, vector<1x64xf32>
    %c0_102 = arith.constant 0 : index
    %c0_103 = arith.constant 0 : index
    %51 = vector.load %arg52[%c0_102, %c0_103] : memref<64x64xf32, #tpu.memory_space<vmem>>, vector<64x64xf32>
    %c0_104 = arith.constant 0 : index
    %c0_105 = arith.constant 0 : index
    %52 = vector.load %arg53[%c0_104, %c0_105] : memref<64x64xf32, #tpu.memory_space<vmem>>, vector<64x64xf32>
    %c0_106 = arith.constant 0 : index
    %c0_107 = arith.constant 0 : index
    %53 = vector.load %arg54[%c0_106, %c0_107] : memref<64x64xf32, #tpu.memory_space<vmem>>, vector<64x64xf32>
    %c0_108 = arith.constant 0 : index
    %c0_109 = arith.constant 0 : index
    %54 = vector.load %arg55[%c0_108, %c0_109] : memref<64x64xf32, #tpu.memory_space<vmem>>, vector<64x64xf32>
    %55 = tpu.iota {dimensions = array<i32: 1>} : vector<16x64xi32>
    %c0_i32 = arith.constant 0 : i32
    %56 = vector.broadcast %c0_i32 : i32 to vector<16x64xi32>
    %57 = arith.cmpi sge, %55, %56 : vector<16x64xi32>
    %c32_i32 = arith.constant 32 : i32
    %58 = vector.broadcast %c32_i32 : i32 to vector<16x64xi32>
    %59 = arith.cmpi slt, %55, %58 : vector<16x64xi32>
    %60 = arith.andi %57, %59 : vector<16x64xi1>
    %61 = arith.extui %60 : vector<16x64xi1> to vector<16x64xi32>
    %62 = arith.sitofp %61 : vector<16x64xi32> to vector<16x64xf32>
    %c32_i32_110 = arith.constant 32 : i32
    %63 = vector.broadcast %c32_i32_110 : i32 to vector<16x64xi32>
    %64 = arith.cmpi sge, %55, %63 : vector<16x64xi32>
    %c64_i32 = arith.constant 64 : i32
    %65 = vector.broadcast %c64_i32 : i32 to vector<16x64xi32>
    %66 = arith.cmpi slt, %55, %65 : vector<16x64xi32>
    %67 = arith.andi %64, %66 : vector<16x64xi1>
    %68 = arith.extui %67 : vector<16x64xi1> to vector<16x64xi32>
    %69 = arith.sitofp %68 : vector<16x64xi32> to vector<16x64xf32>
    %cst = arith.constant dense<0.000000e+00> : vector<16x64xf32>
    %70 = tpu.matmul %0, %49, %cst {dimension_numbers = #tpu.dot_dimension_numbers<[1], [0], [0], [1], [0, 0, 1, 1], [], []>} : vector<16x18xf32>, vector<18x64xf32>, vector<16x64xf32> -> vector<16x64xf32>
    %cst_111 = arith.constant dense<0.000000e+00> : vector<16x64xf32>
    %71 = tpu.matmul %70, %47, %cst_111 {dimension_numbers = #tpu.dot_dimension_numbers<[1], [0], [0], [1], [0, 0, 1, 1], [], []>} : vector<16x64xf32>, vector<64x64xf32>, vector<16x64xf32> -> vector<16x64xf32>
    %72 = vector.broadcast %37 : vector<1x64xf32> to vector<16x64xf32>
    %73 = arith.addf %71, %72 : vector<16x64xf32>
    %cst_112 = arith.constant dense<0.000000e+00> : vector<16x64xf32>
    %74 = tpu.matmul %70, %45, %cst_112 {dimension_numbers = #tpu.dot_dimension_numbers<[1], [0], [0], [1], [0, 0, 1, 1], [], []>} : vector<16x64xf32>, vector<64x64xf32>, vector<16x64xf32> -> vector<16x64xf32>
    %75 = vector.broadcast %35 : vector<1x64xf32> to vector<16x64xf32>
    %76 = arith.addf %74, %75 : vector<16x64xf32>
    %cst_113 = arith.constant dense<0.000000e+00> : vector<16x64xf32>
    %77 = tpu.matmul %70, %48, %cst_113 {dimension_numbers = #tpu.dot_dimension_numbers<[1], [0], [0], [1], [0, 0, 1, 1], [], []>} : vector<16x64xf32>, vector<64x64xf32>, vector<16x64xf32> -> vector<16x64xf32>
    %78 = vector.broadcast %38 : vector<1x64xf32> to vector<16x64xf32>
    %79 = arith.addf %77, %78 : vector<16x64xf32>
    %80 = arith.mulf %73, %62 : vector<16x64xf32>
    %cst_114 = arith.constant dense<0.000000e+00> : vector<16x16xf32>
    %81 = tpu.matmul %80, %76, %cst_114 {dimension_numbers = #tpu.dot_dimension_numbers<[1], [1], [0], [0], [0, 0, 1, 0], [], []>} : vector<16x64xf32>, vector<16x64xf32>, vector<16x16xf32> -> vector<16x16xf32>
    %82 = arith.addf %81, %3 : vector<16x16xf32>
    %cst_115 = arith.constant dense<0xFF800000> : vector<16xf32>
    %83 = vector.multi_reduction <maximumf>, %82, %cst_115 [1] : vector<16x16xf32> to vector<16xf32>
    %84 = vector.shape_cast %83 : vector<16xf32> to vector<16x1xf32>
    %85 = vector.broadcast %84 : vector<16x1xf32> to vector<16x16xf32>
    %86 = arith.subf %82, %85 : vector<16x16xf32>
    %87 = math.exp %86 : vector<16x16xf32>
    %cst_116 = arith.constant dense<0.000000e+00> : vector<16xf32>
    %88 = vector.multi_reduction <add>, %87, %cst_116 [1] : vector<16x16xf32> to vector<16xf32>
    %89 = vector.shape_cast %88 : vector<16xf32> to vector<16x1xf32>
    %90 = tpu.reciprocal %89 {approx = true} : vector<16x1xf32> -> vector<16x1xf32>
    %91 = vector.broadcast %90 : vector<16x1xf32> to vector<16x16xf32>
    %92 = arith.mulf %87, %91 : vector<16x16xf32>
    %93 = arith.mulf %79, %62 : vector<16x64xf32>
    %cst_117 = arith.constant dense<0.000000e+00> : vector<16x64xf32>
    %94 = tpu.matmul %92, %93, %cst_117 {dimension_numbers = #tpu.dot_dimension_numbers<[1], [0], [0], [1], [0, 0, 1, 1], [], []>} : vector<16x16xf32>, vector<16x64xf32>, vector<16x64xf32> -> vector<16x64xf32>
    %95 = arith.mulf %73, %69 : vector<16x64xf32>
    %cst_118 = arith.constant dense<0.000000e+00> : vector<16x16xf32>
    %96 = tpu.matmul %95, %76, %cst_118 {dimension_numbers = #tpu.dot_dimension_numbers<[1], [1], [0], [0], [0, 0, 1, 0], [], []>} : vector<16x64xf32>, vector<16x64xf32>, vector<16x16xf32> -> vector<16x16xf32>
    %97 = arith.addf %96, %3 : vector<16x16xf32>
    %cst_119 = arith.constant dense<0xFF800000> : vector<16xf32>
    %98 = vector.multi_reduction <maximumf>, %97, %cst_119 [1] : vector<16x16xf32> to vector<16xf32>
    %99 = vector.shape_cast %98 : vector<16xf32> to vector<16x1xf32>
    %100 = vector.broadcast %99 : vector<16x1xf32> to vector<16x16xf32>
    %101 = arith.subf %97, %100 : vector<16x16xf32>
    %102 = math.exp %101 : vector<16x16xf32>
    %cst_120 = arith.constant dense<0.000000e+00> : vector<16xf32>
    %103 = vector.multi_reduction <add>, %102, %cst_120 [1] : vector<16x16xf32> to vector<16xf32>
    %104 = vector.shape_cast %103 : vector<16xf32> to vector<16x1xf32>
    %105 = tpu.reciprocal %104 {approx = true} : vector<16x1xf32> -> vector<16x1xf32>
    %106 = vector.broadcast %105 : vector<16x1xf32> to vector<16x16xf32>
    %107 = arith.mulf %102, %106 : vector<16x16xf32>
    %108 = arith.mulf %79, %69 : vector<16x64xf32>
    %cst_121 = arith.constant dense<0.000000e+00> : vector<16x64xf32>
    %109 = tpu.matmul %107, %108, %cst_121 {dimension_numbers = #tpu.dot_dimension_numbers<[1], [0], [0], [1], [0, 0, 1, 1], [], []>} : vector<16x16xf32>, vector<16x64xf32>, vector<16x64xf32> -> vector<16x64xf32>
    %110 = arith.addf %94, %109 : vector<16x64xf32>
    %cst_122 = arith.constant dense<0.000000e+00> : vector<16x64xf32>
    %111 = tpu.matmul %110, %46, %cst_122 {dimension_numbers = #tpu.dot_dimension_numbers<[1], [0], [0], [1], [0, 0, 1, 1], [], []>} : vector<16x64xf32>, vector<64x64xf32>, vector<16x64xf32> -> vector<16x64xf32>
    %112 = vector.broadcast %36 : vector<1x64xf32> to vector<16x64xf32>
    %113 = arith.addf %111, %112 : vector<16x64xf32>
    %114 = arith.addf %70, %113 : vector<16x64xf32>
    %cst_123 = arith.constant dense<0.000000e+00> : vector<16xf32>
    %115 = vector.multi_reduction <add>, %114, %cst_123 [1] : vector<16x64xf32> to vector<16xf32>
    %116 = vector.shape_cast %115 : vector<16xf32> to vector<16x1xf32>
    %cst_124 = arith.constant 6.400000e+01 : f32
    %117 = vector.broadcast %cst_124 : f32 to vector<16x1xf32>
    %118 = arith.divf %116, %117 : vector<16x1xf32>
    %119 = vector.broadcast %118 : vector<16x1xf32> to vector<16x64xf32>
    %120 = arith.subf %114, %119 : vector<16x64xf32>
    %121 = arith.mulf %120, %120 : vector<16x64xf32>
    %cst_125 = arith.constant dense<0.000000e+00> : vector<16xf32>
    %122 = vector.multi_reduction <add>, %121, %cst_125 [1] : vector<16x64xf32> to vector<16xf32>
    %123 = vector.shape_cast %122 : vector<16xf32> to vector<16x1xf32>
    %cst_126 = arith.constant 6.400000e+01 : f32
    %124 = vector.broadcast %cst_126 : f32 to vector<16x1xf32>
    %125 = arith.divf %123, %124 : vector<16x1xf32>
    %cst_127 = arith.constant 9.99999974E-6 : f32
    %126 = vector.broadcast %cst_127 : f32 to vector<16x1xf32>
    %127 = arith.addf %125, %126 : vector<16x1xf32>
    %128 = math.rsqrt %127 : vector<16x1xf32>
    %129 = vector.broadcast %128 : vector<16x1xf32> to vector<16x64xf32>
    %130 = arith.mulf %120, %129 : vector<16x64xf32>
    %131 = vector.broadcast %40 : vector<1x64xf32> to vector<16x64xf32>
    %132 = arith.mulf %130, %131 : vector<16x64xf32>
    %133 = vector.broadcast %39 : vector<1x64xf32> to vector<16x64xf32>
    %134 = arith.addf %132, %133 : vector<16x64xf32>
    %cst_128 = arith.constant dense<0.000000e+00> : vector<16x128xf32>
    %135 = tpu.matmul %134, %43, %cst_128 {dimension_numbers = #tpu.dot_dimension_numbers<[1], [0], [0], [1], [0, 0, 1, 1], [], []>} : vector<16x64xf32>, vector<64x128xf32>, vector<16x128xf32> -> vector<16x128xf32>
    %136 = vector.broadcast %33 : vector<1x128xf32> to vector<16x128xf32>
    %137 = arith.addf %135, %136 : vector<16x128xf32>
    %cst_129 = arith.constant 0.000000e+00 : f32
    %138 = vector.broadcast %cst_129 : f32 to vector<16x128xf32>
    %139 = arith.maximumf %137, %138 : vector<16x128xf32>
    %cst_130 = arith.constant dense<0.000000e+00> : vector<16x64xf32>
    %140 = tpu.matmul %139, %44, %cst_130 {dimension_numbers = #tpu.dot_dimension_numbers<[1], [0], [0], [1], [0, 0, 1, 1], [], []>} : vector<16x128xf32>, vector<128x64xf32>, vector<16x64xf32> -> vector<16x64xf32>
    %141 = vector.broadcast %34 : vector<1x64xf32> to vector<16x64xf32>
    %142 = arith.addf %140, %141 : vector<16x64xf32>
    %143 = arith.addf %134, %142 : vector<16x64xf32>
    %cst_131 = arith.constant dense<0.000000e+00> : vector<16xf32>
    %144 = vector.multi_reduction <add>, %143, %cst_131 [1] : vector<16x64xf32> to vector<16xf32>
    %145 = vector.shape_cast %144 : vector<16xf32> to vector<16x1xf32>
    %cst_132 = arith.constant 6.400000e+01 : f32
    %146 = vector.broadcast %cst_132 : f32 to vector<16x1xf32>
    %147 = arith.divf %145, %146 : vector<16x1xf32>
    %148 = vector.broadcast %147 : vector<16x1xf32> to vector<16x64xf32>
    %149 = arith.subf %143, %148 : vector<16x64xf32>
    %150 = arith.mulf %149, %149 : vector<16x64xf32>
    %cst_133 = arith.constant dense<0.000000e+00> : vector<16xf32>
    %151 = vector.multi_reduction <add>, %150, %cst_133 [1] : vector<16x64xf32> to vector<16xf32>
    %152 = vector.shape_cast %151 : vector<16xf32> to vector<16x1xf32>
    %cst_134 = arith.constant 6.400000e+01 : f32
    %153 = vector.broadcast %cst_134 : f32 to vector<16x1xf32>
    %154 = arith.divf %152, %153 : vector<16x1xf32>
    %cst_135 = arith.constant 9.99999974E-6 : f32
    %155 = vector.broadcast %cst_135 : f32 to vector<16x1xf32>
    %156 = arith.addf %154, %155 : vector<16x1xf32>
    %157 = math.rsqrt %156 : vector<16x1xf32>
    %158 = vector.broadcast %157 : vector<16x1xf32> to vector<16x64xf32>
    %159 = arith.mulf %149, %158 : vector<16x64xf32>
    %160 = vector.broadcast %42 : vector<1x64xf32> to vector<16x64xf32>
    %161 = arith.mulf %159, %160 : vector<16x64xf32>
    %162 = vector.broadcast %41 : vector<1x64xf32> to vector<16x64xf32>
    %163 = arith.addf %161, %162 : vector<16x64xf32>
    %cst_136 = arith.constant dense<0.000000e+00> : vector<16x64xf32>
    %164 = tpu.matmul %1, %163, %cst_136 {dimension_numbers = #tpu.dot_dimension_numbers<[1], [0], [0], [1], [0, 0, 1, 1], [], []>} : vector<16x16xf32>, vector<16x64xf32>, vector<16x64xf32> -> vector<16x64xf32>
    %cst_137 = arith.constant dense<0.000000e+00> : vector<16x64xf32>
    %165 = tpu.matmul %2, %163, %cst_137 {dimension_numbers = #tpu.dot_dimension_numbers<[1], [0], [0], [1], [0, 0, 1, 1], [], []>} : vector<16x16xf32>, vector<16x64xf32>, vector<16x64xf32> -> vector<16x64xf32>
    %cst_138 = arith.constant dense<0.000000e+00> : vector<16x64xf32>
    %166 = tpu.matmul %164, %53, %cst_138 {dimension_numbers = #tpu.dot_dimension_numbers<[1], [0], [0], [1], [0, 0, 1, 1], [], []>} : vector<16x64xf32>, vector<64x64xf32>, vector<16x64xf32> -> vector<16x64xf32>
    %cst_139 = arith.constant dense<0.000000e+00> : vector<16x64xf32>
    %167 = tpu.matmul %165, %54, %cst_139 {dimension_numbers = #tpu.dot_dimension_numbers<[1], [0], [0], [1], [0, 0, 1, 1], [], []>} : vector<16x64xf32>, vector<64x64xf32>, vector<16x64xf32> -> vector<16x64xf32>
    %168 = arith.addf %166, %167 : vector<16x64xf32>
    %cst_140 = arith.constant dense<0.000000e+00> : vector<16x64xf32>
    %169 = tpu.matmul %168, %31, %cst_140 {dimension_numbers = #tpu.dot_dimension_numbers<[1], [0], [0], [1], [0, 0, 1, 1], [], []>} : vector<16x64xf32>, vector<64x64xf32>, vector<16x64xf32> -> vector<16x64xf32>
    %170 = vector.broadcast %27 : vector<1x64xf32> to vector<16x64xf32>
    %171 = arith.addf %169, %170 : vector<16x64xf32>
    %cst_141 = arith.constant dense<0.000000e+00> : vector<16x64xf32>
    %172 = tpu.matmul %168, %29, %cst_141 {dimension_numbers = #tpu.dot_dimension_numbers<[1], [0], [0], [1], [0, 0, 1, 1], [], []>} : vector<16x64xf32>, vector<64x64xf32>, vector<16x64xf32> -> vector<16x64xf32>
    %173 = vector.broadcast %25 : vector<1x64xf32> to vector<16x64xf32>
    %174 = arith.addf %172, %173 : vector<16x64xf32>
    %cst_142 = arith.constant dense<0.000000e+00> : vector<16x64xf32>
    %175 = tpu.matmul %168, %32, %cst_142 {dimension_numbers = #tpu.dot_dimension_numbers<[1], [0], [0], [1], [0, 0, 1, 1], [], []>} : vector<16x64xf32>, vector<64x64xf32>, vector<16x64xf32> -> vector<16x64xf32>
    %176 = vector.broadcast %28 : vector<1x64xf32> to vector<16x64xf32>
    %177 = arith.addf %175, %176 : vector<16x64xf32>
    %178 = arith.mulf %171, %62 : vector<16x64xf32>
    %cst_143 = arith.constant dense<0.000000e+00> : vector<16x16xf32>
    %179 = tpu.matmul %178, %174, %cst_143 {dimension_numbers = #tpu.dot_dimension_numbers<[1], [1], [0], [0], [0, 0, 1, 0], [], []>} : vector<16x64xf32>, vector<16x64xf32>, vector<16x16xf32> -> vector<16x16xf32>
    %180 = arith.addf %179, %4 : vector<16x16xf32>
    %cst_144 = arith.constant dense<0xFF800000> : vector<16xf32>
    %181 = vector.multi_reduction <maximumf>, %180, %cst_144 [1] : vector<16x16xf32> to vector<16xf32>
    %182 = vector.shape_cast %181 : vector<16xf32> to vector<16x1xf32>
    %183 = vector.broadcast %182 : vector<16x1xf32> to vector<16x16xf32>
    %184 = arith.subf %180, %183 : vector<16x16xf32>
    %185 = math.exp %184 : vector<16x16xf32>
    %cst_145 = arith.constant dense<0.000000e+00> : vector<16xf32>
    %186 = vector.multi_reduction <add>, %185, %cst_145 [1] : vector<16x16xf32> to vector<16xf32>
    %187 = vector.shape_cast %186 : vector<16xf32> to vector<16x1xf32>
    %188 = tpu.reciprocal %187 {approx = true} : vector<16x1xf32> -> vector<16x1xf32>
    %189 = vector.broadcast %188 : vector<16x1xf32> to vector<16x16xf32>
    %190 = arith.mulf %185, %189 : vector<16x16xf32>
    %191 = arith.mulf %177, %62 : vector<16x64xf32>
    %cst_146 = arith.constant dense<0.000000e+00> : vector<16x64xf32>
    %192 = tpu.matmul %190, %191, %cst_146 {dimension_numbers = #tpu.dot_dimension_numbers<[1], [0], [0], [1], [0, 0, 1, 1], [], []>} : vector<16x16xf32>, vector<16x64xf32>, vector<16x64xf32> -> vector<16x64xf32>
    %193 = arith.mulf %171, %69 : vector<16x64xf32>
    %cst_147 = arith.constant dense<0.000000e+00> : vector<16x16xf32>
    %194 = tpu.matmul %193, %174, %cst_147 {dimension_numbers = #tpu.dot_dimension_numbers<[1], [1], [0], [0], [0, 0, 1, 0], [], []>} : vector<16x64xf32>, vector<16x64xf32>, vector<16x16xf32> -> vector<16x16xf32>
    %195 = arith.addf %194, %4 : vector<16x16xf32>
    %cst_148 = arith.constant dense<0xFF800000> : vector<16xf32>
    %196 = vector.multi_reduction <maximumf>, %195, %cst_148 [1] : vector<16x16xf32> to vector<16xf32>
    %197 = vector.shape_cast %196 : vector<16xf32> to vector<16x1xf32>
    %198 = vector.broadcast %197 : vector<16x1xf32> to vector<16x16xf32>
    %199 = arith.subf %195, %198 : vector<16x16xf32>
    %200 = math.exp %199 : vector<16x16xf32>
    %cst_149 = arith.constant dense<0.000000e+00> : vector<16xf32>
    %201 = vector.multi_reduction <add>, %200, %cst_149 [1] : vector<16x16xf32> to vector<16xf32>
    %202 = vector.shape_cast %201 : vector<16xf32> to vector<16x1xf32>
    %203 = tpu.reciprocal %202 {approx = true} : vector<16x1xf32> -> vector<16x1xf32>
    %204 = vector.broadcast %203 : vector<16x1xf32> to vector<16x16xf32>
    %205 = arith.mulf %200, %204 : vector<16x16xf32>
    %206 = arith.mulf %177, %69 : vector<16x64xf32>
    %cst_150 = arith.constant dense<0.000000e+00> : vector<16x64xf32>
    %207 = tpu.matmul %205, %206, %cst_150 {dimension_numbers = #tpu.dot_dimension_numbers<[1], [0], [0], [1], [0, 0, 1, 1], [], []>} : vector<16x16xf32>, vector<16x64xf32>, vector<16x64xf32> -> vector<16x64xf32>
    %208 = arith.addf %192, %207 : vector<16x64xf32>
    %cst_151 = arith.constant dense<0.000000e+00> : vector<16x64xf32>
    %209 = tpu.matmul %208, %30, %cst_151 {dimension_numbers = #tpu.dot_dimension_numbers<[1], [0], [0], [1], [0, 0, 1, 1], [], []>} : vector<16x64xf32>, vector<64x64xf32>, vector<16x64xf32> -> vector<16x64xf32>
    %210 = vector.broadcast %26 : vector<1x64xf32> to vector<16x64xf32>
    %211 = arith.addf %209, %210 : vector<16x64xf32>
    %212 = arith.addf %168, %211 : vector<16x64xf32>
    %cst_152 = arith.constant dense<0.000000e+00> : vector<16xf32>
    %213 = vector.multi_reduction <add>, %212, %cst_152 [1] : vector<16x64xf32> to vector<16xf32>
    %214 = vector.shape_cast %213 : vector<16xf32> to vector<16x1xf32>
    %cst_153 = arith.constant 6.400000e+01 : f32
    %215 = vector.broadcast %cst_153 : f32 to vector<16x1xf32>
    %216 = arith.divf %214, %215 : vector<16x1xf32>
    %217 = vector.broadcast %216 : vector<16x1xf32> to vector<16x64xf32>
    %218 = arith.subf %212, %217 : vector<16x64xf32>
    %219 = arith.mulf %218, %218 : vector<16x64xf32>
    %cst_154 = arith.constant dense<0.000000e+00> : vector<16xf32>
    %220 = vector.multi_reduction <add>, %219, %cst_154 [1] : vector<16x64xf32> to vector<16xf32>
    %221 = vector.shape_cast %220 : vector<16xf32> to vector<16x1xf32>
    %cst_155 = arith.constant 6.400000e+01 : f32
    %222 = vector.broadcast %cst_155 : f32 to vector<16x1xf32>
    %223 = arith.divf %221, %222 : vector<16x1xf32>
    %cst_156 = arith.constant 9.99999974E-6 : f32
    %224 = vector.broadcast %cst_156 : f32 to vector<16x1xf32>
    %225 = arith.addf %223, %224 : vector<16x1xf32>
    %226 = math.rsqrt %225 : vector<16x1xf32>
    %227 = vector.broadcast %226 : vector<16x1xf32> to vector<16x64xf32>
    %228 = arith.mulf %218, %227 : vector<16x64xf32>
    %229 = vector.broadcast %18 : vector<1x64xf32> to vector<16x64xf32>
    %230 = arith.mulf %228, %229 : vector<16x64xf32>
    %231 = vector.broadcast %17 : vector<1x64xf32> to vector<16x64xf32>
    %232 = arith.addf %230, %231 : vector<16x64xf32>
    %cst_157 = arith.constant dense<0.000000e+00> : vector<16x64xf32>
    %233 = tpu.matmul %232, %13, %cst_157 {dimension_numbers = #tpu.dot_dimension_numbers<[1], [0], [0], [1], [0, 0, 1, 1], [], []>} : vector<16x64xf32>, vector<64x64xf32>, vector<16x64xf32> -> vector<16x64xf32>
    %234 = vector.broadcast %9 : vector<1x64xf32> to vector<16x64xf32>
    %235 = arith.addf %233, %234 : vector<16x64xf32>
    %cst_158 = arith.constant dense<0.000000e+00> : vector<16x64xf32>
    %236 = tpu.matmul %163, %11, %cst_158 {dimension_numbers = #tpu.dot_dimension_numbers<[1], [0], [0], [1], [0, 0, 1, 1], [], []>} : vector<16x64xf32>, vector<64x64xf32>, vector<16x64xf32> -> vector<16x64xf32>
    %237 = vector.broadcast %7 : vector<1x64xf32> to vector<16x64xf32>
    %238 = arith.addf %236, %237 : vector<16x64xf32>
    %cst_159 = arith.constant dense<0.000000e+00> : vector<16x64xf32>
    %239 = tpu.matmul %163, %14, %cst_159 {dimension_numbers = #tpu.dot_dimension_numbers<[1], [0], [0], [1], [0, 0, 1, 1], [], []>} : vector<16x64xf32>, vector<64x64xf32>, vector<16x64xf32> -> vector<16x64xf32>
    %240 = vector.broadcast %10 : vector<1x64xf32> to vector<16x64xf32>
    %241 = arith.addf %239, %240 : vector<16x64xf32>
    %242 = arith.mulf %235, %62 : vector<16x64xf32>
    %cst_160 = arith.constant dense<0.000000e+00> : vector<16x16xf32>
    %243 = tpu.matmul %242, %238, %cst_160 {dimension_numbers = #tpu.dot_dimension_numbers<[1], [1], [0], [0], [0, 0, 1, 0], [], []>} : vector<16x64xf32>, vector<16x64xf32>, vector<16x16xf32> -> vector<16x16xf32>
    %244 = arith.addf %243, %5 : vector<16x16xf32>
    %cst_161 = arith.constant dense<0xFF800000> : vector<16xf32>
    %245 = vector.multi_reduction <maximumf>, %244, %cst_161 [1] : vector<16x16xf32> to vector<16xf32>
    %246 = vector.shape_cast %245 : vector<16xf32> to vector<16x1xf32>
    %247 = vector.broadcast %246 : vector<16x1xf32> to vector<16x16xf32>
    %248 = arith.subf %244, %247 : vector<16x16xf32>
    %249 = math.exp %248 : vector<16x16xf32>
    %cst_162 = arith.constant dense<0.000000e+00> : vector<16xf32>
    %250 = vector.multi_reduction <add>, %249, %cst_162 [1] : vector<16x16xf32> to vector<16xf32>
    %251 = vector.shape_cast %250 : vector<16xf32> to vector<16x1xf32>
    %252 = tpu.reciprocal %251 {approx = true} : vector<16x1xf32> -> vector<16x1xf32>
    %253 = vector.broadcast %252 : vector<16x1xf32> to vector<16x16xf32>
    %254 = arith.mulf %249, %253 : vector<16x16xf32>
    %255 = arith.mulf %241, %62 : vector<16x64xf32>
    %cst_163 = arith.constant dense<0.000000e+00> : vector<16x64xf32>
    %256 = tpu.matmul %254, %255, %cst_163 {dimension_numbers = #tpu.dot_dimension_numbers<[1], [0], [0], [1], [0, 0, 1, 1], [], []>} : vector<16x16xf32>, vector<16x64xf32>, vector<16x64xf32> -> vector<16x64xf32>
    %257 = arith.mulf %235, %69 : vector<16x64xf32>
    %cst_164 = arith.constant dense<0.000000e+00> : vector<16x16xf32>
    %258 = tpu.matmul %257, %238, %cst_164 {dimension_numbers = #tpu.dot_dimension_numbers<[1], [1], [0], [0], [0, 0, 1, 0], [], []>} : vector<16x64xf32>, vector<16x64xf32>, vector<16x16xf32> -> vector<16x16xf32>
    %259 = arith.addf %258, %5 : vector<16x16xf32>
    %cst_165 = arith.constant dense<0xFF800000> : vector<16xf32>
    %260 = vector.multi_reduction <maximumf>, %259, %cst_165 [1] : vector<16x16xf32> to vector<16xf32>
    %261 = vector.shape_cast %260 : vector<16xf32> to vector<16x1xf32>
    %262 = vector.broadcast %261 : vector<16x1xf32> to vector<16x16xf32>
    %263 = arith.subf %259, %262 : vector<16x16xf32>
    %264 = math.exp %263 : vector<16x16xf32>
    %cst_166 = arith.constant dense<0.000000e+00> : vector<16xf32>
    %265 = vector.multi_reduction <add>, %264, %cst_166 [1] : vector<16x16xf32> to vector<16xf32>
    %266 = vector.shape_cast %265 : vector<16xf32> to vector<16x1xf32>
    %267 = tpu.reciprocal %266 {approx = true} : vector<16x1xf32> -> vector<16x1xf32>
    %268 = vector.broadcast %267 : vector<16x1xf32> to vector<16x16xf32>
    %269 = arith.mulf %264, %268 : vector<16x16xf32>
    %270 = arith.mulf %241, %69 : vector<16x64xf32>
    %cst_167 = arith.constant dense<0.000000e+00> : vector<16x64xf32>
    %271 = tpu.matmul %269, %270, %cst_167 {dimension_numbers = #tpu.dot_dimension_numbers<[1], [0], [0], [1], [0, 0, 1, 1], [], []>} : vector<16x16xf32>, vector<16x64xf32>, vector<16x64xf32> -> vector<16x64xf32>
    %272 = arith.addf %256, %271 : vector<16x64xf32>
    %cst_168 = arith.constant dense<0.000000e+00> : vector<16x64xf32>
    %273 = tpu.matmul %272, %12, %cst_168 {dimension_numbers = #tpu.dot_dimension_numbers<[1], [0], [0], [1], [0, 0, 1, 1], [], []>} : vector<16x64xf32>, vector<64x64xf32>, vector<16x64xf32> -> vector<16x64xf32>
    %274 = vector.broadcast %8 : vector<1x64xf32> to vector<16x64xf32>
    %275 = arith.addf %273, %274 : vector<16x64xf32>
    %276 = arith.addf %232, %275 : vector<16x64xf32>
    %cst_169 = arith.constant dense<0.000000e+00> : vector<16xf32>
    %277 = vector.multi_reduction <add>, %276, %cst_169 [1] : vector<16x64xf32> to vector<16xf32>
    %278 = vector.shape_cast %277 : vector<16xf32> to vector<16x1xf32>
    %cst_170 = arith.constant 6.400000e+01 : f32
    %279 = vector.broadcast %cst_170 : f32 to vector<16x1xf32>
    %280 = arith.divf %278, %279 : vector<16x1xf32>
    %281 = vector.broadcast %280 : vector<16x1xf32> to vector<16x64xf32>
    %282 = arith.subf %276, %281 : vector<16x64xf32>
    %283 = arith.mulf %282, %282 : vector<16x64xf32>
    %cst_171 = arith.constant dense<0.000000e+00> : vector<16xf32>
    %284 = vector.multi_reduction <add>, %283, %cst_171 [1] : vector<16x64xf32> to vector<16xf32>
    %285 = vector.shape_cast %284 : vector<16xf32> to vector<16x1xf32>
    %cst_172 = arith.constant 6.400000e+01 : f32
    %286 = vector.broadcast %cst_172 : f32 to vector<16x1xf32>
    %287 = arith.divf %285, %286 : vector<16x1xf32>
    %cst_173 = arith.constant 9.99999974E-6 : f32
    %288 = vector.broadcast %cst_173 : f32 to vector<16x1xf32>
    %289 = arith.addf %287, %288 : vector<16x1xf32>
    %290 = math.rsqrt %289 : vector<16x1xf32>
    %291 = vector.broadcast %290 : vector<16x1xf32> to vector<16x64xf32>
    %292 = arith.mulf %282, %291 : vector<16x64xf32>
    %293 = vector.broadcast %20 : vector<1x64xf32> to vector<16x64xf32>
    %294 = arith.mulf %292, %293 : vector<16x64xf32>
    %295 = vector.broadcast %19 : vector<1x64xf32> to vector<16x64xf32>
    %296 = arith.addf %294, %295 : vector<16x64xf32>
    %cst_174 = arith.constant dense<0.000000e+00> : vector<16x128xf32>
    %297 = tpu.matmul %296, %23, %cst_174 {dimension_numbers = #tpu.dot_dimension_numbers<[1], [0], [0], [1], [0, 0, 1, 1], [], []>} : vector<16x64xf32>, vector<64x128xf32>, vector<16x128xf32> -> vector<16x128xf32>
    %298 = vector.broadcast %15 : vector<1x128xf32> to vector<16x128xf32>
    %299 = arith.addf %297, %298 : vector<16x128xf32>
    %cst_175 = arith.constant 0.000000e+00 : f32
    %300 = vector.broadcast %cst_175 : f32 to vector<16x128xf32>
    %301 = arith.maximumf %299, %300 : vector<16x128xf32>
    %cst_176 = arith.constant dense<0.000000e+00> : vector<16x64xf32>
    %302 = tpu.matmul %301, %24, %cst_176 {dimension_numbers = #tpu.dot_dimension_numbers<[1], [0], [0], [1], [0, 0, 1, 1], [], []>} : vector<16x128xf32>, vector<128x64xf32>, vector<16x64xf32> -> vector<16x64xf32>
    %303 = vector.broadcast %16 : vector<1x64xf32> to vector<16x64xf32>
    %304 = arith.addf %302, %303 : vector<16x64xf32>
    %305 = arith.addf %296, %304 : vector<16x64xf32>
    %cst_177 = arith.constant dense<0.000000e+00> : vector<16xf32>
    %306 = vector.multi_reduction <add>, %305, %cst_177 [1] : vector<16x64xf32> to vector<16xf32>
    %307 = vector.shape_cast %306 : vector<16xf32> to vector<16x1xf32>
    %cst_178 = arith.constant 6.400000e+01 : f32
    %308 = vector.broadcast %cst_178 : f32 to vector<16x1xf32>
    %309 = arith.divf %307, %308 : vector<16x1xf32>
    %310 = vector.broadcast %309 : vector<16x1xf32> to vector<16x64xf32>
    %311 = arith.subf %305, %310 : vector<16x64xf32>
    %312 = arith.mulf %311, %311 : vector<16x64xf32>
    %cst_179 = arith.constant dense<0.000000e+00> : vector<16xf32>
    %313 = vector.multi_reduction <add>, %312, %cst_179 [1] : vector<16x64xf32> to vector<16xf32>
    %314 = vector.shape_cast %313 : vector<16xf32> to vector<16x1xf32>
    %cst_180 = arith.constant 6.400000e+01 : f32
    %315 = vector.broadcast %cst_180 : f32 to vector<16x1xf32>
    %316 = arith.divf %314, %315 : vector<16x1xf32>
    %cst_181 = arith.constant 9.99999974E-6 : f32
    %317 = vector.broadcast %cst_181 : f32 to vector<16x1xf32>
    %318 = arith.addf %316, %317 : vector<16x1xf32>
    %319 = math.rsqrt %318 : vector<16x1xf32>
    %320 = vector.broadcast %319 : vector<16x1xf32> to vector<16x64xf32>
    %321 = arith.mulf %311, %320 : vector<16x64xf32>
    %322 = vector.broadcast %22 : vector<1x64xf32> to vector<16x64xf32>
    %323 = arith.mulf %321, %322 : vector<16x64xf32>
    %324 = vector.broadcast %21 : vector<1x64xf32> to vector<16x64xf32>
    %325 = arith.addf %323, %324 : vector<16x64xf32>
    %cst_182 = arith.constant dense<0.000000e+00> : vector<16x64xf32>
    %326 = tpu.matmul %163, %51, %cst_182 {dimension_numbers = #tpu.dot_dimension_numbers<[1], [0], [0], [1], [0, 0, 1, 1], [], []>} : vector<16x64xf32>, vector<64x64xf32>, vector<16x64xf32> -> vector<16x64xf32>
    %cst_183 = arith.constant dense<0.000000e+00> : vector<16x64xf32>
    %327 = tpu.matmul %325, %52, %cst_183 {dimension_numbers = #tpu.dot_dimension_numbers<[1], [0], [0], [1], [0, 0, 1, 1], [], []>} : vector<16x64xf32>, vector<64x64xf32>, vector<16x64xf32> -> vector<16x64xf32>
    %328 = vector.shape_cast %50 : vector<1x64xf32> to vector<1x1x64xf32>
    %329 = vector.shape_cast %328 : vector<1x1x64xf32> to vector<1x1x64xf32>
    %330 = vector.broadcast %329 : vector<1x1x64xf32> to vector<8x8x64xf32>
    %331 = vector.extract_strided_slice %326 {offsets = [0, 0], sizes = [8, 64], strides = [1, 1]} : vector<16x64xf32> to vector<8x64xf32>
    %332 = vector.extract_strided_slice %327 {offsets = [0, 0], sizes = [8, 64], strides = [1, 1]} : vector<16x64xf32> to vector<8x64xf32>
    %333 = vector.shape_cast %332 : vector<8x64xf32> to vector<8x1x64xf32>
    %334 = vector.shape_cast %331 : vector<8x64xf32> to vector<1x8x64xf32>
    %335 = vector.broadcast %333 : vector<8x1x64xf32> to vector<8x8x64xf32>
    %336 = vector.broadcast %334 : vector<1x8x64xf32> to vector<8x8x64xf32>
    %337 = arith.addf %335, %336 : vector<8x8x64xf32>
    %338 = math.tanh %337 : vector<8x8x64xf32>
    %339 = arith.mulf %338, %330 : vector<8x8x64xf32>
    %cst_184 = arith.constant dense<0.000000e+00> : vector<8x8xf32>
    %340 = vector.multi_reduction <add>, %339, %cst_184 [2] : vector<8x8x64xf32> to vector<8x8xf32>
    %341 = vector.extract_strided_slice %6 {offsets = [0, 0, 0], sizes = [1, 8, 8], strides = [1, 1, 1]} : vector<2x8x8xf32> to vector<1x8x8xf32>
    %342 = vector.shape_cast %341 : vector<1x8x8xf32> to vector<8x8xf32>
    %343 = arith.addf %340, %342 : vector<8x8xf32>
    %cst_185 = arith.constant dense<0xFF800000> : vector<8xf32>
    %344 = vector.multi_reduction <maximumf>, %343, %cst_185 [1] : vector<8x8xf32> to vector<8xf32>
    %345 = vector.shape_cast %344 : vector<8xf32> to vector<8x1xf32>
    %346 = vector.broadcast %345 : vector<8x1xf32> to vector<8x8xf32>
    %347 = arith.subf %343, %346 : vector<8x8xf32>
    %348 = math.exp %347 : vector<8x8xf32>
    %cst_186 = arith.constant dense<0.000000e+00> : vector<8xf32>
    %349 = vector.multi_reduction <add>, %348, %cst_186 [1] : vector<8x8xf32> to vector<8xf32>
    %350 = vector.shape_cast %349 : vector<8xf32> to vector<8x1xf32>
    %351 = math.log %350 : vector<8x1xf32>
    %352 = arith.addf %345, %351 : vector<8x1xf32>
    %353 = vector.broadcast %352 : vector<8x1xf32> to vector<8x8xf32>
    %354 = arith.subf %343, %353 : vector<8x8xf32>
    %355 = vector.extract_strided_slice %326 {offsets = [8, 0], sizes = [8, 64], strides = [1, 1]} : vector<16x64xf32> to vector<8x64xf32>
    %356 = vector.extract_strided_slice %327 {offsets = [8, 0], sizes = [8, 64], strides = [1, 1]} : vector<16x64xf32> to vector<8x64xf32>
    %357 = vector.shape_cast %356 : vector<8x64xf32> to vector<8x1x64xf32>
    %358 = vector.shape_cast %355 : vector<8x64xf32> to vector<1x8x64xf32>
    %359 = vector.broadcast %357 : vector<8x1x64xf32> to vector<8x8x64xf32>
    %360 = vector.broadcast %358 : vector<1x8x64xf32> to vector<8x8x64xf32>
    %361 = arith.addf %359, %360 : vector<8x8x64xf32>
    %362 = math.tanh %361 : vector<8x8x64xf32>
    %363 = arith.mulf %362, %330 : vector<8x8x64xf32>
    %cst_187 = arith.constant dense<0.000000e+00> : vector<8x8xf32>
    %364 = vector.multi_reduction <add>, %363, %cst_187 [2] : vector<8x8x64xf32> to vector<8x8xf32>
    %365 = vector.extract_strided_slice %6 {offsets = [1, 0, 0], sizes = [1, 8, 8], strides = [1, 1, 1]} : vector<2x8x8xf32> to vector<1x8x8xf32>
    %366 = vector.shape_cast %365 : vector<1x8x8xf32> to vector<8x8xf32>
    %367 = arith.addf %364, %366 : vector<8x8xf32>
    %cst_188 = arith.constant dense<0xFF800000> : vector<8xf32>
    %368 = vector.multi_reduction <maximumf>, %367, %cst_188 [1] : vector<8x8xf32> to vector<8xf32>
    %369 = vector.shape_cast %368 : vector<8xf32> to vector<8x1xf32>
    %370 = vector.broadcast %369 : vector<8x1xf32> to vector<8x8xf32>
    %371 = arith.subf %367, %370 : vector<8x8xf32>
    %372 = math.exp %371 : vector<8x8xf32>
    %cst_189 = arith.constant dense<0.000000e+00> : vector<8xf32>
    %373 = vector.multi_reduction <add>, %372, %cst_189 [1] : vector<8x8xf32> to vector<8xf32>
    %374 = vector.shape_cast %373 : vector<8xf32> to vector<8x1xf32>
    %375 = math.log %374 : vector<8x1xf32>
    %376 = arith.addf %369, %375 : vector<8x1xf32>
    %377 = vector.broadcast %376 : vector<8x1xf32> to vector<8x8xf32>
    %378 = arith.subf %367, %377 : vector<8x8xf32>
    %379 = tpu.concatenate %354, %378 in 0 : vector<8x8xf32>, vector<8x8xf32> -> vector<16x8xf32>
    %c0_190 = arith.constant 0 : index
    %c0_191 = arith.constant 0 : index
    %380 = vector.load %arg56[%c0_190, %c0_191] : memref<16x8xf32, #tpu.memory_space<vmem>>, vector<16x8xf32>
    tpu.vector_store %arg56[%c0_190, %c0_191], %379 {strides = array<i32>} : memref<16x8xf32, #tpu.memory_space<vmem>>, vector<16x8xf32>,
    return
  }
  func.func @transform_0(%arg0: i32) -> (i32, i32) {
    %c0_i32 = arith.constant 0 : i32
    %c0_i32_0 = arith.constant 0 : i32
    %c0_i32_1 = arith.constant 0 : i32
    return %c0_i32, %c0_i32_0 : i32, i32
  }
  func.func @transform_1(%arg0: i32) -> (i32, i32) {
    %c0_i32 = arith.constant 0 : i32
    %c0_i32_0 = arith.constant 0 : i32
    %c0_i32_1 = arith.constant 0 : i32
    return %c0_i32, %c0_i32_0 : i32, i32
  }
  func.func @transform_2(%arg0: i32) -> (i32, i32) {
    %c0_i32 = arith.constant 0 : i32
    %c0_i32_0 = arith.constant 0 : i32
    %c0_i32_1 = arith.constant 0 : i32
    return %c0_i32, %c0_i32_0 : i32, i32
  }
  func.func @transform_3(%arg0: i32) -> (i32, i32) {
    %c0_i32 = arith.constant 0 : i32
    %c0_i32_0 = arith.constant 0 : i32
    %c0_i32_1 = arith.constant 0 : i32
    return %c0_i32, %c0_i32_0 : i32, i32
  }
  func.func @transform_4(%arg0: i32) -> (i32, i32) {
    %c0_i32 = arith.constant 0 : i32
    %c0_i32_0 = arith.constant 0 : i32
    %c0_i32_1 = arith.constant 0 : i32
    return %c0_i32, %c0_i32_0 : i32, i32
  }
  func.func @transform_5(%arg0: i32) -> (i32, i32) {
    %c0_i32 = arith.constant 0 : i32
    %c0_i32_0 = arith.constant 0 : i32
    %c0_i32_1 = arith.constant 0 : i32
    return %c0_i32, %c0_i32_0 : i32, i32
  }
  func.func @transform_6(%arg0: i32) -> (i32, i32, i32) {
    %c0_i32 = arith.constant 0 : i32
    %c0_i32_0 = arith.constant 0 : i32
    %c0_i32_1 = arith.constant 0 : i32
    %c0_i32_2 = arith.constant 0 : i32
    return %c0_i32, %c0_i32_0, %c0_i32_1 : i32, i32, i32
  }
  func.func @transform_7(%arg0: i32) -> (i32, i32) {
    %c0_i32 = arith.constant 0 : i32
    %c0_i32_0 = arith.constant 0 : i32
    %c0_i32_1 = arith.constant 0 : i32
    return %c0_i32, %c0_i32_0 : i32, i32
  }
  func.func @transform_8(%arg0: i32) -> (i32, i32) {
    %c0_i32 = arith.constant 0 : i32
    %c0_i32_0 = arith.constant 0 : i32
    %c0_i32_1 = arith.constant 0 : i32
    return %c0_i32, %c0_i32_0 : i32, i32
  }
  func.func @transform_9(%arg0: i32) -> (i32, i32) {
    %c0_i32 = arith.constant 0 : i32
    %c0_i32_0 = arith.constant 0 : i32
    %c0_i32_1 = arith.constant 0 : i32
    return %c0_i32, %c0_i32_0 : i32, i32
  }
  func.func @transform_10(%arg0: i32) -> (i32, i32) {
    %c0_i32 = arith.constant 0 : i32
    %c0_i32_0 = arith.constant 0 : i32
    %c0_i32_1 = arith.constant 0 : i32
    return %c0_i32, %c0_i32_0 : i32, i32
  }
  func.func @transform_11(%arg0: i32) -> (i32, i32) {
    %c0_i32 = arith.constant 0 : i32
    %c0_i32_0 = arith.constant 0 : i32
    %c0_i32_1 = arith.constant 0 : i32
    return %c0_i32, %c0_i32_0 : i32, i32
  }
  func.func @transform_12(%arg0: i32) -> (i32, i32) {
    %c0_i32 = arith.constant 0 : i32
    %c0_i32_0 = arith.constant 0 : i32
    %c0_i32_1 = arith.constant 0 : i32
    return %c0_i32, %c0_i32_0 : i32, i32
  }
  func.func @transform_13(%arg0: i32) -> (i32, i32) {
    %c0_i32 = arith.constant 0 : i32
    %c0_i32_0 = arith.constant 0 : i32
    %c0_i32_1 = arith.constant 0 : i32
    return %c0_i32, %c0_i32_0 : i32, i32
  }
  func.func @transform_14(%arg0: i32) -> (i32, i32) {
    %c0_i32 = arith.constant 0 : i32
    %c0_i32_0 = arith.constant 0 : i32
    %c0_i32_1 = arith.constant 0 : i32
    return %c0_i32, %c0_i32_0 : i32, i32
  }
  func.func @transform_15(%arg0: i32) -> (i32, i32) {
    %c0_i32 = arith.constant 0 : i32
    %c0_i32_0 = arith.constant 0 : i32
    %c0_i32_1 = arith.constant 0 : i32
    return %c0_i32, %c0_i32_0 : i32, i32
  }
  func.func @transform_16(%arg0: i32) -> (i32, i32) {
    %c0_i32 = arith.constant 0 : i32
    %c0_i32_0 = arith.constant 0 : i32
    %c0_i32_1 = arith.constant 0 : i32
    return %c0_i32, %c0_i32_0 : i32, i32
  }
  func.func @transform_17(%arg0: i32) -> (i32, i32) {
    %c0_i32 = arith.constant 0 : i32
    %c0_i32_0 = arith.constant 0 : i32
    %c0_i32_1 = arith.constant 0 : i32
    return %c0_i32, %c0_i32_0 : i32, i32
  }
  func.func @transform_18(%arg0: i32) -> (i32, i32) {
    %c0_i32 = arith.constant 0 : i32
    %c0_i32_0 = arith.constant 0 : i32
    %c0_i32_1 = arith.constant 0 : i32
    return %c0_i32, %c0_i32_0 : i32, i32
  }
  func.func @transform_19(%arg0: i32) -> (i32, i32) {
    %c0_i32 = arith.constant 0 : i32
    %c0_i32_0 = arith.constant 0 : i32
    %c0_i32_1 = arith.constant 0 : i32
    return %c0_i32, %c0_i32_0 : i32, i32
  }
  func.func @transform_20(%arg0: i32) -> (i32, i32) {
    %c0_i32 = arith.constant 0 : i32
    %c0_i32_0 = arith.constant 0 : i32
    %c0_i32_1 = arith.constant 0 : i32
    return %c0_i32, %c0_i32_0 : i32, i32
  }
  func.func @transform_21(%arg0: i32) -> (i32, i32) {
    %c0_i32 = arith.constant 0 : i32
    %c0_i32_0 = arith.constant 0 : i32
    %c0_i32_1 = arith.constant 0 : i32
    return %c0_i32, %c0_i32_0 : i32, i32
  }
  func.func @transform_22(%arg0: i32) -> (i32, i32) {
    %c0_i32 = arith.constant 0 : i32
    %c0_i32_0 = arith.constant 0 : i32
    %c0_i32_1 = arith.constant 0 : i32
    return %c0_i32, %c0_i32_0 : i32, i32
  }
  func.func @transform_23(%arg0: i32) -> (i32, i32) {
    %c0_i32 = arith.constant 0 : i32
    %c0_i32_0 = arith.constant 0 : i32
    %c0_i32_1 = arith.constant 0 : i32
    return %c0_i32, %c0_i32_0 : i32, i32
  }
  func.func @transform_24(%arg0: i32) -> (i32, i32) {
    %c0_i32 = arith.constant 0 : i32
    %c0_i32_0 = arith.constant 0 : i32
    %c0_i32_1 = arith.constant 0 : i32
    return %c0_i32, %c0_i32_0 : i32, i32
  }
  func.func @transform_25(%arg0: i32) -> (i32, i32) {
    %c0_i32 = arith.constant 0 : i32
    %c0_i32_0 = arith.constant 0 : i32
    %c0_i32_1 = arith.constant 0 : i32
    return %c0_i32, %c0_i32_0 : i32, i32
  }
  func.func @transform_26(%arg0: i32) -> (i32, i32) {
    %c0_i32 = arith.constant 0 : i32
    %c0_i32_0 = arith.constant 0 : i32
    %c0_i32_1 = arith.constant 0 : i32
    return %c0_i32, %c0_i32_0 : i32, i32
  }
  func.func @transform_27(%arg0: i32) -> (i32, i32) {
    %c0_i32 = arith.constant 0 : i32
    %c0_i32_0 = arith.constant 0 : i32
    %c0_i32_1 = arith.constant 0 : i32
    return %c0_i32, %c0_i32_0 : i32, i32
  }
  func.func @transform_28(%arg0: i32) -> (i32, i32) {
    %c0_i32 = arith.constant 0 : i32
    %c0_i32_0 = arith.constant 0 : i32
    %c0_i32_1 = arith.constant 0 : i32
    return %c0_i32, %c0_i32_0 : i32, i32
  }
  func.func @transform_29(%arg0: i32) -> (i32, i32) {
    %c0_i32 = arith.constant 0 : i32
    %c0_i32_0 = arith.constant 0 : i32
    %c0_i32_1 = arith.constant 0 : i32
    return %c0_i32, %c0_i32_0 : i32, i32
  }
  func.func @transform_30(%arg0: i32) -> (i32, i32) {
    %c0_i32 = arith.constant 0 : i32
    %c0_i32_0 = arith.constant 0 : i32
    %c0_i32_1 = arith.constant 0 : i32
    return %c0_i32, %c0_i32_0 : i32, i32
  }
  func.func @transform_31(%arg0: i32) -> (i32, i32) {
    %c0_i32 = arith.constant 0 : i32
    %c0_i32_0 = arith.constant 0 : i32
    %c0_i32_1 = arith.constant 0 : i32
    return %c0_i32, %c0_i32_0 : i32, i32
  }
  func.func @transform_32(%arg0: i32) -> (i32, i32) {
    %c0_i32 = arith.constant 0 : i32
    %c0_i32_0 = arith.constant 0 : i32
    %c0_i32_1 = arith.constant 0 : i32
    return %c0_i32, %c0_i32_0 : i32, i32
  }
  func.func @transform_33(%arg0: i32) -> (i32, i32) {
    %c0_i32 = arith.constant 0 : i32
    %c0_i32_0 = arith.constant 0 : i32
    %c0_i32_1 = arith.constant 0 : i32
    return %c0_i32, %c0_i32_0 : i32, i32
  }
  func.func @transform_34(%arg0: i32) -> (i32, i32) {
    %c0_i32 = arith.constant 0 : i32
    %c0_i32_0 = arith.constant 0 : i32
    %c0_i32_1 = arith.constant 0 : i32
    return %c0_i32, %c0_i32_0 : i32, i32
  }
  func.func @transform_35(%arg0: i32) -> (i32, i32) {
    %c0_i32 = arith.constant 0 : i32
    %c0_i32_0 = arith.constant 0 : i32
    %c0_i32_1 = arith.constant 0 : i32
    return %c0_i32, %c0_i32_0 : i32, i32
  }
  func.func @transform_36(%arg0: i32) -> (i32, i32) {
    %c0_i32 = arith.constant 0 : i32
    %c0_i32_0 = arith.constant 0 : i32
    %c0_i32_1 = arith.constant 0 : i32
    return %c0_i32, %c0_i32_0 : i32, i32
  }
  func.func @transform_37(%arg0: i32) -> (i32, i32) {
    %c0_i32 = arith.constant 0 : i32
    %c0_i32_0 = arith.constant 0 : i32
    %c0_i32_1 = arith.constant 0 : i32
    return %c0_i32, %c0_i32_0 : i32, i32
  }
  func.func @transform_38(%arg0: i32) -> (i32, i32) {
    %c0_i32 = arith.constant 0 : i32
    %c0_i32_0 = arith.constant 0 : i32
    %c0_i32_1 = arith.constant 0 : i32
    return %c0_i32, %c0_i32_0 : i32, i32
  }
  func.func @transform_39(%arg0: i32) -> (i32, i32) {
    %c0_i32 = arith.constant 0 : i32
    %c0_i32_0 = arith.constant 0 : i32
    %c0_i32_1 = arith.constant 0 : i32
    return %c0_i32, %c0_i32_0 : i32, i32
  }
  func.func @transform_40(%arg0: i32) -> (i32, i32) {
    %c0_i32 = arith.constant 0 : i32
    %c0_i32_0 = arith.constant 0 : i32
    %c0_i32_1 = arith.constant 0 : i32
    return %c0_i32, %c0_i32_0 : i32, i32
  }
  func.func @transform_41(%arg0: i32) -> (i32, i32) {
    %c0_i32 = arith.constant 0 : i32
    %c0_i32_0 = arith.constant 0 : i32
    %c0_i32_1 = arith.constant 0 : i32
    return %c0_i32, %c0_i32_0 : i32, i32
  }
  func.func @transform_42(%arg0: i32) -> (i32, i32) {
    %c0_i32 = arith.constant 0 : i32
    %c0_i32_0 = arith.constant 0 : i32
    %c0_i32_1 = arith.constant 0 : i32
    return %c0_i32, %c0_i32_0 : i32, i32
  }
  func.func @transform_43(%arg0: i32) -> (i32, i32) {
    %c0_i32 = arith.constant 0 : i32
    %c0_i32_0 = arith.constant 0 : i32
    %c0_i32_1 = arith.constant 0 : i32
    return %c0_i32, %c0_i32_0 : i32, i32
  }
  func.func @transform_44(%arg0: i32) -> (i32, i32) {
    %c0_i32 = arith.constant 0 : i32
    %c0_i32_0 = arith.constant 0 : i32
    %c0_i32_1 = arith.constant 0 : i32
    return %c0_i32, %c0_i32_0 : i32, i32
  }
  func.func @transform_45(%arg0: i32) -> (i32, i32) {
    %c0_i32 = arith.constant 0 : i32
    %c0_i32_0 = arith.constant 0 : i32
    %c0_i32_1 = arith.constant 0 : i32
    return %c0_i32, %c0_i32_0 : i32, i32
  }
  func.func @transform_46(%arg0: i32) -> (i32, i32) {
    %c0_i32 = arith.constant 0 : i32
    %c0_i32_0 = arith.constant 0 : i32
    %c0_i32_1 = arith.constant 0 : i32
    return %c0_i32, %c0_i32_0 : i32, i32
  }
  func.func @transform_47(%arg0: i32) -> (i32, i32) {
    %c0_i32 = arith.constant 0 : i32
    %c0_i32_0 = arith.constant 0 : i32
    %c0_i32_1 = arith.constant 0 : i32
    return %c0_i32, %c0_i32_0 : i32, i32
  }
  func.func @transform_48(%arg0: i32) -> (i32, i32) {
    %c0_i32 = arith.constant 0 : i32
    %c0_i32_0 = arith.constant 0 : i32
    %c0_i32_1 = arith.constant 0 : i32
    return %c0_i32, %c0_i32_0 : i32, i32
  }
  func.func @transform_49(%arg0: i32) -> (i32, i32) {
    %c0_i32 = arith.constant 0 : i32
    %c0_i32_0 = arith.constant 0 : i32
    %c0_i32_1 = arith.constant 0 : i32
    return %c0_i32, %c0_i32_0 : i32, i32
  }
  func.func @transform_50(%arg0: i32) -> (i32, i32) {
    %c0_i32 = arith.constant 0 : i32
    %c0_i32_0 = arith.constant 0 : i32
    %c0_i32_1 = arith.constant 0 : i32
    return %c0_i32, %c0_i32_0 : i32, i32
  }
  func.func @transform_51(%arg0: i32) -> (i32, i32) {
    %c0_i32 = arith.constant 0 : i32
    %c0_i32_0 = arith.constant 0 : i32
    %c0_i32_1 = arith.constant 0 : i32
    return %c0_i32, %c0_i32_0 : i32, i32
  }
  func.func @transform_52(%arg0: i32) -> (i32, i32) {
    %c0_i32 = arith.constant 0 : i32
    %c0_i32_0 = arith.constant 0 : i32
    %c0_i32_1 = arith.constant 0 : i32
    return %c0_i32, %c0_i32_0 : i32, i32
  }
  func.func @transform_53(%arg0: i32) -> (i32, i32) {
    %c0_i32 = arith.constant 0 : i32
    %c0_i32_0 = arith.constant 0 : i32
    %c0_i32_1 = arith.constant 0 : i32
    return %c0_i32, %c0_i32_0 : i32, i32
  }
  func.func @transform_54(%arg0: i32) -> (i32, i32) {
    %c0_i32 = arith.constant 0 : i32
    %c0_i32_0 = arith.constant 0 : i32
    %c0_i32_1 = arith.constant 0 : i32
    return %c0_i32, %c0_i32_0 : i32, i32
  }
  func.func @transform_55(%arg0: i32) -> (i32, i32) {
    %c0_i32 = arith.constant 0 : i32
    %c0_i32_0 = arith.constant 0 : i32
    %c0_i32_1 = arith.constant 0 : i32
    return %c0_i32, %c0_i32_0 : i32, i32
  }
}

</mosaic_0001>

<bundles_post_ra>
// kernel: eq.57
= control target key start
LH: loop header
LB: loop body
LE: loop exit
PB: predicated region body
PF: predicated region fallthrough
CT: control target
= control target key end

     0   :  { %vm7_vm0 = vcmask 64512   ;;  %vm13_vm1 = vcmask 130112   ;;  %s39_s0 = inlined_call_operand.vmem [shape: s32[2,8], index: 0, kind: input, shape index: {}]   ;;  %s40_s1 = inlined_call_operand.vmem [shape: s32[16], index: 1, kind: output, shape index: {}]  }
   0x1   :  { %v4_v0 = vld [vmem:[%s39_s0] sm:$0x3]  ;;  %s22_s0 = smov 8  }
   0x2   :  { %5 = vst [vmem:[#allocation1] sm:$0x3] %v4_v0 }
   0x9   :  { %v10_v1 = vld [vmem:[#allocation1 + $0x1] sm:$0x1]   ;;  %v6_v2 = vld [vmem:[#allocation1] sm:$0x1]  }
   0xa   :  { %11 = vrot.lane.b32.xlu0 %v10_v1, %s22_s0  ;;  %8 = vst.msk [vmem:[#allocation0] sm:$0x1] %vm7_vm0, %v6_v2  }
  0x7c   :  { %v12_v3 = vpop.permute.xlu0 %11  }
  0x7d   :  { %14 = vst.msk [vmem:[#allocation0] sm:$0x1] %vm13_vm1, %v12_v3  }
  0x84   :  { %v17_v4 = vld [vmem:[#allocation0] sm:$0x1] }
  0x85   :  { %20 = vst [vmem:[%s40_s1] sm:$0x1] %v17_v4 }

// kernel: grouper_forward.1
= control target key start
LH: loop header
LB: loop body
LE: loop exit
PB: predicated region body
PF: predicated region fallthrough
CT: control target
= control target key end

     0   :  { %s3521_s6 = smov 1   ;;  %s3522_s10 = smov 2   ;;  %s4616_s0 = inlined_call_operand.smem [shape: u32[56], index: -1, kind: input, shape index: {}] }
   0x1   :  { %s3600_s5 = sld [smem:[%s4616_s0]]   ;;  %s3523_s14 = smov 3  }
   0x2   :  { %s3605_s9 = sld [smem:[%s4616_s0 + %s3521_s6]]   ;;  %s3524_s18 = smov 4  }
   0x3   :  { %s3610_s13 = sld [smem:[%s4616_s0 + %s3522_s10]]   ;;  %s3525_s22 = smov 5  }
   0x4   :  { %s3615_s17 = sld [smem:[%s4616_s0 + %s3523_s14]]   ;;  %s3526_s26 = smov 6  }
   0x5   :  { %s3620_s21 = sld [smem:[%s4616_s0 + %s3524_s18]]   ;;  %s3527_s30 = smov 7  }
   0x6   :  { %s3625_s25 = sld [smem:[%s4616_s0 + %s3525_s22]]   ;;  %s3528_s4 = smov 8  }
   0x7   :  { %s3630_s29 = sld [smem:[%s4616_s0 + %s3526_s26]]   ;;  %s3529_s10 = smov 9  }
   0x8   :  { %4631 = sst [smem:[#allocation25_spill]] %s3605_s9  ;;  %s3530_s15 = smov 10  }
   0x9   :  { %4632 = sst [smem:[#allocation26_spill]] %s3610_s13  ;;  %s3531_s20 = smov 11  }
   0xa   :  { %s3635_s3 = sld [smem:[%s4616_s0 + %s3527_s30]]   ;;  %s3532_s26 = smov 12  }
   0xb   :  { %4633 = sst [smem:[#allocation27_spill]] %s3620_s21  ;;  %s3533_s1 = smov 13  }
   0xc   :  { %4634 = sst [smem:[#allocation28_spill]] %s3625_s25  ;;  %s3534_s7 = smov 14  }
   0xd   :  { %4635 = sst [smem:[#allocation29_spill]] %s3630_s29  ;;  %s3536_s22 = smov 16  }
   0xe   :  { %s3640_s8 = sld [smem:[%s4616_s0 + %s3528_s4]]   ;;  %s3537_s28 = smov 17  }
   0xf   :  { %s3645_s14 = sld [smem:[%s4616_s0 + %s3529_s10]]  }
  0x10   :  { %4636 = sst [smem:[#allocation30_spill]] %s3635_s3 }
  0x11   :  { %s3650_s19 = sld [smem:[%s4616_s0 + %s3530_s15]]   ;;  %s3535_s15 = smov 15  }
  0x12   :  { %s3655_s24 = sld [smem:[%s4616_s0 + %s3531_s20]]  }
  0x13   :  { %s3660_s30 = sld [smem:[%s4616_s0 + %s3532_s26]]  }
  0x14   :  { %4637 = sst [smem:[#allocation31_spill]] %s3640_s8 }
  0x15   :  { %4638 = sst [smem:[#allocation32_spill]] %s3645_s14 }
  0x16   :  { %s3665_s6 = sld [smem:[%s4616_s0 + %s3533_s1]]  }
  0x17   :  { %4639 = sst [smem:[#allocation33_spill]] %s3650_s19 }
  0x18   :  { %4640 = sst [smem:[#allocation34_spill]] %s3655_s24 }
  0x19   :  { %4641 = sst [smem:[#allocation35_spill]] %s3660_s30 }
  0x1a   :  { %s3670_s12 = sld [smem:[%s4616_s0 + %s3534_s7]]   ;;  %s3538_s7 = smov 18  }
  0x1b   :  { %s3675_s20 = sld [smem:[%s4616_s0 + %s3535_s15]]   ;;  %s3539_s15 = smov 19  }
  0x1c   :  { %4642 = sst [smem:[#allocation36_spill]] %s3665_s6 }
  0x1d   :  { %s3680_s27 = sld [smem:[%s4616_s0 + %s3536_s22]]   ;;  %s3540_s22 = smov 20  }
  0x1e   :  { %s3685_s4 = sld [smem:[%s4616_s0 + %s3537_s28]]   ;;  %s3541_s28 = smov 21  }
  0x1f   :  { %s3690_s29 = sld [smem:[%s4616_s0 + %s3538_s7]]   ;;  %s3542_s7 = smov 22  }
  0x20   :  { %4643 = sst [smem:[#allocation37_spill]] %s3670_s12 }
  0x21   :  { %4644 = sst [smem:[#allocation38_spill]] %s3675_s20 }
  0x22   :  { %s3695_s20 = sld [smem:[%s4616_s0 + %s3539_s15]]   ;;  %s3543_s15 = smov 23  }
  0x23   :  { %4645 = sst [smem:[#allocation39_spill]] %s3680_s27 }
  0x24   :  { %4646 = sst [smem:[#allocation40_spill]] %s3685_s4 }
  0x25   :  { %4647 = sst [smem:[#allocation41_spill]] %s3690_s29 }
  0x26   :  { %s3700_s27 = sld [smem:[%s4616_s0 + %s3540_s22]]   ;;  %s3544_s22 = smov 24  }
  0x27   :  { %s3705_s8 = sld [smem:[%s4616_s0 + %s3541_s28]]   ;;  %s3545_s28 = smov 25  }
  0x28   :  { %4648 = sst [smem:[#allocation42_spill]] %s3695_s20 }
  0x29   :  { %s3710_s30 = sld [smem:[%s4616_s0 + %s3542_s7]]   ;;  %s3546_s7 = smov 26  }
  0x2a   :  { %s3715_s20 = sld [smem:[%s4616_s0 + %s3543_s15]]   ;;  %s3547_s15 = smov 27  }
  0x2c   :  { %4649 = sst [smem:[#allocation43_spill]] %s3700_s27 }
  0x2d   :  { %4650 = sst [smem:[#allocation44_spill]] %s3705_s8 }
  0x2e   :  { %s3720_s27 = sld [smem:[%s4616_s0 + %s3544_s22]]   ;;  %s3548_s22 = smov 28  }
  0x2f   :  { %4651 = sst [smem:[#allocation45_spill]] %s3710_s30 }
  0x30   :  { %4652 = sst [smem:[#allocation46_spill]] %s3715_s20 }
  0x31   :  { %s3725_s8 = sld [smem:[%s4616_s0 + %s3545_s28]]   ;;  %s3549_s28 = smov 29  }
  0x32   :  { %s3730_s30 = sld [smem:[%s4616_s0 + %s3546_s7]]   ;;  %s3550_s7 = smov 30  }
  0x33   :  { %s3735_s20 = sld [smem:[%s4616_s0 + %s3547_s15]]   ;;  %s3551_s15 = smov 31  }
  0x34   :  { %4653 = sst [smem:[#allocation47_spill]] %s3720_s27 }
  0x35   :  { %s3740_s27 = sld [smem:[%s4616_s0 + %s3548_s22]]   ;;  %s3552_s22 = smov 32  }
  0x36   :  { %s3745_s25 = sld [smem:[%s4616_s0 + %s3549_s28]]   ;;  %s3553_s28 = smov 33  }
  0x37   :  { %4654 = sst [smem:[#allocation48_spill]] %s3725_s8 }
  0x38   :  { %4655 = sst [smem:[#allocation49_spill]] %s3730_s30 }
  0x39   :  { %4656 = sst [smem:[#allocation50_spill]] %s3735_s20 }
  0x3a   :  { %s3750_s14 = sld [smem:[%s4616_s0 + %s3550_s7]]   ;;  %s3554_s7 = smov 34  }
  0x3b   :  { %4657 = sst [smem:[#allocation51_spill]] %s3740_s27 }
  0x3c   :  { %4658 = sst [smem:[#allocation52_spill]] %s3745_s25 }
  0x3d   :  { %s3755_s4 = sld [smem:[%s4616_s0 + %s3551_s15]]   ;;  %s3555_s15 = smov 35  }
  0x3e   :  { %s3760_s29 = sld [smem:[%s4616_s0 + %s3552_s22]]   ;;  %s3556_s22 = smov 36  }
  0x3f   :  { %s3765_s30 = sld [smem:[%s4616_s0 + %s3553_s28]]   ;;  %s3557_s28 = smov 37  }
  0x40   :  { %4659 = sst [smem:[#allocation53_spill]] %s3750_s14 }
  0x41   :  { %s3770_s19 = sld [smem:[%s4616_s0 + %s3554_s7]]   ;;  %s3558_s7 = smov 38  }
  0x42   :  { %s3775_s3 = sld [smem:[%s4616_s0 + %s3555_s15]]   ;;  %s3559_s15 = smov 39  }
  0x43   :  { %s3780_s6 = sld [smem:[%s4616_s0 + %s3556_s22]]   ;;  %s3560_s22 = smov 40  }
  0x44   :  { %s3785_s14 = sld [smem:[%s4616_s0 + %s3557_s28]]   ;;  %s3561_s28 = smov 41  }
  0x45   :  { %4660 = sst [smem:[#allocation54_spill]] %s3765_s30 }
  0x46   :  { %s3790_s12 = sld [smem:[%s4616_s0 + %s3558_s7]]   ;;  %s3562_s7 = smov 42  }
  0x47   :  { %4661 = sst [smem:[#allocation55_spill]] %s3770_s19 }
  0x48   :  { %s3795_s24 = sld [smem:[%s4616_s0 + %s3559_s15]]   ;;  %s3563_s15 = smov 43  }
  0x49   :  { %4662 = sst [smem:[#allocation56_spill]] %s3780_s6 }
  0x4a   :  { %s3800_s21 = sld [smem:[%s4616_s0 + %s3560_s22]]   ;;  %s3564_s22 = smov 44  }
  0x4b   :  { %s3805_s27 = sld [smem:[%s4616_s0 + %s3561_s28]]   ;;  %s3565_s28 = smov 45  }
  0x4c   :  { %s3810_s20 = sld [smem:[%s4616_s0 + %s3562_s7]]   ;;  %s3566_s7 = smov 46  }
  0x4d   :  { %s3815_s8 = sld [smem:[%s4616_s0 + %s3563_s15]]   ;;  %s3567_s15 = smov 47  }
  0x4e   :  { %4663 = sst [smem:[#allocation57_spill]] %s3795_s24 }
  0x4f   :  { %s3820_s25 = sld [smem:[%s4616_s0 + %s3564_s22]]   ;;  %s3568_s22 = smov 48  }
  0x50   :  { %4664 = sst [smem:[#allocation58_spill]] %s3800_s21 }
  0x51   :  { %4665 = sst [smem:[#allocation59_spill]] %s3805_s27 }
  0x52   :  { %4666 = sst [smem:[#allocation60_spill]] %s3810_s20 }
  0x53   :  { %s3825_s13 = sld [smem:[%s4616_s0 + %s3565_s28]]   ;;  %s3569_s28 = smov 49  }
  0x54   :  { %s3830_s9 = sld [smem:[%s4616_s0 + %s3566_s7]]   ;;  %s3570_s7 = smov 50  }
  0x55   :  { %4667 = sst [smem:[#allocation61_spill]] %s3820_s25 }
  0x56   :  { %s3835_s27 = sld [smem:[%s4616_s0 + %s3567_s15]]   ;;  %s3571_s15 = smov 51  }
  0x57   :  { %s3840_s20 = sld [smem:[%s4616_s0 + %s3568_s22]]   ;;  %s3572_s22 = smov 52  }
  0x58   :  { %s3845_s19 = sld [smem:[%s4616_s0 + %s3569_s28]]   ;;  %s3573_s28 = smov 53  }
  0x59   :  { %s3850_s30 = sld [smem:[%s4616_s0 + %s3570_s7]]   ;;  %s3574_s7 = smov 54  }
  0x5a   :  { %s3855_s24 = sld [smem:[%s4616_s0 + %s3571_s15]]   ;;  %s3575_s15 = smov 55  }
  0x5b   :  { %s3860_s21 = sld [smem:[%s4616_s0 + %s3572_s22]]  }
  0x5c   :  { %s3865_s25 = sld [smem:[%s4616_s0 + %s3573_s28]]  }
  0x5d   :  { %s3875_s6 = sld [smem:[%s4616_s0 + %s3575_s15]]  }
  0x5f   :  { %4668 = sst [smem:[#allocation62_spill]] %s3850_s30 }
  0x60   :  { %s3870_s30 = sld [smem:[%s4616_s0 + %s3574_s7]]  }
  0x61   :  { %116 = vsyncpa [#allocation3], 0 }
  0x62   :  { %117 = vsyncpa [#allocation5], 0 }
  0x63   :  { %118 = vsyncpa [#allocation8], 0 }
  0x64   :  { %119 = vsyncpa [#allocation11], 0 }
  0x65   :  { %120 = vsyncpa [#allocation14], 0 }
  0x66   :  { %121 = vsyncpa [#allocation17], 0  ;;  %s201_s22 = sshll.u32 %s3760_s29, 4  ;;  %s3576_s23 = smov [#allocation4]   ;;  %s202_s22 = int_to_ptr.hbm [resolvable:$true] %s201_s22 }
  0x67   :  { %s203_s26 = sshll.u32 %s3576_s23, 4  ;;  %s249_s28 = sshll.u32 %s3825_s13, 4  ;;  %s204_s26 = int_to_ptr.vmem [resolvable:$true] %s203_s26  ;;  %s250_s28 = int_to_ptr.hbm [resolvable:$true] %s249_s28 }
  0x68   :  { %s3245_s1 = sshra.s32 %s202_s22, 4  ;;  %s3249_s2 = scalar_lea.hbm %s3760_s29, 64  ;;  %s3246_s1 = int_to_ptr.hbm [resolvable:$true] %s3245_s1 }
  0x69   :  { %s3247_s0 = scalar_lea.hbm %s3246_s1, 64  ;;  %p3250_p1 = scmp.lt.s32.totalorder %s3246_s1, %s3760_s29 }
  0x6a   :  { %p3248_p0 = scmp.ne.s32.totalorder %s3246_s1, %s3247_s0  ;;  %p3251_p2 = scmp.lt.s32.totalorder %s3249_s2, %s3247_s0 }
  0x6c   :  { %p3252_p3 = por %p3251_p2, %p3250_p1 }
  0x6e   :  { %p3253_p4 = pnand %p3252_p3, %p3248_p0 }
  0x70   :  { %3256 = shalt.err (!%p3253_p4)
}
  0x71   :  { %s3577_s7 = smov 128   ;;  %s3578_s10 = smov 8  }
  0x72   :  { %209 = dma.hbm_to_vmem [thread:$0]  %s202_s22, 1024, %s204_s26, [#allocation5], %s3577_s7, %s3577_s7, %s3578_s10  }
  0x73   :  { %s3579_s11 = smov [#allocation7]   ;;  %s275_s16 = sshll.u32 %s3835_s27, 4  ;;  %s3885_s16 = int_to_ptr.hbm [resolvable:$true] %s275_s16 }
  0x74   :  { %s251_s15 = sshll.u32 %s3579_s11, 4  ;;  %s3269_s29 = sshra.s32 %s250_s28, 4  ;;  %s252_s15 = int_to_ptr.vmem [resolvable:$true] %s251_s15  ;;  %s3270_s29 = int_to_ptr.hbm [resolvable:$true] %s3269_s29 }
  0x75   :  { %s3271_s18 = scalar_lea.hbm %s3270_s29, 64  ;;  %s3273_s23 = scalar_lea.hbm %s3825_s13, 64 }
  0x76   :  { %p3272_p5 = scmp.ne.s32.totalorder %s3270_s29, %s3271_s18  ;;  %p3274_p6 = scmp.lt.s32.totalorder %s3270_s29, %s3825_s13 }
  0x77   :  { %p3275_p7 = scmp.lt.s32.totalorder %s3273_s23, %s3271_s18 }
  0x79   :  { %p3276_p8 = por %p3275_p7, %p3274_p6 }
  0x7b   :  { %p3277_p9 = pnand %p3276_p8, %p3272_p5 }
  0x7d   :  { %3280 = shalt.err (!%p3277_p9)
}
  0x7e   :  { %257 = dma.hbm_to_vmem [thread:$0]  %s250_s28, 1024, %s252_s15, [#allocation8], %s3577_s7, %s3577_s7, %s3578_s10  }
  0x7f   :  { %s305_s22 = sshll.u32 %s3855_s24, 4  ;;  %s3580_s26 = smov [#allocation10]   ;;  %s3893_s22 = int_to_ptr.hbm [resolvable:$true] %s305_s22 }
  0x80   :  { %s277_s1 = sshll.u32 %s3580_s26, 4  ;;  %s3293_s0 = sshra.s32 %s3885_s16, 4  ;;  %s278_s1 = int_to_ptr.vmem [resolvable:$true] %s277_s1  ;;  %s3294_s0 = int_to_ptr.hbm [resolvable:$true] %s3293_s0 }
  0x81   :  { %s3295_s13 = scalar_lea.hbm %s3294_s0, 64  ;;  %s3297_s2 = scalar_lea.hbm %s3835_s27, 64 }
  0x82   :  { %p3296_p10 = scmp.ne.s32.totalorder %s3294_s0, %s3295_s13  ;;  %p3298_p11 = scmp.lt.s32.totalorder %s3294_s0, %s3835_s27 }
  0x83   :  { %p3299_p12 = scmp.lt.s32.totalorder %s3297_s2, %s3295_s13 }
  0x85   :  { %p3300_p13 = por %p3299_p12, %p3298_p11 }
  0x87   :  { %p3301_p0 = pnand %p3300_p13, %p3296_p10 }
  0x89   :  { %3304 = shalt.err (!%p3301_p0)
}
  0x8a   :  { %283 = dma.hbm_to_vmem [thread:$0]  %s3885_s16, 1024, %s278_s1, [#allocation11], %s3577_s7, %s3577_s7, %s3578_s10  }
  0x8b   :  { %s3581_s28 = smov [#allocation13]   ;;  %s331_s15 = sshll.u32 %s3865_s25, 4  ;;  %s3903_s15 = int_to_ptr.hbm [resolvable:$true] %s331_s15 }
  0x8c   :  { %s307_s11 = sshll.u32 %s3581_s28, 4  ;;  %s3317_s27 = sshra.s32 %s3893_s22, 4  ;;  %s308_s11 = int_to_ptr.vmem [resolvable:$true] %s307_s11  ;;  %s3318_s27 = int_to_ptr.hbm [resolvable:$true] %s3317_s27 }
  0x8d   :  { %s3319_s29 = scalar_lea.hbm %s3318_s27, 64  ;;  %s3321_s18 = scalar_lea.hbm %s3855_s24, 64 }
  0x8e   :  { %p3320_p1 = scmp.ne.s32.totalorder %s3318_s27, %s3319_s29  ;;  %p3322_p2 = scmp.lt.s32.totalorder %s3318_s27, %s3855_s24 }
  0x8f   :  { %p3323_p3 = scmp.lt.s32.totalorder %s3321_s18, %s3319_s29 }
  0x91   :  { %p3324_p4 = por %p3323_p3, %p3322_p2 }
  0x93   :  { %p3325_p5 = pnand %p3324_p4, %p3320_p1 }
  0x95   :  { %3328 = shalt.err (!%p3325_p5)
}
  0x96   :  { %313 = dma.hbm_to_vmem [thread:$0]  %s3893_s22, 1024, %s308_s11, [#allocation14], %s3577_s7, %s3577_s7, %s3578_s10  }
  0x97   :  { %s188_s16 = sshll.u32 %s3755_s4, 4  ;;  %s3582_s23 = smov [#allocation16]   ;;  %s3913_s16 = int_to_ptr.hbm [resolvable:$true] %s188_s16 }
  0x98   :  { %s333_s26 = sshll.u32 %s3582_s23, 4  ;;  %s3341_s24 = sshra.s32 %s3903_s15, 4  ;;  %s334_s26 = int_to_ptr.vmem [resolvable:$true] %s333_s26  ;;  %s3342_s24 = int_to_ptr.hbm [resolvable:$true] %s3341_s24 }
  0x99   :  { %s3343_s1 = scalar_lea.hbm %s3342_s24, 64  ;;  %s3345_s0 = scalar_lea.hbm %s3865_s25, 64 }
  0x9a   :  { %p3344_p6 = scmp.ne.s32.totalorder %s3342_s24, %s3343_s1  ;;  %p3346_p7 = scmp.lt.s32.totalorder %s3342_s24, %s3865_s25 }
  0x9b   :  { %p3347_p8 = scmp.lt.s32.totalorder %s3345_s0, %s3343_s1 }
  0x9d   :  { %p3348_p9 = por %p3347_p8, %p3346_p7 }
  0x9f   :  { %p3349_p10 = pnand %p3348_p9, %p3344_p6 }
  0xa1   :  { %3352 = shalt.err (!%p3349_p10)
}
  0xa2   :  { %339 = dma.hbm_to_vmem [thread:$0]  %s3903_s15, 1024, %s334_s26, [#allocation17], %s3577_s7, %s3577_s7, %s3578_s10  }
  0xa3   :  { %s3583_s22 = smov [#allocation2]   ;;  %s234_s2 = sshll.u32 %s3815_s8, 4  ;;  %s3923_s2 = int_to_ptr.hbm [resolvable:$true] %s234_s2 }
  0xa4   :  { %s190_s13 = sshll.u32 %s3583_s22, 4  ;;  %s3365_s25 = sshra.s32 %s3913_s16, 4  ;;  %s191_s13 = int_to_ptr.vmem [resolvable:$true] %s190_s13  ;;  %s3366_s25 = int_to_ptr.hbm [resolvable:$true] %s3365_s25 }
  0xa5   :  { %s3367_s28 = scalar_lea.hbm %s3366_s25, 64  ;;  %s3369_s11 = scalar_lea.hbm %s3755_s4, 64 }
  0xa6   :  { %p3368_p11 = scmp.ne.s32.totalorder %s3366_s25, %s3367_s28  ;;  %p3370_p12 = scmp.lt.s32.totalorder %s3366_s25, %s3755_s4 }
  0xa7   :  { %p3371_p13 = scmp.lt.s32.totalorder %s3369_s11, %s3367_s28 }
  0xa9   :  { %p3372_p0 = por %p3371_p13, %p3370_p12 }
  0xab   :  { %p3373_p1 = pnand %p3372_p0, %p3368_p11 }
  0xad   :  { %3376 = shalt.err (!%p3373_p1)
}
  0xae   :  { %196 = dma.hbm_to_vmem [thread:$0]  %s3913_s16, 1024, %s191_s13, [#allocation3], %s3577_s7, %s3577_s7, %s3578_s10  }
  0xaf   :  { %s262_s15 = sshll.u32 %s3830_s9, 4  ;;  %s3584_s27 = smov [#allocation6]   ;;  %s3933_s15 = int_to_ptr.hbm [resolvable:$true] %s262_s15 }
  0xb0   :  { %s236_s29 = sshll.u32 %s3584_s27, 4  ;;  %s3389_s4 = sshra.s32 %s3923_s2, 4  ;;  %s237_s29 = int_to_ptr.vmem [resolvable:$true] %s236_s29  ;;  %s3390_s4 = int_to_ptr.hbm [resolvable:$true] %s3389_s4 }
  0xb1   :  { %s3391_s18 = scalar_lea.hbm %s3390_s4, 64  ;;  %s3393_s23 = scalar_lea.hbm %s3815_s8, 64 }
  0xb2   :  { %p3392_p2 = scmp.ne.s32.totalorder %s3390_s4, %s3391_s18  ;;  %p3394_p3 = scmp.lt.s32.totalorder %s3390_s4, %s3815_s8 }
  0xb3   :  { %p3395_p4 = scmp.lt.s32.totalorder %s3393_s23, %s3391_s18 }
  0xb5   :  { %p3396_p5 = por %p3395_p4, %p3394_p3 }
  0xb7   :  { %p3397_p6 = pnand %p3396_p5, %p3392_p2 }
  0xb9   :  { %3400 = shalt.err (!%p3397_p6)
}
  0xba   :  { %242 = dma.hbm_to_vmem [thread:$0]  %s3923_s2, 1024, %s237_s29, [#allocation5], %s3577_s7, %s3577_s7, %s3578_s10  }
  0xbb   :  { %s3585_s16 = smov [#allocation9]   ;;  %s288_s24 = sshll.u32 %s3840_s20, 4  ;;  %s3943_s24 = int_to_ptr.hbm [resolvable:$true] %s288_s24 }
  0xbc   :  { %s264_s26 = sshll.u32 %s3585_s16, 4  ;;  %s3413_s8 = sshra.s32 %s3933_s15, 4  ;;  %s265_s26 = int_to_ptr.vmem [resolvable:$true] %s264_s26  ;;  %s3414_s8 = int_to_ptr.hbm [resolvable:$true] %s3413_s8 }
  0xbd   :  { %s3415_s1 = scalar_lea.hbm %s3414_s8, 64  ;;  %s3417_s0 = scalar_lea.hbm %s3830_s9, 64 }
  0xbe   :  { %p3416_p7 = scmp.ne.s32.totalorder %s3414_s8, %s3415_s1  ;;  %p3418_p8 = scmp.lt.s32.totalorder %s3414_s8, %s3830_s9 }
  0xbf   :  { %p3419_p9 = scmp.lt.s32.totalorder %s3417_s0, %s3415_s1 }
  0xc1   :  { %p3420_p10 = por %p3419_p9, %p3418_p8 }
  0xc3   :  { %p3421_p11 = pnand %p3420_p10, %p3416_p7 }
  0xc5   :  { %3424 = shalt.err (!%p3421_p11)
}
  0xc6   :  { %270 = dma.hbm_to_vmem [thread:$0]  %s3933_s15, 1024, %s265_s26, [#allocation8], %s3577_s7, %s3577_s7, %s3578_s10  }
  0xc7   :  { %s318_s22 = sshll.u32 %s3860_s21, 4  ;;  %s3586_s13 = smov [#allocation12]   ;;  %s3953_s22 = int_to_ptr.hbm [resolvable:$true] %s318_s22 }
  0xc8   :  { %s290_s2 = sshll.u32 %s3586_s13, 4  ;;  %s3437_s9 = sshra.s32 %s3943_s24, 4  ;;  %s291_s2 = int_to_ptr.vmem [resolvable:$true] %s290_s2  ;;  %s3438_s9 = int_to_ptr.hbm [resolvable:$true] %s3437_s9 }
  0xc9   :  { %s3439_s25 = scalar_lea.hbm %s3438_s9, 64  ;;  %s3441_s28 = scalar_lea.hbm %s3840_s20, 64 }
  0xca   :  { %p3440_p12 = scmp.ne.s32.totalorder %s3438_s9, %s3439_s25  ;;  %p3442_p13 = scmp.lt.s32.totalorder %s3438_s9, %s3840_s20 }
  0xcb   :  { %p3443_p0 = scmp.lt.s32.totalorder %s3441_s28, %s3439_s25 }
  0xcd   :  { %p3444_p1 = por %p3443_p0, %p3442_p13 }
  0xcf   :  { %p3445_p2 = pnand %p3444_p1, %p3440_p12 }
  0xd1   :  { %3448 = shalt.err (!%p3445_p2)
}
  0xd2   :  { %296 = dma.hbm_to_vmem [thread:$0]  %s3943_s24, 1024, %s291_s2, [#allocation11], %s3577_s7, %s3577_s7, %s3578_s10  }
  0xd3   :  { %s3587_s11 = smov [#allocation15]   ;;  %s344_s27 = sshll.u32 %s3870_s30, 4  ;;  %s345_s27 = int_to_ptr.hbm [resolvable:$true] %s344_s27 }
  0xd4   :  { %s320_s15 = sshll.u32 %s3587_s11, 4  ;;  %s3461_s29 = sshra.s32 %s3953_s22, 4  ;;  %s321_s15 = int_to_ptr.vmem [resolvable:$true] %s320_s15  ;;  %s3462_s29 = int_to_ptr.hbm [resolvable:$true] %s3461_s29 }
  0xd5   :  { %s3463_s20 = scalar_lea.hbm %s3462_s29, 64  ;;  %s3465_s4 = scalar_lea.hbm %s3860_s21, 64 }
  0xd6   :  { %p3464_p3 = scmp.ne.s32.totalorder %s3462_s29, %s3463_s20  ;;  %p3466_p4 = scmp.lt.s32.totalorder %s3462_s29, %s3860_s21 }
  0xd7   :  { %p3467_p5 = scmp.lt.s32.totalorder %s3465_s4, %s3463_s20 }
  0xd9   :  { %p3468_p6 = por %p3467_p5, %p3466_p4 }
  0xdb   :  { %p3469_p7 = pnand %p3468_p6, %p3464_p3 }
  0xdd   :  { %3472 = shalt.err (!%p3469_p7)
}
  0xde   :  { %326 = dma.hbm_to_vmem [thread:$0]  %s3953_s22, 1024, %s321_s15, [#allocation14], %s3577_s7, %s3577_s7, %s3578_s10  }
  0xdf   :  { %s3588_s18 = smov [#allocation18]   ;;  %s3485_s16 = sshra.s32 %s345_s27, 4  ;;  %s3486_s16 = int_to_ptr.hbm [resolvable:$true] %s3485_s16 }
  0xe0   :  { %s346_s23 = sshll.u32 %s3588_s18, 4  ;;  %s3487_s26 = scalar_lea.hbm %s3486_s16, 64  ;;  %s347_s23 = int_to_ptr.vmem [resolvable:$true] %s346_s23 }
  0xe1   :  { %p3488_p8 = scmp.ne.s32.totalorder %s3486_s16, %s3487_s26  ;;  %s3489_s21 = scalar_lea.hbm %s3870_s30, 64 }
  0xe2   :  { %p3490_p9 = scmp.lt.s32.totalorder %s3486_s16, %s3870_s30  ;;  %p3491_p10 = scmp.lt.s32.totalorder %s3489_s21, %s3487_s26 }
  0xe4   :  { %p3492_p11 = por %p3491_p10, %p3490_p9 }
  0xe6   :  { %p3493_p12 = pnand %p3492_p11, %p3488_p8 }
  0xe8   :  { %3496 = shalt.err (!%p3493_p12)
}
  0xe9   :  { %352 = dma.hbm_to_vmem [thread:$0]  %s345_s27, 1024, %s347_s23, [#allocation17], %s3577_s7, %s3577_s7, %s3578_s10  }
  0xea   :  { %3509 = dma.done.wait [#allocation3], 1024  }
  0xeb   :  { %3510 = vsyncadd [#allocation3], 4294966272 }
  0xec   :  { %3511 = dma.done.wait [#allocation5], 2048  }
  0xed   :  { %3512 = vsyncadd [#allocation5], 4294965248 }
  0xee   :  { %3513 = dma.done.wait [#allocation8], 2048  }
  0xef   :  { %3514 = vsyncadd [#allocation8], 4294965248 }
  0xf0   :  { %3515 = dma.done.wait [#allocation11], 2048  }
  0xf1   :  { %3516 = vsyncadd [#allocation11], 4294965248 }
  0xf2   :  { %3517 = dma.done.wait [#allocation14], 2048  }
  0xf3   :  { %3518 = vsyncadd [#allocation14], 4294965248 }
  0xf4   :  { %3519 = dma.done.wait [#allocation17], 2048  }
  0xf5   :  { %3520 = vsyncadd [#allocation17], 4294965248  ;;  %vm636_vm0 = vcmask 1041408   ;;  %v583_v0 = vld [vmem:[%s3845_s19 + $0x10] sm:$0x3]  ;;  %v582_v1 = vld [vmem:[%s3845_s19 + $0x8] sm:$0xff]  ;;  %v617_v31 = vlaneseq }
  0xf6   :  { %2924 = vmatpush.msk.msra.mxu0 %vm636_vm0, %v583_v0  ;;  %v581_v2 = vld [vmem:[%s3845_s19] sm:$0xff]  ;;  %v556_v3 = vld [vmem:[#allocation7 + $0x38] sm:$0xff]  ;;  %vm629_vm1 = vcmask 146432   ;;  %v555_v6 = vld [vmem:[#allocation7 + $0x30] sm:$0xff]  ;;  %vm666_vm2 = vcmask 523264   ;;  %v3589_v44 = vmov 0.0  }
  0xf7   :  { %v580_v4 = vld [vmem:[#allocation12 + $0x38] sm:$0xff]  ;;  %v397_v5 = vld [vmem:[%s3600_s5] sm:$0xff]  ;;  %707 = vmatpush.msra.mxu2 %v556_v3  ;;  %v579_v7 = vld [vmem:[#allocation12 + $0x30] sm:$0xff]  ;;  %v3999_v33 = vand.u32 127, %v617_v31  ;;  %vm785_vm7 = vcmask 130048   ;;  %s4673_s19 = sld [smem:[#allocation54_spill]] }
  0xf8   :  { %654 = vmatpush.msra.mxu0 %v582_v1  ;;  %v572_v8 = vld [vmem:[#allocation10 + $0x38] sm:$0xff]  ;;  %733 = vmatpush.msra.mxu3 %v580_v4  ;;  %v554_v9 = vld [vmem:[#allocation7 + $0x28] sm:$0xff]  ;;  %v571_v11 = vld [vmem:[#allocation10 + $0x30] sm:$0xff]  ;;  %s4674_s30 = sld [smem:[#allocation55_spill]] }
  0xf9   :  { %708 = vmatpush.msra.mxu2 %v555_v6  ;;  %v578_v10 = vld [vmem:[#allocation12 + $0x28] sm:$0xff]  ;;  %v553_v12 = vld [vmem:[#allocation7 + $0x20] sm:$0xff]  ;;  %v552_v15 = vld [vmem:[#allocation7 + $0x18] sm:$0xff]  ;;  %vm624_vm3 = vcmp.ge.s32.totalorder %v3999_v33, 32  ;;  %vm625_vm4 = vcmp.lt.s32.totalorder %v3999_v33, 64  ;;  %vm620_vm5 = vcmp.lt.s32.totalorder %v3999_v33, 32 }
  0xfa   :  { %655 = vmatpush.msra.mxu0 %v581_v2  ;;  %734 = vmatpush.msra.mxu3 %v579_v7  ;;  %v570_v13 = vld [vmem:[#allocation10 + $0x28] sm:$0xff]  ;;  %v577_v14 = vld [vmem:[#allocation12 + $0x20] sm:$0xff]  ;;  %v576_v17 = vld [vmem:[#allocation12 + $0x18] sm:$0xff]  ;;  %v4007_v45 = vsel %vm620_vm5, 1.0, %v3589_v44  ;;  %s4676_s7 = sld [smem:[#allocation59_spill]] }
  0xfb   :  { %2925 = vmatmul.msk.f32.vlgmr.msra.gmra.mxu0 %vm629_vm1, %v397_v5  ;;  %709 = vmatpush.msra.mxu2 %v554_v9  ;;  %v569_v16 = vld [vmem:[#allocation10 + $0x20] sm:$0xff]  ;;  %v551_v18 = vld [vmem:[#allocation7 + $0x10] sm:$0xff]  ;;  %v398_v19 = vld [vmem:[%s3600_s5 + $0x8] sm:$0xff]  ;;  %s4669_s5 = sld [smem:[#allocation56_spill]] }
  0xfc   :  { %681 = vmatpush.msrb.mxu0 %v572_v8  ;;  %735 = vmatpush.msra.mxu3 %v578_v10  ;;  %v575_v20 = vld [vmem:[#allocation12 + $0x10] sm:$0xff]  ;;  %v568_v21 = vld [vmem:[#allocation10 + $0x18] sm:$0xff]  ;;  %v550_v22 = vld [vmem:[#allocation7 + $0x8] sm:$0xff]  ;;  %s4677_s10 = sld [smem:[#allocation25_spill]] }
  0xfd   :  { %710 = vmatpush.msra.mxu2 %v553_v12  ;;  %v574_v23 = vld [vmem:[#allocation12 + $0x8] sm:$0xff]  ;;  %v567_v24 = vld [vmem:[#allocation10 + $0x10] sm:$0xff]  ;;  %v565_v26 = vld [vmem:[#allocation10] sm:$0xff]  ;;  %s4678_s24 = sld [smem:[#allocation26_spill]] }
  0xfe   :  { %682 = vmatpush.msrb.mxu0 %v571_v11  ;;  %736 = vmatpush.msra.mxu3 %v577_v14  ;;  %v566_v25 = vld [vmem:[#allocation10 + $0x8] sm:$0xff]  ;;  %v549_v27 = vld [vmem:[#allocation7] sm:$0xff]  ;;  %vm626_vm6 = vmand %vm624_vm3, %vm625_vm4  ;;  %s4679_s8 = sld [smem:[#allocation52_spill]] }
  0xff   :  { %711 = vmatpush.msra.mxu2 %v552_v15  ;;  %v573_v28 = vld [vmem:[#allocation12] sm:$0xff]  ;;  %v4009_v46 = vsel %vm626_vm6, 1.0, %v3589_v44  ;;  %v404_v0 = vld [vmem:[%s3615_s17 + $0x8] sm:$0xff]  ;;  %s4680_s1 = sld [smem:[#allocation48_spill]] }
 0x100   :  { %683 = vmatpush.msrb.mxu0 %v570_v13  ;;  %737 = vmatpush.msra.mxu3 %v576_v17  ;;  %v3082_v35 = vld [vmem:[%s3790_s12] ss:$0 sm:$0xff]  ;;  %s4675_s12 = sld [smem:[#allocation60_spill]] }
 0x101   :  { %712 = vmatpush.msra.mxu2 %v551_v18  ;;  %v3081_v37 = vld [vmem:[%s3775_s3] ss:$0 sm:$0xff]  ;;  %s4671_s3 = sld [smem:[#allocation58_spill]] }
 0x102   :  { %684 = vmatpush.msrb.mxu0 %v569_v16  ;;  %738 = vmatpush.msra.mxu3 %v575_v20  ;;  %v3080_v38 = vld [vmem:[%s3785_s14] ss:$0 sm:$0xff]  ;;  %s4672_s14 = sld [smem:[#allocation57_spill]] }
 0x103   :  { %2926 = vmatmul.msk.f32.gmra.mxu0 %vm629_vm1, %v398_v19  ;;  %713 = vmatpush.msra.mxu2 %v550_v22  ;;  %v403_v59 = vld [vmem:[%s3615_s17] sm:$0xff]  ;;  %s4670_s17 = sld [smem:[#allocation61_spill]] }
 0x104   :  { %685 = vmatpush.msrb.mxu0 %v568_v21  ;;  %739 = vmatpush.msra.mxu3 %v574_v23  ;;  %s4681_s0 = sld [smem:[#allocation50_spill]] }
 0x105   :  { %714 = vmatpush.msra.mxu2 %v549_v27  ;;  %s4682_s22 = sld [smem:[#allocation51_spill]] }
 0x106   :  { %686 = vmatpush.msrb.mxu0 %v567_v24  ;;  %740 = vmatpush.msra.mxu3 %v573_v28  ;;  %s4683_s13 = sld [smem:[#allocation27_spill]] }
 0x107   :  { %s4684_s2 = sld [smem:[#allocation34_spill]] }
 0x108   :  { %687 = vmatpush.msrb.mxu0 %v566_v25  ;;  %s4685_s9 = sld [smem:[#allocation37_spill]] }
 0x109   :  { %s4686_s25 = sld [smem:[#allocation53_spill]] }
 0x10a   :  { %688 = vmatpush.msrb.mxu0 %v565_v26  ;;  %s4687_s28 = sld [smem:[#allocation36_spill]] }
 0x10b   :  { %s4688_s11 = sld [smem:[#allocation30_spill]] }
 0x10c   :  { %s4689_s15 = sld [smem:[#allocation33_spill]] }
 0x10d   :  { %s4690_s27 = sld [smem:[#allocation49_spill]] }
 0x10e   :  { %s4691_s29 = sld [smem:[#allocation41_spill]] }
 0x10f   :  { %s4692_s20 = sld [smem:[#allocation40_spill]] }
 0x110   :  { %s4693_s4 = sld [smem:[#allocation32_spill]] }
 0x111   :  { %s4694_s18 = sld [smem:[#allocation28_spill]] }
 0x112   :  { %s4695_s23 = sld [smem:[#allocation35_spill]] }
 0x113   :  { %s4696_s16 = sld [smem:[#allocation31_spill]] }
 0x114   :  { %s4697_s26 = sld [smem:[#allocation46_spill]] }
 0x115   :  { %s4698_s21 = sld [smem:[#allocation47_spill]] }
 0x178   :  { %v3982_v29 = vpop.f32.mrf.mxu0 }
 0x179   :  { %2927 = vmatmul.msk.f32.vlgmr.msrb.gmra.mxu0 %vm666_vm2, %v3982_v29  ;;  %2929 = vmatmul.msk.f32.vlgmr.msra.gmra.mxu2 %vm666_vm2, %v3982_v29 }
 0x17a   :  { %2931 = vmatmul.msk.f32.vlgmr.msra.gmra.mxu3 %vm666_vm2, %v3982_v29 }
 0x180   :  { %v3990_v30 = vpop.f32.mrf.mxu0 }
 0x181   :  { %2928 = vmatmul.msk.f32.gmra.mxu0 %vm666_vm2, %v3990_v30  ;;  %2930 = vmatmul.msk.f32.gmra.mxu2 %vm666_vm2, %v3990_v30 }
 0x182   :  { %2932 = vmatmul.msk.f32.gmra.mxu3 %vm666_vm2, %v3990_v30 }
 0x1f6   :  { %v690_v36 = vpop.f32.mrf.mxu0 }
 0x1f7   :  { %v691_v47 = vadd.f32 %v3080_v38, %v690_v36 }
 0x1f9   :  { %v748_v53 = vmul.f32 %v4007_v45, %v691_v47  ;;  %v810_v54 = vmul.f32 %v4009_v46, %v691_v47 }
 0x1fc   :  { %v716_v32 = vpop.f32.mrf.mxu2 }
 0x1fd   :  { %v742_v34 = vpop.f32.mrf.mxu3  ;;  %v717_v50 = vadd.f32 %v3081_v37, %v716_v32  ;;  %v564_v32 = vld [vmem:[#allocation9 + $0x38] sm:$0xff] }
 0x1fe   :  { %v743_v42 = vadd.f32 %v3082_v35, %v742_v34  ;;  %v693_v55 = vpop.f32.mrf.mxu0  ;;  %v563_v34 = vld [vmem:[#allocation9 + $0x30] sm:$0xff] }
 0x1ff   :  { %v694_v56 = vadd.f32 %v3080_v38, %v693_v55 }
 0x200   :  { %v863_v51 = vmul.f32 %v4009_v46, %v743_v42  ;;  %v808_v52 = vmul.f32 %v4007_v45, %v743_v42 }
 0x201   :  { %v749_v57 = vmul.f32 %v4007_v45, %v694_v56  ;;  %v811_v58 = vmul.f32 %v4009_v46, %v694_v56 }
 0x204   :  { %v719_v39 = vpop.f32.mrf.mxu2 }
 0x205   :  { %v720_v40 = vadd.f32 %v3081_v37, %v719_v39  ;;  %v745_v41 = vpop.f32.mrf.mxu3 }
 0x206   :  { %v746_v43 = vadd.f32 %v3082_v35, %v745_v41 }
 0x207   :  { %2933 = vmatpush.xpose.msk.msra.mxu0 %vm666_vm2, %v720_v40  ;;  %2937 = vmatpush.xpose.msk.msra.mxu1 %vm666_vm2, %v720_v40 }
 0x208   :  { %v864_v48 = vmul.f32 %v4009_v46, %v746_v43  ;;  %v809_v49 = vmul.f32 %v4007_v45, %v746_v43 }
 0x20a   :  { %885 = vmatpush.msrb.mxu2 %v864_v48  ;;  %914 = vmatpush.msrb.mxu3 %v809_v49  ;;  %v562_v49 = vld [vmem:[#allocation9 + $0x28] sm:$0xff] }
 0x20b   :  { %2934 = vmatpush.xpose.msk.msra.mxu0 %vm666_vm2, %v717_v50  ;;  %2938 = vmatpush.xpose.msk.msra.mxu1 %vm666_vm2, %v717_v50  ;;  %v561_v50 = vld [vmem:[#allocation9 + $0x20] sm:$0xff] }
 0x20c   :  { %886 = vmatpush.msrb.mxu2 %v863_v51  ;;  %915 = vmatpush.msrb.mxu3 %v808_v52  ;;  %v560_v51 = vld [vmem:[#allocation9 + $0x18] sm:$0xff]  ;;  %v559_v52 = vld [vmem:[#allocation9 + $0x10] sm:$0xff] }
 0x20e   :  { %2935 = vmatmul.msk.f32.vlgmr.msra.gmra.mxu0 %vm666_vm2, %v748_v53  ;;  %2939 = vmatmul.msk.f32.vlgmr.msra.gmra.mxu1 %vm666_vm2, %v810_v54  ;;  %v558_v53 = vld [vmem:[#allocation9 + $0x8] sm:$0xff]  ;;  %v557_v54 = vld [vmem:[#allocation9] sm:$0xff] }
 0x20f   :  { %940 = vmatpush.msrb.mxu0 %v564_v32 }
 0x211   :  { %941 = vmatpush.msrb.mxu0 %v563_v34 }
 0x213   :  { %942 = vmatpush.msrb.mxu0 %v562_v49 }
 0x215   :  { %943 = vmatpush.msrb.mxu0 %v561_v50  ;;  %v542_v50 = vld [vmem:[%s4670_s17 + $0x48] sm:$0xff] }
 0x216   :  { %2936 = vmatmul.msk.f32.gmra.mxu0 %vm666_vm2, %v749_v57  ;;  %2940 = vmatmul.msk.f32.gmra.mxu1 %vm666_vm2, %v811_v58 }
 0x217   :  { %944 = vmatpush.msrb.mxu0 %v560_v51 }
 0x219   :  { %945 = vmatpush.msrb.mxu0 %v559_v52  ;;  %v541_v52 = vld [vmem:[%s4670_s17 + $0x40] sm:$0xff] }
 0x21b   :  { %946 = vmatpush.msrb.mxu0 %v558_v53 }
 0x21d   :  { %947 = vmatpush.msrb.mxu0 %v557_v54 }
 0x28b   :  { %v779_v60 = vpop.f32.mrf.mxu0  ;;  %v835_v62 = vpop.f32.mrf.mxu1 }
 0x28c   :  { %v780_v61 = vadd.f32 %v779_v60, %v403_v59  ;;  %v836_v1 = vadd.f32 %v835_v62, %v403_v59 }
 0x28e   :  { %v786_v63 = vsel %vm785_vm7, %v780_v61, -inf  ;;  %v841_v5 = vsel %vm785_vm7, %v836_v1, -inf }
 0x28f   :  { %787 = vmax.xlane.f32.xlu0 %v786_v63 }
 0x293   :  { %v782_v2 = vpop.f32.mrf.mxu0  ;;  %v838_v6 = vpop.f32.mrf.mxu1 }
 0x294   :  { %v783_v3 = vadd.f32 %v782_v2, %v404_v0  ;;  %v839_v7 = vadd.f32 %v838_v6, %v404_v0  ;;  %v3590_v6 = vmov 64.0  }
 0x296   :  { %v789_v4 = vsel %vm785_vm7, %v783_v3, -inf  ;;  %v844_v8 = vsel %vm785_vm7, %v839_v7, -inf }
 0x297   :  { %790 = vmax.xlane.f32.xlu1 %v789_v4  ;;  %842 = vmax.xlane.f32.xlu0 %v841_v5 }
 0x29f   :  { %845 = vmax.xlane.f32.xlu1 %v844_v8 }
 0x302   :  { %v788_v9 = vpop.xlane.xlu0 %787 }
 0x303   :  { %v792_v10 = vsub.f32 %v780_v61, %v788_v9  ;;  %v3083_v61 = vld [vmem:[%s4669_s5] ss:$0 sm:$0xff]  ;;  %s4699_s5 = sld [smem:[#allocation43_spill]] }
 0x305   :  { %v794_v11 = vmul.f32 1.442695, %v792_v10 }
 0x307   :  { %3107 = vpow2.f32 %v794_v11 }
 0x30a   :  { %v791_v12 = vpop.xlane.xlu1 %790  ;;  %v843_v13 = vpop.xlane.xlu0 %842 }
 0x30b   :  { %v793_v14 = vsub.f32 %v783_v3, %v791_v12  ;;  %v847_v15 = vsub.f32 %v836_v1, %v843_v13 }
 0x30d   :  { %v3108_v16 = vpop.eup %3107  ;;  %v796_v17 = vmul.f32 1.442695, %v793_v14  ;;  %v849_v18 = vmul.f32 1.442695, %v847_v15 }
 0x30e   :  { %v798_v19 = vsel %vm785_vm7, %v3108_v16, 0.0 }
 0x30f   :  { %3109 = vpow2.f32 %v796_v17  ;;  %799 = vadd.xlane.f32.xlu2 %v798_v19 }
 0x310   :  { %3111 = vpow2.f32 %v849_v18 }
 0x312   :  { %v846_v20 = vpop.xlane.xlu1 %845 }
 0x313   :  { %v848_v21 = vsub.f32 %v839_v7, %v846_v20 }
 0x315   :  { %v3110_v22 = vpop.eup %3109  ;;  %v851_v23 = vmul.f32 1.442695, %v848_v21  ;;  %v532_v21 = vld [vmem:[#allocation6 + $0x38] sm:$0xff] }
 0x316   :  { %v3112_v24 = vpop.eup %3111  ;;  %v801_v25 = vsel %vm785_vm7, %v3110_v22, 0.0  ;;  %1035 = vmatpush.msrb.mxu1 %v532_v21 }
 0x317   :  { %3113 = vpow2.f32 %v851_v23  ;;  %802 = vadd.xlane.f32.xlu0 %v801_v25  ;;  %v853_v26 = vsel %vm785_vm7, %v3112_v24, 0.0  ;;  %v530_v23 = vld [vmem:[#allocation6 + $0x28] sm:$0xff]  ;;  %v528_v25 = vld [vmem:[#allocation6 + $0x18] sm:$0xff] }
 0x318   :  { %854 = vadd.xlane.f32.xlu2 %v853_v26  ;;  %v527_v26 = vld [vmem:[#allocation6 + $0x10] sm:$0xff] }
 0x31d   :  { %v3114_v27 = vpop.eup %3113 }
 0x31e   :  { %v856_v28 = vsel %vm785_vm7, %v3114_v27, 0.0 }
 0x31f   :  { %857 = vadd.xlane.f32.xlu1 %v856_v28  ;;  %v525_v28 = vld [vmem:[#allocation6] sm:$0xff] }
 0x382   :  { %v800_v35 = vpop.xlane.xlu2 %799 }
 0x383   :  { %3115 = vrcp.f32 %v800_v35 }
 0x389   :  { %v3116_v36 = vpop.eup %3115 }
 0x38a   :  { %v803_v37 = vpop.xlane.xlu0 %802  ;;  %v806_v38 = vmul.f32 %v3116_v36, %v3108_v16  ;;  %v548_v36 = vld [vmem:[%s4670_s17 + $0x78] sm:$0xff] }
 0x38b   :  { %v855_v39 = vpop.xlane.xlu2 %854  ;;  %3117 = vrcp.f32 %v803_v37  ;;  %v547_v37 = vld [vmem:[%s4670_s17 + $0x70] sm:$0xff]  ;;  %1055 = vmatpush.msra.mxu2 %v548_v36 }
 0x38c   :  { %3119 = vrcp.f32 %v855_v39  ;;  %2943 = vmatmul.msk.f32.vlgmr.msrb.gmra.mxu3 %vm785_vm7, %v806_v38  ;;  %v546_v38 = vld [vmem:[%s4670_s17 + $0x68] sm:$0xff] }
 0x38d   :  { %1056 = vmatpush.msra.mxu2 %v547_v37 }
 0x38f   :  { %1057 = vmatpush.msra.mxu2 %v546_v38 }
 0x391   :  { %v3118_v40 = vpop.eup %3117 }
 0x392   :  { %v3120_v41 = vpop.eup %3119  ;;  %v858_v42 = vpop.xlane.xlu1 %857  ;;  %v807_v43 = vmul.f32 %v3118_v40, %v3110_v22  ;;  %v531_v22 = vld [vmem:[#allocation6 + $0x30] sm:$0xff] }
 0x393   :  { %3121 = vrcp.f32 %v858_v42  ;;  %v861_v44 = vmul.f32 %v3120_v41, %v3112_v24  ;;  %1036 = vmatpush.msrb.mxu1 %v531_v22  ;;  %v529_v24 = vld [vmem:[#allocation6 + $0x20] sm:$0xff] }
 0x394   :  { %2944 = vmatmul.msk.f32.gmra.mxu3 %vm785_vm7, %v807_v43  ;;  %3123 = vrcp.f32 %v3590_v6  ;;  %v545_v41 = vld [vmem:[%s4670_s17 + $0x60] sm:$0xff]  ;;  %v536_v6 = vld [vmem:[%s4670_s17 + $0x18] sm:$0xff] }
 0x395   :  { %2941 = vmatmul.msk.f32.vlgmr.msrb.gmra.mxu2 %vm785_vm7, %v861_v44  ;;  %1037 = vmatpush.msrb.mxu1 %v530_v23  ;;  %v544_v44 = vld [vmem:[%s4670_s17 + $0x58] sm:$0xff] }
 0x396   :  { %1058 = vmatpush.msra.mxu2 %v545_v41 }
 0x397   :  { %1038 = vmatpush.msrb.mxu1 %v529_v24 }
 0x398   :  { %1059 = vmatpush.msra.mxu2 %v544_v44 }
 0x399   :  { %v3122_v47 = vpop.eup %3121  ;;  %1039 = vmatpush.msrb.mxu1 %v528_v25 }
 0x39a   :  { %v862_v48 = vmul.f32 %v3122_v47, %v3114_v27  ;;  %v3124_v7 = vpop.eup %3123  ;;  %v526_v27 = vld [vmem:[#allocation6 + $0x8] sm:$0xff] }
 0x39b   :  { %v964_v8 = vmul.f32 64.0, %v3124_v7  ;;  %vm968_vm8 = vweird.f32 %v3124_v7  ;;  %1040 = vmatpush.msrb.mxu1 %v527_v26 }
 0x39d   :  { %2942 = vmatmul.msk.f32.gmra.mxu2 %vm785_vm7, %v862_v48  ;;  %v965_v9 = vsub.f32 1.0, %v964_v8  ;;  %1041 = vmatpush.msrb.mxu1 %v526_v27  ;;  %v543_v48 = vld [vmem:[%s4670_s17 + $0x50] sm:$0xff] }
 0x39e   :  { %1060 = vmatpush.msra.mxu2 %v543_v48 }
 0x39f   :  { %v966_v10 = vmul.f32 %v3124_v7, %v965_v9  ;;  %1042 = vmatpush.msrb.mxu1 %v525_v28 }
 0x3a0   :  { %1061 = vmatpush.msra.mxu2 %v542_v50 }
 0x3a1   :  { %v967_v11 = vadd.f32 %v3124_v7, %v966_v10 }
 0x3a2   :  { %1062 = vmatpush.msra.mxu2 %v541_v52 }
 0x3a3   :  { %v4048_v12 = vsel %vm968_vm8, %v3124_v7, %v967_v11 }
 0x40f   :  { %v917_v55 = vpop.f32.mrf.mxu3 }
 0x417   :  { %v920_v58 = vpop.f32.mrf.mxu3 }
 0x418   :  { %v888_v56 = vpop.f32.mrf.mxu2 }
 0x419   :  { %v918_v57 = vadd.f32 %v917_v55, %v888_v56  ;;  %v540_v55 = vld [vmem:[%s4670_s17 + $0x38] sm:$0xff] }
 0x41a   :  { %1063 = vmatpush.msra.mxu2 %v540_v55 }
 0x41b   :  { %2945 = vmatmul.msk.f32.vlgmr.msrb.gmra.mxu0 %vm666_vm2, %v918_v57 }
 0x420   :  { %v891_v59 = vpop.f32.mrf.mxu2 }
 0x421   :  { %v921_v60 = vadd.f32 %v920_v58, %v891_v59  ;;  %v3084_v58 = vld [vmem:[%s4671_s3] ss:$0 sm:$0xff]  ;;  %v539_v59 = vld [vmem:[%s4670_s17 + $0x30] sm:$0xff]  ;;  %s4701_s3 = sld [smem:[#allocation38_spill]] }
 0x422   :  { %1064 = vmatpush.msra.mxu2 %v539_v59 }
 0x423   :  { %2946 = vmatmul.msk.f32.gmra.mxu0 %vm666_vm2, %v921_v60 }
 0x498   :  { %v949_v62 = vpop.f32.mrf.mxu0 }
 0x499   :  { %v950_v63 = vadd.f32 %v3083_v61, %v949_v62 }
 0x49b   :  { %v955_v0 = vadd.f32 %v950_v63, %v3982_v29  ;;  %v3085_v63 = vld [vmem:[%s4672_s14] ss:$0 sm:$0xff]  ;;  %s4702_s14 = sld [smem:[#allocation39_spill]] }
 0x49d   :  { %v957_v1 = vsel %vm666_vm2, %v955_v0, 0.0 }
 0x49e   :  { %958 = vadd.xlane.f32.xlu2 %v957_v1 }
 0x4a0   :  { %v952_v2 = vpop.f32.mrf.mxu0 }
 0x4a1   :  { %v953_v3 = vadd.f32 %v3083_v61, %v952_v2 }
 0x4a3   :  { %v956_v4 = vadd.f32 %v953_v3, %v3990_v30  ;;  %v537_v3 = vld [vmem:[%s4670_s17 + $0x20] sm:$0xff] }
 0x4a5   :  { %v960_v5 = vsel %vm666_vm2, %v956_v4, 0.0 }
 0x4a6   :  { %961 = vadd.xlane.f32.xlu0 %v960_v5 }
 0x511   :  { %v959_v29 = vpop.xlane.xlu2 %958 }
 0x512   :  { %v970_v13 = vmul.f32 %v4048_v12, %v959_v29  ;;  %v535_v29 = vld [vmem:[%s4670_s17 + $0x10] sm:$0xff] }
 0x514   :  { %v4051_v14 = vsub.f32 %v955_v0, %v970_v13  ;;  %v538_v0 = vld [vmem:[%s4670_s17 + $0x28] sm:$0xff] }
 0x515   :  { %1065 = vmatpush.msra.mxu2 %v538_v0  ;;  %v534_v13 = vld [vmem:[%s4670_s17 + $0x8] sm:$0xff] }
 0x516   :  { %v974_v30 = vmul.f32 %v4051_v14, %v4051_v14 }
 0x517   :  { %1066 = vmatpush.msra.mxu2 %v537_v3 }
 0x518   :  { %v976_v15 = vsel %vm666_vm2, %v974_v30, 0.0  ;;  %v3086_v30 = vld [vmem:[%s4673_s19] ss:$0 sm:$0xff]  ;;  %s4703_s19 = sld [smem:[#allocation29_spill]] }
 0x519   :  { %977 = vadd.xlane.f32.xlu1 %v976_v15  ;;  %v962_v16 = vpop.xlane.xlu0 %961  ;;  %1067 = vmatpush.msra.mxu2 %v536_v6 }
 0x51a   :  { %v971_v17 = vmul.f32 %v4048_v12, %v962_v16 }
 0x51b   :  { %1068 = vmatpush.msra.mxu2 %v535_v29 }
 0x51c   :  { %v4057_v18 = vsub.f32 %v956_v4, %v971_v17 }
 0x51d   :  { %1069 = vmatpush.msra.mxu2 %v534_v13 }
 0x51e   :  { %v975_v19 = vmul.f32 %v4057_v18, %v4057_v18 }
 0x520   :  { %v979_v20 = vsel %vm666_vm2, %v975_v19, 0.0 }
 0x521   :  { %980 = vadd.xlane.f32.xlu2 %v979_v20 }
 0x58c   :  { %v978_v32 = vpop.xlane.xlu1 %977 }
 0x58d   :  { %v982_v34 = vmul.f32 %v978_v32, %v4048_v12 }
 0x58f   :  { %v984_v35 = vadd.f32 1e-05, %v982_v34 }
 0x591   :  { %3125 = vrsqrt.f32 %v984_v35  ;;  %vm992_vm10 = vweird.f32 %v984_v35 }
 0x594   :  { %v981_v39 = vpop.xlane.xlu2 %980 }
 0x595   :  { %v983_v40 = vmul.f32 %v981_v39, %v4048_v12 }
 0x597   :  { %v3126_v42 = vpop.eup %3125  ;;  %v985_v43 = vadd.f32 1e-05, %v983_v40 }
 0x598   :  { %v987_v47 = vmul.f32 %v3126_v42, %v984_v35  ;;  %vm993_vm9 = vweird.f32 %v3126_v42 }
 0x599   :  { %3127 = vrsqrt.f32 %v985_v43  ;;  %vm994_vm11 = vmor %vm992_vm10, %vm993_vm9  ;;  %vm1002_vm13 = vweird.f32 %v985_v43 }
 0x59a   :  { %v988_v49 = vmul.f32 %v3126_v42, %v987_v47 }
 0x59c   :  { %v989_v51 = vmul.f32 0.5, %v988_v49 }
 0x59e   :  { %v990_v53 = vsub.f32 1.5, %v989_v51 }
 0x59f   :  { %v3128_v54 = vpop.eup %3127 }
 0x5a0   :  { %v991_v56 = vmul.f32 %v3126_v42, %v990_v53  ;;  %v997_v57 = vmul.f32 %v3128_v54, %v985_v43  ;;  %vm1003_vm12 = vweird.f32 %v3128_v54 }
 0x5a1   :  { %vm1004_vm14 = vmor %vm1002_vm13, %vm1003_vm12 }
 0x5a2   :  { %v995_v60 = vsel %vm994_vm11, %v3126_v42, %v991_v56  ;;  %v998_v61 = vmul.f32 %v3128_v54, %v997_v57  ;;  %v616_v56 = vld [vmem:[#allocation18 + $0x38] sm:$0xff] }
 0x5a3   :  { %v1006_v62 = vmul.f32 %v995_v60, %v4051_v14  ;;  %v533_v14 = vld [vmem:[%s4670_s17] sm:$0xff]  ;;  %1206 = vmatpush.msra.mxu1 %v616_v56  ;;  %v614_v60 = vld [vmem:[#allocation18 + $0x28] sm:$0xff]  ;;  %v501_v56 = vld [vmem:[#allocation2 + $0x10] sm:$0xff]  ;;  %s4700_s17 = sld [smem:[#allocation42_spill]] }
 0x5a4   :  { %v999_v1 = vmul.f32 0.5, %v998_v61  ;;  %1070 = vmatpush.msra.mxu2 %v533_v14  ;;  %v399_v14 = vld [vmem:[%s4677_s10] sm:$0xff] }
 0x5a5   :  { %v1011_v2 = vmul.f32 %v3084_v58, %v1006_v62  ;;  %v613_v62 = vld [vmem:[#allocation18 + $0x20] sm:$0xff] }
 0x5a6   :  { %v1000_v4 = vsub.f32 1.5, %v999_v1 }
 0x5a7   :  { %v1016_v5 = vadd.f32 %v3085_v63, %v1011_v2 }
 0x5a8   :  { %v1001_v7 = vmul.f32 %v3128_v54, %v1000_v4 }
 0x5a9   :  { %2947 = vmatmul.msk.f32.vlgmr.msrb.gmra.mxu1 %vm666_vm2, %v1016_v5 }
 0x5aa   :  { %v1005_v8 = vsel %vm1004_vm14, %v3128_v54, %v1001_v7 }
 0x5ab   :  { %v1007_v9 = vmul.f32 %v1005_v8, %v4057_v18  ;;  %v3087_v18 = vld [vmem:[%s4674_s30] ss:$0 sm:$0xff]  ;;  %s4704_s30 = sld [smem:[#allocation45_spill]] }
 0x5ad   :  { %v1012_v10 = vmul.f32 %v3084_v58, %v1007_v9  ;;  %v615_v58 = vld [vmem:[#allocation18 + $0x30] sm:$0xff] }
 0x5ae   :  { %1207 = vmatpush.msra.mxu1 %v615_v58  ;;  %v508_v58 = vld [vmem:[#allocation4 + $0x8] sm:$0xff] }
 0x5af   :  { %v1017_v11 = vadd.f32 %v3085_v63, %v1012_v10 }
 0x5b0   :  { %1208 = vmatpush.msra.mxu1 %v614_v60  ;;  %v483_v60 = vld [vmem:[%s4679_s8] sm:$0xff] }
 0x5b1   :  { %2948 = vmatmul.msk.f32.gmra.mxu1 %vm666_vm2, %v1017_v11 }
 0x5b2   :  { %1209 = vmatpush.msra.mxu1 %v613_v62  ;;  %v499_v62 = vld [vmem:[#allocation2] sm:$0xff] }
 0x626   :  { %v1044_v15 = vpop.f32.mrf.mxu1 }
 0x627   :  { %v1045_v16 = vadd.f32 %v3086_v30, %v1044_v15  ;;  %v608_v15 = vld [vmem:[#allocation16 + $0x38] sm:$0xff] }
 0x629   :  { %v1050_v17 = vmax.f32 %v1045_v16, 0.0  ;;  %v607_v16 = vld [vmem:[#allocation16 + $0x30] sm:$0xff] }
 0x62b   :  { %1071 = vmatmul.f32.vlgmr.msra.gmra.mxu2 %v1050_v17  ;;  %v606_v17 = vld [vmem:[#allocation16 + $0x28] sm:$0xff] }
 0x62e   :  { %v1047_v19 = vpop.f32.mrf.mxu1 }
 0x62f   :  { %v1048_v20 = vadd.f32 %v3086_v30, %v1047_v19  ;;  %v401_v30 = vld [vmem:[%s4678_s24] sm:$0xff] }
 0x630   :  { %v605_v19 = vld [vmem:[#allocation16 + $0x20] sm:$0xff] }
 0x631   :  { %v1051_v21 = vmax.f32 %v1048_v20, 0.0  ;;  %v400_v20 = vld [vmem:[%s4677_s10 + $0x8] sm:$0xff] }
 0x633   :  { %1074 = vmatmul.f32.gmra.mxu2 %v1051_v21  ;;  %v402_v21 = vld [vmem:[%s4678_s24 + $0x8] sm:$0xff] }
 0x6ae   :  { %v1072_v22 = vpop.f32.mrf.mxu2 }
 0x6af   :  { %v1073_v23 = vadd.f32 %v3087_v18, %v1072_v22  ;;  %v603_v22 = vld [vmem:[#allocation16 + $0x10] sm:$0xff] }
 0x6b1   :  { %v1078_v24 = vadd.f32 %v1073_v23, %v1016_v5  ;;  %v3088_v5 = vld [vmem:[%s4675_s12] ss:$0 sm:$0xff]  ;;  %v602_v23 = vld [vmem:[#allocation16 + $0x8] sm:$0xff]  ;;  %s4705_s12 = sld [smem:[#allocation44_spill]] }
 0x6b3   :  { %v1080_v25 = vsel %vm666_vm2, %v1078_v24, 0.0 }
 0x6b4   :  { %1081 = vadd.xlane.f32.xlu1 %v1080_v25  ;;  %v601_v25 = vld [vmem:[#allocation16] sm:$0xff] }
 0x6b6   :  { %v1075_v26 = vpop.f32.mrf.mxu2 }
 0x6b7   :  { %v1076_v27 = vadd.f32 %v3087_v18, %v1075_v26  ;;  %v604_v18 = vld [vmem:[#allocation16 + $0x18] sm:$0xff]  ;;  %v611_v26 = vld [vmem:[#allocation18 + $0x10] sm:$0xff] }
 0x6b9   :  { %v1079_v28 = vadd.f32 %v1076_v27, %v1017_v11  ;;  %v3089_v11 = vld [vmem:[%s4676_s7] ss:$0 sm:$0xff]  ;;  %v610_v27 = vld [vmem:[#allocation18 + $0x8] sm:$0xff]  ;;  %s4706_s7 = sld [smem:[#allocation62_spill]] }
 0x6bb   :  { %v1083_v32 = vsel %vm666_vm2, %v1079_v28, 0.0 }
 0x6bc   :  { %1084 = vadd.xlane.f32.xlu0 %v1083_v32  ;;  %v490_v32 = vld [vmem:[%s4679_s8 + $0x38] sm:$0xff] }
 0x727   :  { %v1082_v34 = vpop.xlane.xlu1 %1081 }
 0x728   :  { %v1086_v35 = vmul.f32 %v1082_v34, %v4048_v12  ;;  %v514_v34 = vld [vmem:[#allocation4 + $0x38] sm:$0xff] }
 0x729   :  { %1319 = vmatpush.msrb.mxu2 %v514_v34 }
 0x72a   :  { %v1088_v36 = vsub.f32 %v1078_v24, %v1086_v35  ;;  %v612_v24 = vld [vmem:[#allocation18 + $0x18] sm:$0xff]  ;;  %v489_v35 = vld [vmem:[%s4679_s8 + $0x30] sm:$0xff] }
 0x72b   :  { %1210 = vmatpush.msra.mxu1 %v612_v24 }
 0x72c   :  { %v1090_v37 = vmul.f32 %v1088_v36, %v1088_v36 }
 0x72d   :  { %1211 = vmatpush.msra.mxu1 %v611_v26 }
 0x72e   :  { %v1092_v38 = vsel %vm666_vm2, %v1090_v37, 0.0  ;;  %v506_v37 = vld [vmem:[#allocation2 + $0x38] sm:$0xff] }
 0x72f   :  { %1093 = vadd.xlane.f32.xlu0 %v1092_v38  ;;  %v1085_v39 = vpop.xlane.xlu0 %1084  ;;  %1212 = vmatpush.msra.mxu1 %v610_v27  ;;  %v488_v38 = vld [vmem:[%s4679_s8 + $0x28] sm:$0xff] }
 0x730   :  { %v1087_v40 = vmul.f32 %v1085_v39, %v4048_v12  ;;  %v512_v39 = vld [vmem:[#allocation4 + $0x28] sm:$0xff] }
 0x732   :  { %v1089_v41 = vsub.f32 %v1079_v28, %v1087_v40  ;;  %v609_v28 = vld [vmem:[#allocation18] sm:$0xff]  ;;  %v505_v40 = vld [vmem:[#allocation2 + $0x30] sm:$0xff] }
 0x733   :  { %1213 = vmatpush.msra.mxu1 %v609_v28 }
 0x734   :  { %v1091_v42 = vmul.f32 %v1089_v41, %v1089_v41 }
 0x735   :  { %1293 = vmatpush.msrb.mxu1 %v490_v32  ;;  %v405_v32 = vld [vmem:[%s4683_s13] sm:$0xff] }
 0x736   :  { %v1095_v43 = vsel %vm666_vm2, %v1091_v42, 0.0  ;;  %v487_v42 = vld [vmem:[%s4679_s8 + $0x20] sm:$0xff] }
 0x737   :  { %1096 = vadd.xlane.f32.xlu2 %v1095_v43  ;;  %1294 = vmatpush.msrb.mxu1 %v489_v35  ;;  %v511_v43 = vld [vmem:[#allocation4 + $0x20] sm:$0xff] }
 0x739   :  { %1295 = vmatpush.msrb.mxu1 %v488_v38 }
 0x73b   :  { %1296 = vmatpush.msrb.mxu1 %v487_v42 }
 0x7a2   :  { %v1094_v44 = vpop.xlane.xlu0 %1093 }
 0x7a3   :  { %v1098_v47 = vmul.f32 %v1094_v44, %v4048_v12  ;;  %v503_v44 = vld [vmem:[#allocation2 + $0x20] sm:$0xff] }
 0x7a5   :  { %v1100_v48 = vadd.f32 1e-05, %v1098_v47  ;;  %v486_v47 = vld [vmem:[%s4679_s8 + $0x18] sm:$0xff] }
 0x7a6   :  { %1297 = vmatpush.msrb.mxu1 %v486_v47 }
 0x7a7   :  { %3129 = vrsqrt.f32 %v1100_v48  ;;  %vm1108_vm0 = vweird.f32 %v1100_v48 }
 0x7aa   :  { %v1097_v49 = vpop.xlane.xlu2 %1096 }
 0x7ab   :  { %v1099_v50 = vmul.f32 %v1097_v49, %v4048_v12  ;;  %v485_v49 = vld [vmem:[%s4679_s8 + $0x10] sm:$0xff] }
 0x7ac   :  { %1298 = vmatpush.msrb.mxu1 %v485_v49 }
 0x7ad   :  { %v3130_v51 = vpop.eup %3129  ;;  %v1101_v52 = vadd.f32 1e-05, %v1099_v50  ;;  %v509_v50 = vld [vmem:[#allocation4 + $0x10] sm:$0xff] }
 0x7ae   :  { %v1103_v53 = vmul.f32 %v3130_v51, %v1100_v48  ;;  %vm1109_vm15 = vweird.f32 %v3130_v51  ;;  %v510_v48 = vld [vmem:[#allocation4 + $0x18] sm:$0xff] }
 0x7af   :  { %3131 = vrsqrt.f32 %v1101_v52  ;;  %vm1110_vm1 = vmor %vm1108_vm0, %vm1109_vm15  ;;  %vm1118_vm4 = vweird.f32 %v1101_v52 }
 0x7b0   :  { %v1104_v54 = vmul.f32 %v3130_v51, %v1103_v53 }
 0x7b2   :  { %v1105_v55 = vmul.f32 0.5, %v1104_v54 }
 0x7b4   :  { %v1106_v57 = vsub.f32 1.5, %v1105_v55  ;;  %v502_v55 = vld [vmem:[#allocation2 + $0x18] sm:$0xff] }
 0x7b5   :  { %v3132_v59 = vpop.eup %3131 }
 0x7b6   :  { %v1113_v61 = vmul.f32 %v3132_v59, %v1101_v52  ;;  %v1107_v63 = vmul.f32 %v3130_v51, %v1106_v57  ;;  %vm1119_vm3 = vweird.f32 %v3132_v59  ;;  %v484_v57 = vld [vmem:[%s4679_s8 + $0x8] sm:$0xff] }
 0x7b7   :  { %vm1120_vm5 = vmor %vm1118_vm4, %vm1119_vm3  ;;  %1299 = vmatpush.msrb.mxu1 %v484_v57 }
 0x7b8   :  { %v1114_v0 = vmul.f32 %v3132_v59, %v1113_v61  ;;  %v1111_v2 = vsel %vm1110_vm1, %v3130_v51, %v1107_v63  ;;  %v507_v61 = vld [vmem:[#allocation4] sm:$0xff] }
 0x7b9   :  { %v1122_v6 = vmul.f32 %v1111_v2, %v1088_v36  ;;  %v513_v36 = vld [vmem:[#allocation4 + $0x30] sm:$0xff]  ;;  %1300 = vmatpush.msrb.mxu1 %v483_v60 }
 0x7ba   :  { %v1115_v1 = vmul.f32 0.5, %v1114_v0  ;;  %1320 = vmatpush.msrb.mxu2 %v513_v36 }
 0x7bb   :  { %v1127_v9 = vmul.f32 %v3088_v5, %v1122_v6 }
 0x7bc   :  { %v1116_v3 = vsub.f32 1.5, %v1115_v1  ;;  %1321 = vmatpush.msrb.mxu2 %v512_v39 }
 0x7bd   :  { %v4102_v13 = vadd.f32 %v3089_v11, %v1127_v9  ;;  %v3091_v9 = vld [vmem:[%s4681_s0] ss:$0 sm:$0xff] }
 0x7be   :  { %v1117_v4 = vmul.f32 %v3132_v59, %v1116_v3  ;;  %1322 = vmatpush.msrb.mxu2 %v511_v43 }
 0x7c0   :  { %v1121_v7 = vsel %vm1120_vm5, %v3132_v59, %v1117_v4  ;;  %1323 = vmatpush.msrb.mxu2 %v510_v48  ;;  %v500_v59 = vld [vmem:[#allocation2 + $0x8] sm:$0xff] }
 0x7c1   :  { %v1123_v8 = vmul.f32 %v1121_v7, %v1089_v41  ;;  %v504_v41 = vld [vmem:[#allocation2 + $0x28] sm:$0xff]  ;;  %v3090_v7 = vld [vmem:[%s4680_s1] ss:$0 sm:$0xff] }
 0x7c2   :  { %1324 = vmatpush.msrb.mxu2 %v509_v50 }
 0x7c3   :  { %v1128_v10 = vmul.f32 %v3088_v5, %v1123_v8 }
 0x7c4   :  { %1325 = vmatpush.msrb.mxu2 %v508_v58 }
 0x7c5   :  { %v4098_v29 = vadd.f32 %v3089_v11, %v1128_v10 }
 0x7c6   :  { %1326 = vmatpush.msrb.mxu2 %v507_v61 }
 0x7c7   :  { %1154 = vmatpush.msra.mxu3 %v4098_v29  ;;  %1183 = vmatpush.msra.mxu0 %v4098_v29 }
 0x7c9   :  { %1155 = vmatpush.msra.mxu3 %v4102_v13  ;;  %1184 = vmatpush.msra.mxu0 %v4102_v13 }
 0x7ca   :  { %2949 = vmatmul.msk.f32.vlgmr.msra.gmra.mxu3 %vm785_vm7, %v399_v14  ;;  %2951 = vmatmul.msk.f32.vlgmr.msra.gmra.mxu0 %vm785_vm7, %v401_v30  ;;  %v3092_v14 = vld [vmem:[%s4682_s22] ss:$0 sm:$0xff] }
 0x7cb   :  { %1235 = vmatpush.msrb.mxu3 %v608_v15  ;;  %1267 = vmatpush.msrb.mxu0 %v506_v37 }
 0x7cd   :  { %1236 = vmatpush.msrb.mxu3 %v607_v16  ;;  %1268 = vmatpush.msrb.mxu0 %v505_v40  ;;  %v406_v40 = vld [vmem:[%s4683_s13 + $0x8] sm:$0xff] }
 0x7cf   :  { %1237 = vmatpush.msrb.mxu3 %v606_v17  ;;  %1269 = vmatpush.msrb.mxu0 %v504_v41 }
 0x7d1   :  { %1238 = vmatpush.msrb.mxu3 %v605_v19  ;;  %1270 = vmatpush.msrb.mxu0 %v503_v44 }
 0x7d2   :  { %2950 = vmatmul.msk.f32.gmra.mxu3 %vm785_vm7, %v400_v20  ;;  %2952 = vmatmul.msk.f32.gmra.mxu0 %vm785_vm7, %v402_v21 }
 0x7d3   :  { %1239 = vmatpush.msrb.mxu3 %v604_v18  ;;  %1271 = vmatpush.msrb.mxu0 %v502_v55 }
 0x7d5   :  { %1240 = vmatpush.msrb.mxu3 %v603_v22  ;;  %1272 = vmatpush.msrb.mxu0 %v501_v56 }
 0x7d7   :  { %1241 = vmatpush.msrb.mxu3 %v602_v23  ;;  %1273 = vmatpush.msrb.mxu0 %v500_v59 }
 0x7d9   :  { %1242 = vmatpush.msrb.mxu3 %v601_v25  ;;  %1274 = vmatpush.msrb.mxu0 %v499_v62 }
 0x847   :  { %v1186_v51 = vpop.f32.mrf.mxu0 }
 0x848   :  { %2953 = vmatmul.msk.f32.vlgmr.msra.gmra.mxu1 %vm666_vm2, %v1186_v51 }
 0x84d   :  { %v1157_v52 = vpop.f32.mrf.mxu3 }
 0x84e   :  { %2955 = vmatmul.msk.f32.vlgmr.msrb.gmra.mxu3 %vm666_vm2, %v1157_v52 }
 0x84f   :  { %v1189_v53 = vpop.f32.mrf.mxu0 }
 0x850   :  { %2954 = vmatmul.msk.f32.gmra.mxu1 %vm666_vm2, %v1189_v53 }
 0x855   :  { %v1160_v54 = vpop.f32.mrf.mxu3 }
 0x856   :  { %2956 = vmatmul.msk.f32.gmra.mxu3 %vm666_vm2, %v1160_v54 }
 0x8c5   :  { %v1215_v63 = vpop.f32.mrf.mxu1 }
 0x8cd   :  { %v1218_v2 = vpop.f32.mrf.mxu1 }
 0x8d1   :  { %v1244_v0 = vpop.f32.mrf.mxu3 }
 0x8d2   :  { %v4126_v1 = vadd.f32 %v1244_v0, %v1215_v63 }
 0x8d4   :  { %2959 = vmatmul.msk.f32.vlgmr.msrb.gmra.mxu1 %vm666_vm2, %v4126_v1  ;;  %2961 = vmatmul.msk.f32.vlgmr.msrb.gmra.mxu2 %vm666_vm2, %v4126_v1 }
 0x8d5   :  { %2957 = vmatmul.msk.f32.vlgmr.msrb.gmra.mxu0 %vm666_vm2, %v4126_v1 }
 0x8d9   :  { %v1247_v3 = vpop.f32.mrf.mxu3 }
 0x8da   :  { %v4134_v4 = vadd.f32 %v1247_v3, %v1218_v2 }
 0x8dc   :  { %2960 = vmatmul.msk.f32.gmra.mxu1 %vm666_vm2, %v4134_v4  ;;  %2962 = vmatmul.msk.f32.gmra.mxu2 %vm666_vm2, %v4134_v4 }
 0x8dd   :  { %2958 = vmatmul.msk.f32.gmra.mxu0 %vm666_vm2, %v4134_v4 }
 0x951   :  { %v1302_v5 = vpop.f32.mrf.mxu1 }
 0x952   :  { %v1276_v8 = vpop.f32.mrf.mxu0  ;;  %v1303_v15 = vadd.f32 %v3090_v7, %v1302_v5 }
 0x953   :  { %v1277_v30 = vadd.f32 %v3091_v9, %v1276_v8  ;;  %v446_v8 = vld [vmem:[%s4685_s9 + $0x38] sm:$0xff] }
 0x955   :  { %v1334_v20 = vmul.f32 %v4007_v45, %v1277_v30  ;;  %v1395_v21 = vmul.f32 %v4009_v46, %v1277_v30  ;;  %v419_v30 = vld [vmem:[%s4684_s2 + $0x20] sm:$0xff] }
 0x957   :  { %v1328_v6 = vpop.f32.mrf.mxu2 }
 0x958   :  { %v1329_v17 = vadd.f32 %v3092_v14, %v1328_v6 }
 0x959   :  { %v1305_v10 = vpop.f32.mrf.mxu1 }
 0x95a   :  { %v1306_v11 = vadd.f32 %v3090_v7, %v1305_v10  ;;  %v1279_v18 = vpop.f32.mrf.mxu0  ;;  %v1393_v24 = vmul.f32 %v4007_v45, %v1329_v17  ;;  %v1448_v25 = vmul.f32 %v4009_v46, %v1329_v17  ;;  %v422_v7 = vld [vmem:[%s4684_s2 + $0x38] sm:$0xff]  ;;  %v445_v10 = vld [vmem:[%s4685_s9 + $0x30] sm:$0xff] }
 0x95b   :  { %v1280_v26 = vadd.f32 %v3091_v9, %v1279_v18  ;;  %v421_v9 = vld [vmem:[%s4684_s2 + $0x30] sm:$0xff]  ;;  %v442_v17 = vld [vmem:[%s4685_s9 + $0x18] sm:$0xff]  ;;  %v440_v18 = vld [vmem:[%s4685_s9 + $0x8] sm:$0xff] }
 0x95c   :  { %2963 = vmatpush.xpose.msk.msra.mxu3 %vm666_vm2, %v1306_v11  ;;  %2967 = vmatpush.xpose.msk.msra.mxu0 %vm666_vm2, %v1306_v11  ;;  %v420_v11 = vld [vmem:[%s4684_s2 + $0x28] sm:$0xff] }
 0x95d   :  { %v1335_v27 = vmul.f32 %v4007_v45, %v1280_v26  ;;  %v1396_v28 = vmul.f32 %v4009_v46, %v1280_v26 }
 0x95f   :  { %v1331_v16 = vpop.f32.mrf.mxu2 }
 0x960   :  { %v1332_v19 = vadd.f32 %v3092_v14, %v1331_v16  ;;  %2964 = vmatpush.xpose.msk.msra.mxu3 %vm666_vm2, %v1303_v15  ;;  %2968 = vmatpush.xpose.msk.msra.mxu0 %vm666_vm2, %v1303_v15  ;;  %v444_v14 = vld [vmem:[%s4685_s9 + $0x28] sm:$0xff]  ;;  %v443_v15 = vld [vmem:[%s4685_s9 + $0x20] sm:$0xff]  ;;  %v418_v16 = vld [vmem:[%s4684_s2 + $0x18] sm:$0xff] }
 0x962   :  { %v1394_v22 = vmul.f32 %v4007_v45, %v1332_v19  ;;  %v1449_v23 = vmul.f32 %v4009_v46, %v1332_v19  ;;  %v417_v19 = vld [vmem:[%s4684_s2 + $0x10] sm:$0xff] }
 0x963   :  { %2965 = vmatmul.msk.f32.vlgmr.msra.gmra.mxu3 %vm666_vm2, %v1334_v20  ;;  %2969 = vmatmul.msk.f32.vlgmr.msra.gmra.mxu0 %vm666_vm2, %v1395_v21  ;;  %v441_v20 = vld [vmem:[%s4685_s9 + $0x10] sm:$0xff]  ;;  %v416_v21 = vld [vmem:[%s4684_s2 + $0x8] sm:$0xff] }
 0x964   :  { %1470 = vmatpush.msra.mxu1 %v1449_v23  ;;  %1499 = vmatpush.msra.mxu2 %v1394_v22  ;;  %v415_v22 = vld [vmem:[%s4684_s2] sm:$0xff] }
 0x965   :  { %v439_v23 = vld [vmem:[%s4685_s9] sm:$0xff] }
 0x966   :  { %1471 = vmatpush.msra.mxu1 %v1448_v25  ;;  %1500 = vmatpush.msra.mxu2 %v1393_v24 }
 0x968   :  { %1645 = vmatpush.msrb.mxu1 %v422_v7  ;;  %1671 = vmatpush.msrb.mxu2 %v446_v8  ;;  %v3094_v7 = vld [vmem:[%s4689_s15] ss:$0 sm:$0xff] }
 0x96a   :  { %1646 = vmatpush.msrb.mxu1 %v421_v9  ;;  %1672 = vmatpush.msrb.mxu2 %v445_v10 }
 0x96b   :  { %2966 = vmatmul.msk.f32.gmra.mxu3 %vm666_vm2, %v1335_v27  ;;  %2970 = vmatmul.msk.f32.gmra.mxu0 %vm666_vm2, %v1396_v28 }
 0x96c   :  { %1647 = vmatpush.msrb.mxu1 %v420_v11  ;;  %1673 = vmatpush.msrb.mxu2 %v444_v14 }
 0x96e   :  { %1648 = vmatpush.msrb.mxu1 %v419_v30  ;;  %1674 = vmatpush.msrb.mxu2 %v443_v15 }
 0x970   :  { %1649 = vmatpush.msrb.mxu1 %v418_v16  ;;  %1675 = vmatpush.msrb.mxu2 %v442_v17  ;;  %v3095_v17 = vld [vmem:[%s4690_s27] ss:$0 sm:$0xff] }
 0x972   :  { %1650 = vmatpush.msrb.mxu1 %v417_v19  ;;  %1676 = vmatpush.msrb.mxu2 %v441_v20 }
 0x974   :  { %1651 = vmatpush.msrb.mxu1 %v416_v21  ;;  %1677 = vmatpush.msrb.mxu2 %v440_v18 }
 0x976   :  { %1652 = vmatpush.msrb.mxu1 %v415_v22  ;;  %1678 = vmatpush.msrb.mxu2 %v439_v23 }
 0x9e0   :  { %v1420_v34 = vpop.f32.mrf.mxu0 }
 0x9e1   :  { %v1421_v35 = vadd.f32 %v1420_v34, %v405_v32 }
 0x9e3   :  { %v1426_v36 = vsel %vm785_vm7, %v1421_v35, -inf }
 0x9e4   :  { %1427 = vmax.xlane.f32.xlu2 %v1426_v36 }
 0x9e6   :  { %v1365_v37 = vpop.f32.mrf.mxu3 }
 0x9e7   :  { %v1366_v38 = vadd.f32 %v1365_v37, %v405_v32 }
 0x9e8   :  { %v1423_v41 = vpop.f32.mrf.mxu0 }
 0x9e9   :  { %v1371_v39 = vsel %vm785_vm7, %v1366_v38, -inf  ;;  %v1424_v42 = vadd.f32 %v1423_v41, %v406_v40  ;;  %v497_v41 = vld [vmem:[%s4686_s25 + $0x30] sm:$0xff] }
 0x9ea   :  { %1372 = vmax.xlane.f32.xlu1 %v1371_v39 }
 0x9eb   :  { %v1429_v48 = vsel %vm785_vm7, %v1424_v42, -inf }
 0x9ee   :  { %v1368_v43 = vpop.f32.mrf.mxu3 }
 0x9ef   :  { %v1369_v44 = vadd.f32 %v1368_v43, %v406_v40  ;;  %v498_v40 = vld [vmem:[%s4686_s25 + $0x38] sm:$0xff]  ;;  %v495_v43 = vld [vmem:[%s4686_s25 + $0x20] sm:$0xff] }
 0x9f0   :  { %1525 = vmatpush.msrb.mxu3 %v498_v40 }
 0x9f1   :  { %v1374_v47 = vsel %vm785_vm7, %v1369_v44, -inf }
 0x9f2   :  { %1375 = vmax.xlane.f32.xlu0 %v1374_v47  ;;  %1430 = vmax.xlane.f32.xlu1 %v1429_v48  ;;  %v493_v47 = vld [vmem:[%s4686_s25 + $0x10] sm:$0xff]  ;;  %v492_v48 = vld [vmem:[%s4686_s25 + $0x8] sm:$0xff] }
 0x9f3   :  { %1526 = vmatpush.msrb.mxu3 %v497_v41 }
 0xa57   :  { %v1428_v49 = vpop.xlane.xlu2 %1427 }
 0xa58   :  { %v1432_v50 = vsub.f32 %v1421_v35, %v1428_v49  ;;  %v491_v49 = vld [vmem:[%s4686_s25] sm:$0xff] }
 0xa5a   :  { %v1434_v51 = vmul.f32 1.442695, %v1432_v50  ;;  %v438_v50 = vld [vmem:[%s4687_s28 + $0x38] sm:$0xff] }
 0xa5b   :  { %1613 = vmatpush.msrb.mxu0 %v438_v50 }
 0xa5c   :  { %3133 = vpow2.f32 %v1434_v51  ;;  %v437_v51 = vld [vmem:[%s4687_s28 + $0x30] sm:$0xff] }
 0xa5d   :  { %v1373_v52 = vpop.xlane.xlu1 %1372  ;;  %1614 = vmatpush.msrb.mxu0 %v437_v51 }
 0xa5e   :  { %v1377_v53 = vsub.f32 %v1366_v38, %v1373_v52  ;;  %v436_v52 = vld [vmem:[%s4687_s28 + $0x28] sm:$0xff] }
 0xa5f   :  { %1615 = vmatpush.msrb.mxu0 %v436_v52 }
 0xa60   :  { %v1379_v54 = vmul.f32 1.442695, %v1377_v53  ;;  %v435_v53 = vld [vmem:[%s4687_s28 + $0x20] sm:$0xff] }
 0xa61   :  { %1616 = vmatpush.msrb.mxu0 %v435_v53 }
 0xa62   :  { %v3134_v55 = vpop.eup %3133  ;;  %3135 = vpow2.f32 %v1379_v54  ;;  %v434_v54 = vld [vmem:[%s4687_s28 + $0x18] sm:$0xff] }
 0xa63   :  { %v1438_v56 = vsel %vm785_vm7, %v3134_v55, 0.0  ;;  %1617 = vmatpush.msrb.mxu0 %v434_v54  ;;  %v3096_v54 = vld [vmem:[%s4691_s29] ss:$0 sm:$0xff] }
 0xa64   :  { %1439 = vadd.xlane.f32.xlu0 %v1438_v56  ;;  %v432_v56 = vld [vmem:[%s4687_s28 + $0x8] sm:$0xff] }
 0xa65   :  { %v1376_v57 = vpop.xlane.xlu0 %1375  ;;  %v1431_v58 = vpop.xlane.xlu1 %1430 }
 0xa66   :  { %v1378_v59 = vsub.f32 %v1369_v44, %v1376_v57  ;;  %v1433_v60 = vsub.f32 %v1424_v42, %v1431_v58  ;;  %v496_v42 = vld [vmem:[%s4686_s25 + $0x28] sm:$0xff]  ;;  %v494_v44 = vld [vmem:[%s4686_s25 + $0x18] sm:$0xff]  ;;  %v431_v57 = vld [vmem:[%s4687_s28] sm:$0xff] }
 0xa67   :  { %1527 = vmatpush.msrb.mxu3 %v496_v42 }
 0xa68   :  { %v3136_v61 = vpop.eup %3135  ;;  %v1381_v62 = vmul.f32 1.442695, %v1378_v59  ;;  %v1436_v63 = vmul.f32 1.442695, %v1433_v60 }
 0xa69   :  { %v1383_v0 = vsel %vm785_vm7, %v3136_v61, 0.0  ;;  %1528 = vmatpush.msrb.mxu3 %v495_v43 }
 0xa6a   :  { %3137 = vpow2.f32 %v1381_v62  ;;  %1384 = vadd.xlane.f32.xlu2 %v1383_v0 }
 0xa6b   :  { %3139 = vpow2.f32 %v1436_v63  ;;  %1529 = vmatpush.msrb.mxu3 %v494_v44 }
 0xa6d   :  { %1530 = vmatpush.msrb.mxu3 %v493_v47 }
 0xa6f   :  { %1531 = vmatpush.msrb.mxu3 %v492_v48 }
 0xa70   :  { %v3138_v2 = vpop.eup %3137 }
 0xa71   :  { %v3140_v3 = vpop.eup %3139  ;;  %v1386_v5 = vsel %vm785_vm7, %v3138_v2, 0.0  ;;  %1532 = vmatpush.msrb.mxu3 %v491_v49 }
 0xa72   :  { %1387 = vadd.xlane.f32.xlu1 %v1386_v5  ;;  %v1441_v6 = vsel %vm785_vm7, %v3140_v3, 0.0 }
 0xa73   :  { %1442 = vadd.xlane.f32.xlu2 %v1441_v6 }
 0xad7   :  { %v1440_v24 = vpop.xlane.xlu0 %1439 }
 0xad8   :  { %3141 = vrcp.f32 %v1440_v24 }
 0xadd   :  { %v1385_v25 = vpop.xlane.xlu2 %1384 }
 0xade   :  { %v3142_v26 = vpop.eup %3141  ;;  %3143 = vrcp.f32 %v1385_v25 }
 0xadf   :  { %v1446_v27 = vmul.f32 %v3142_v26, %v3134_v55  ;;  %v433_v55 = vld [vmem:[%s4687_s28 + $0x10] sm:$0xff] }
 0xae0   :  { %1618 = vmatpush.msrb.mxu0 %v433_v55 }
 0xae1   :  { %2971 = vmatmul.msk.f32.vlgmr.msra.gmra.mxu1 %vm785_vm7, %v1446_v27 }
 0xae2   :  { %1619 = vmatpush.msrb.mxu0 %v432_v56 }
 0xae4   :  { %v3144_v28 = vpop.eup %3143  ;;  %1620 = vmatpush.msrb.mxu0 %v431_v57 }
 0xae5   :  { %v1391_v32 = vmul.f32 %v3144_v28, %v3136_v61  ;;  %v1388_v34 = vpop.xlane.xlu1 %1387 }
 0xae6   :  { %v1443_v35 = vpop.xlane.xlu2 %1442  ;;  %3145 = vrcp.f32 %v1388_v34 }
 0xae7   :  { %3147 = vrcp.f32 %v1443_v35  ;;  %2973 = vmatmul.msk.f32.vlgmr.msra.gmra.mxu2 %vm785_vm7, %v1391_v32 }
 0xaec   :  { %v3146_v36 = vpop.eup %3145 }
 0xaed   :  { %v3148_v37 = vpop.eup %3147  ;;  %v1392_v38 = vmul.f32 %v3146_v36, %v3138_v2 }
 0xaee   :  { %v1447_v39 = vmul.f32 %v3148_v37, %v3140_v3  ;;  %v3093_v3 = vld [vmem:[%s4688_s11] ss:$0 sm:$0xff] }
 0xaef   :  { %2974 = vmatmul.msk.f32.gmra.mxu2 %vm785_vm7, %v1392_v38 }
 0xaf0   :  { %2972 = vmatmul.msk.f32.gmra.mxu1 %vm785_vm7, %v1447_v39 }
 0xaf7   :  { %2981 = vmatmul.msk.f32.vlgmr.msrb.gmra.mxu2 %vm666_vm2, %v4102_v13 }
 0xaf8   :  { %2979 = vmatmul.msk.f32.vlgmr.msrb.gmra.mxu1 %vm666_vm2, %v4102_v13 }
 0xaff   :  { %2982 = vmatmul.msk.f32.gmra.mxu2 %vm666_vm2, %v4098_v29 }
 0xb00   :  { %2980 = vmatmul.msk.f32.gmra.mxu1 %vm666_vm2, %v4098_v29 }
 0xb5e   :  { %v1473_v58 = vpop.f32.mrf.mxu1 }
 0xb6a   :  { %v1502_v59 = vpop.f32.mrf.mxu2 }
 0xb6b   :  { %v1503_v60 = vadd.f32 %v1502_v59, %v1473_v58  ;;  %v3097_v58 = vld [vmem:[%s4692_s20] ss:$0 sm:$0xff] }
 0xb6d   :  { %v1476_v61 = vpop.f32.mrf.mxu1  ;;  %2975 = vmatmul.msk.f32.vlgmr.msrb.gmra.mxu3 %vm666_vm2, %v1503_v60 }
 0xb72   :  { %v1505_v62 = vpop.f32.mrf.mxu2 }
 0xb73   :  { %v1506_v63 = vadd.f32 %v1505_v62, %v1476_v61 }
 0xb75   :  { %v1654_v0 = vpop.f32.mrf.mxu1  ;;  %2976 = vmatmul.msk.f32.gmra.mxu3 %vm666_vm2, %v1506_v63 }
 0xb76   :  { %v1655_v8 = vadd.f32 %v3093_v3, %v1654_v0 }
 0xb7a   :  { %v1680_v2 = vpop.f32.mrf.mxu2 }
 0xb7b   :  { %v1681_v10 = vadd.f32 %v3094_v7, %v1680_v2 }
 0xb7d   :  { %v1657_v5 = vpop.f32.mrf.mxu1  ;;  %v1745_v15 = vmul.f32 %v4007_v45, %v1681_v10  ;;  %v1800_v16 = vmul.f32 %v4009_v46, %v1681_v10 }
 0xb7e   :  { %v1658_v6 = vadd.f32 %v3093_v3, %v1657_v5 }
 0xb80   :  { %2983 = vmatpush.xpose.msk.msra.mxu3 %vm666_vm2, %v1658_v6  ;;  %2987 = vmatpush.xpose.msk.msra.mxu0 %vm666_vm2, %v1658_v6  ;;  %v3098_v6 = vld [vmem:[%s4693_s4] ss:$0 sm:$0xff] }
 0xb82   :  { %v1683_v9 = vpop.f32.mrf.mxu2 }
 0xb83   :  { %v1684_v11 = vadd.f32 %v3094_v7, %v1683_v9 }
 0xb84   :  { %2984 = vmatpush.xpose.msk.msra.mxu3 %vm666_vm2, %v1655_v8  ;;  %2988 = vmatpush.xpose.msk.msra.mxu0 %vm666_vm2, %v1655_v8 }
 0xb85   :  { %v1746_v14 = vmul.f32 %v4007_v45, %v1684_v11  ;;  %v1801_v30 = vmul.f32 %v4009_v46, %v1684_v11 }
 0xb87   :  { %1822 = vmatpush.msra.mxu1 %v1801_v30  ;;  %1851 = vmatpush.msra.mxu2 %v1746_v14 }
 0xb89   :  { %1823 = vmatpush.msra.mxu1 %v1800_v16  ;;  %1852 = vmatpush.msra.mxu2 %v1745_v15  ;;  %v407_v16 = vld [vmem:[%s4694_s18] sm:$0xff] }
 0xbf0   :  { %v1534_v19 = vpop.f32.mrf.mxu3 }
 0xbf1   :  { %v1535_v20 = vadd.f32 %v3095_v17, %v1534_v19 }
 0xbf3   :  { %v1540_v21 = vadd.f32 %v1535_v20, %v4126_v1 }
 0xbf5   :  { %v1542_v18 = vsel %vm666_vm2, %v1540_v21, 0.0 }
 0xbf6   :  { %1543 = vadd.xlane.f32.xlu0 %v1542_v18 }
 0xbf8   :  { %v1537_v22 = vpop.f32.mrf.mxu3 }
 0xbf9   :  { %v1538_v23 = vadd.f32 %v3095_v17, %v1537_v22 }
 0xbfb   :  { %v1541_v24 = vadd.f32 %v1538_v23, %v4134_v4  ;;  %v408_v23 = vld [vmem:[%s4694_s18 + $0x8] sm:$0xff] }
 0xbfd   :  { %v1545_v25 = vsel %vm666_vm2, %v1541_v24, 0.0 }
 0xbfe   :  { %1546 = vadd.xlane.f32.xlu1 %v1545_v25 }
 0xc69   :  { %v1544_v26 = vpop.xlane.xlu0 %1543 }
 0xc6a   :  { %v1548_v27 = vmul.f32 %v1544_v26, %v4048_v12 }
 0xc6c   :  { %v1550_v28 = vsub.f32 %v1540_v21, %v1548_v27 }
 0xc6e   :  { %v1552_v32 = vmul.f32 %v1550_v28, %v1550_v28 }
 0xc70   :  { %v1554_v34 = vsel %vm666_vm2, %v1552_v32, 0.0 }
 0xc71   :  { %1555 = vadd.xlane.f32.xlu2 %v1554_v34  ;;  %v1547_v35 = vpop.xlane.xlu1 %1546 }
 0xc72   :  { %v1549_v1 = vmul.f32 %v1547_v35, %v4048_v12 }
 0xc74   :  { %v1551_v36 = vsub.f32 %v1541_v24, %v1549_v1 }
 0xc76   :  { %v1553_v37 = vmul.f32 %v1551_v36, %v1551_v36 }
 0xc78   :  { %v1557_v38 = vsel %vm666_vm2, %v1553_v37, 0.0 }
 0xc79   :  { %1558 = vadd.xlane.f32.xlu0 %v1557_v38 }
 0xce4   :  { %v1556_v4 = vpop.xlane.xlu2 %1555 }
 0xce5   :  { %v1560_v39 = vmul.f32 %v1556_v4, %v4048_v12 }
 0xce7   :  { %v1562_v40 = vadd.f32 1e-05, %v1560_v39 }
 0xce9   :  { %3149 = vrsqrt.f32 %v1562_v40  ;;  %vm1570_vm8 = vweird.f32 %v1562_v40 }
 0xcec   :  { %v1559_v41 = vpop.xlane.xlu0 %1558 }
 0xced   :  { %v1561_v42 = vmul.f32 %v1559_v41, %v4048_v12 }
 0xcef   :  { %v3150_v43 = vpop.eup %3149  ;;  %v1563_v44 = vadd.f32 1e-05, %v1561_v42 }
 0xcf0   :  { %v1565_v47 = vmul.f32 %v3150_v43, %v1562_v40  ;;  %vm1571_vm6 = vweird.f32 %v3150_v43 }
 0xcf1   :  { %3151 = vrsqrt.f32 %v1563_v44  ;;  %vm1572_vm9 = vmor %vm1570_vm8, %vm1571_vm6  ;;  %vm1580_vm11 = vweird.f32 %v1563_v44 }
 0xcf2   :  { %v1566_v48 = vmul.f32 %v3150_v43, %v1565_v47 }
 0xcf4   :  { %v1567_v49 = vmul.f32 0.5, %v1566_v48 }
 0xcf6   :  { %v1568_v50 = vsub.f32 1.5, %v1567_v49 }
 0xcf7   :  { %v3152_v51 = vpop.eup %3151 }
 0xcf8   :  { %v1569_v52 = vmul.f32 %v3150_v43, %v1568_v50  ;;  %v1575_v53 = vmul.f32 %v3152_v51, %v1563_v44  ;;  %vm1581_vm10 = vweird.f32 %v3152_v51 }
 0xcf9   :  { %vm1582_vm12 = vmor %vm1580_vm11, %vm1581_vm10  ;;  %vm2306_vm10 = vcmask 1042434   ;;  %vm2308_vm11 = vcmask 1043459  }
 0xcfa   :  { %v1573_v55 = vsel %vm1572_vm9, %v3150_v43, %v1569_v52  ;;  %v1576_v56 = vmul.f32 %v3152_v51, %v1575_v53  ;;  %v592_v52 = vld [vmem:[#allocation13 + $0x38] sm:$0xff]  ;;  %v591_v53 = vld [vmem:[#allocation13 + $0x30] sm:$0xff] }
 0xcfb   :  { %v1584_v57 = vmul.f32 %v1573_v55, %v1550_v28  ;;  %2072 = vmatpush.msrb.mxu2 %v592_v52  ;;  %v589_v55 = vld [vmem:[#allocation13 + $0x20] sm:$0xff] }
 0xcfc   :  { %v1577_v59 = vmul.f32 0.5, %v1576_v56  ;;  %v588_v56 = vld [vmem:[#allocation13 + $0x18] sm:$0xff] }
 0xcfd   :  { %v1589_v60 = vmul.f32 %v3096_v54, %v1584_v57  ;;  %2073 = vmatpush.msrb.mxu2 %v591_v53  ;;  %v587_v57 = vld [vmem:[#allocation13 + $0x10] sm:$0xff] }
 0xcfe   :  { %v1578_v61 = vsub.f32 1.5, %v1577_v59  ;;  %v585_v59 = vld [vmem:[#allocation13] sm:$0xff] }
 0xcff   :  { %v4240_v62 = vadd.f32 %v3097_v58, %v1589_v60 }
 0xd00   :  { %v1579_v63 = vmul.f32 %v3152_v51, %v1578_v61 }
 0xd01   :  { %2977 = vmatmul.msk.f32.vlgmr.msrb.gmra.mxu0 %vm666_vm2, %v4240_v62 }
 0xd02   :  { %v1583_v0 = vsel %vm1582_vm12, %v3152_v51, %v1579_v63  ;;  %vm2310_vm12 = vcmask 1044484  }
 0xd03   :  { %v1585_v2 = vmul.f32 %v1583_v0, %v1551_v36 }
 0xd05   :  { %v1590_v3 = vmul.f32 %v3096_v54, %v1585_v2  ;;  %v590_v54 = vld [vmem:[#allocation13 + $0x28] sm:$0xff] }
 0xd06   :  { %2074 = vmatpush.msrb.mxu2 %v590_v54 }
 0xd07   :  { %v4244_v5 = vadd.f32 %v3097_v58, %v1590_v3  ;;  %v586_v58 = vld [vmem:[#allocation13 + $0x8] sm:$0xff] }
 0xd08   :  { %2075 = vmatpush.msrb.mxu2 %v589_v55  ;;  %v478_v55 = vld [vmem:[%s4698_s21 + $0x78] sm:$0xff] }
 0xd09   :  { %2978 = vmatmul.msk.f32.gmra.mxu0 %vm666_vm2, %v4244_v5  ;;  %1985 = vmatpush.msrb.mxu1 %v478_v55 }
 0xd0a   :  { %2076 = vmatpush.msrb.mxu2 %v588_v56  ;;  %v477_v56 = vld [vmem:[%s4698_s21 + $0x70] sm:$0xff] }
 0xd0b   :  { %1986 = vmatpush.msrb.mxu1 %v477_v56 }
 0xd0c   :  { %2077 = vmatpush.msrb.mxu2 %v587_v57  ;;  %v476_v57 = vld [vmem:[%s4698_s21 + $0x68] sm:$0xff] }
 0xd0d   :  { %1987 = vmatpush.msrb.mxu1 %v476_v57 }
 0xd0e   :  { %2078 = vmatpush.msrb.mxu2 %v586_v58 }
 0xd10   :  { %2079 = vmatpush.msrb.mxu2 %v585_v59 }
 0xd7e   :  { %v1622_v7 = vpop.f32.mrf.mxu0 }
 0xd7f   :  { %v1623_v8 = vadd.f32 %v3098_v6, %v1622_v7 }
 0xd81   :  { %v1686_v9 = vmul.f32 %v4007_v45, %v1623_v8  ;;  %v1747_v10 = vmul.f32 %v4009_v46, %v1623_v8 }
 0xd83   :  { %2985 = vmatmul.msk.f32.vlgmr.msra.gmra.mxu3 %vm666_vm2, %v1686_v9  ;;  %2989 = vmatmul.msk.f32.vlgmr.msra.gmra.mxu0 %vm666_vm2, %v1747_v10 }
 0xd86   :  { %v1625_v11 = vpop.f32.mrf.mxu0 }
 0xd87   :  { %v1626_v14 = vadd.f32 %v3098_v6, %v1625_v11 }
 0xd89   :  { %v1687_v30 = vmul.f32 %v4007_v45, %v1626_v14  ;;  %v1748_v15 = vmul.f32 %v4009_v46, %v1626_v14  ;;  %v430_v14 = vld [vmem:[%s4695_s23 + $0x38] sm:$0xff] }
 0xd8a   :  { %1877 = vmatpush.msrb.mxu3 %v430_v14  ;;  %v470_v14 = vld [vmem:[%s4698_s21 + $0x38] sm:$0xff] }
 0xd8b   :  { %2986 = vmatmul.msk.f32.gmra.mxu3 %vm666_vm2, %v1687_v30  ;;  %2990 = vmatmul.msk.f32.gmra.mxu0 %vm666_vm2, %v1748_v15  ;;  %v429_v30 = vld [vmem:[%s4695_s23 + $0x30] sm:$0xff]  ;;  %v428_v15 = vld [vmem:[%s4695_s23 + $0x28] sm:$0xff] }
 0xd8c   :  { %1878 = vmatpush.msrb.mxu3 %v429_v30 }
 0xd8e   :  { %1879 = vmatpush.msrb.mxu3 %v428_v15 }
 0xe00   :  { %v1772_v17 = vpop.f32.mrf.mxu0 }
 0xe01   :  { %v1773_v19 = vadd.f32 %v1772_v17, %v407_v16  ;;  %v426_v17 = vld [vmem:[%s4695_s23 + $0x18] sm:$0xff] }
 0xe03   :  { %v1778_v20 = vsel %vm785_vm7, %v1773_v19, -inf }
 0xe04   :  { %1779 = vmax.xlane.f32.xlu2 %v1778_v20  ;;  %v424_v20 = vld [vmem:[%s4695_s23 + $0x8] sm:$0xff] }
 0xe06   :  { %v1717_v21 = vpop.f32.mrf.mxu3 }
 0xe07   :  { %v1718_v18 = vadd.f32 %v1717_v21, %v407_v16  ;;  %v427_v16 = vld [vmem:[%s4695_s23 + $0x20] sm:$0xff] }
 0xe08   :  { %v1775_v24 = vpop.f32.mrf.mxu0  ;;  %1880 = vmatpush.msrb.mxu3 %v427_v16  ;;  %v3100_v16 = vld [vmem:[%s4699_s5] ss:$0 sm:$0xff] }
 0xe09   :  { %v1723_v22 = vsel %vm785_vm7, %v1718_v18, -inf  ;;  %v1776_v45 = vadd.f32 %v1775_v24, %v408_v23 }
 0xe0a   :  { %1724 = vmax.xlane.f32.xlu1 %v1723_v22  ;;  %1881 = vmatpush.msrb.mxu3 %v426_v17  ;;  %v469_v17 = vld [vmem:[%s4698_s21 + $0x30] sm:$0xff] }
 0xe0b   :  { %v1781_v26 = vsel %vm785_vm7, %v1776_v45, -inf }
 0xe0e   :  { %v1720_v25 = vpop.f32.mrf.mxu3 }
 0xe0f   :  { %v1721_v46 = vadd.f32 %v1720_v25, %v408_v23 }
 0xe11   :  { %v1726_v27 = vsel %vm785_vm7, %v1721_v46, -inf }
 0xe12   :  { %1782 = vmax.xlane.f32.xlu1 %v1781_v26  ;;  %1727 = vmax.xlane.f32.xlu0 %v1726_v27 }
 0xe77   :  { %v1780_v28 = vpop.xlane.xlu2 %1779 }
 0xe78   :  { %v1784_v32 = vsub.f32 %v1773_v19, %v1780_v28  ;;  %v425_v19 = vld [vmem:[%s4695_s23 + $0x10] sm:$0xff] }
 0xe79   :  { %1882 = vmatpush.msrb.mxu3 %v425_v19 }
 0xe7a   :  { %v1786_v34 = vmul.f32 1.442695, %v1784_v32 }
 0xe7b   :  { %1883 = vmatpush.msrb.mxu3 %v424_v20 }
 0xe7c   :  { %3153 = vpow2.f32 %v1786_v34 }
 0xe7d   :  { %v1725_v35 = vpop.xlane.xlu1 %1724 }
 0xe7e   :  { %v1729_v1 = vsub.f32 %v1718_v18, %v1725_v35 }
 0xe80   :  { %v1731_v36 = vmul.f32 1.442695, %v1729_v1 }
 0xe82   :  { %v3154_v37 = vpop.eup %3153  ;;  %3155 = vpow2.f32 %v1731_v36 }
 0xe83   :  { %v1790_v38 = vsel %vm785_vm7, %v3154_v37, 0.0 }
 0xe84   :  { %1791 = vadd.xlane.f32.xlu0 %v1790_v38 }
 0xe85   :  { %v1728_v4 = vpop.xlane.xlu0 %1727  ;;  %v1783_v39 = vpop.xlane.xlu1 %1782 }
 0xe86   :  { %v1730_v40 = vsub.f32 %v1721_v46, %v1728_v4  ;;  %v1785_v41 = vsub.f32 %v1776_v45, %v1783_v39  ;;  %v3099_v45 = vld [vmem:[%s4696_s16] ss:$0 sm:$0xff] }
 0xe88   :  { %v3156_v42 = vpop.eup %3155  ;;  %v1733_v43 = vmul.f32 1.442695, %v1730_v40  ;;  %v1788_v44 = vmul.f32 1.442695, %v1785_v41 }
 0xe89   :  { %v1735_v47 = vsel %vm785_vm7, %v3156_v42, 0.0 }
 0xe8a   :  { %3157 = vpow2.f32 %v1733_v43  ;;  %1736 = vadd.xlane.f32.xlu2 %v1735_v47  ;;  %v461_v43 = vld [vmem:[%s4697_s26 + $0x30] sm:$0xff]  ;;  %v459_v47 = vld [vmem:[%s4697_s26 + $0x20] sm:$0xff] }
 0xe8b   :  { %3159 = vpow2.f32 %v1788_v44  ;;  %v460_v44 = vld [vmem:[%s4697_s26 + $0x28] sm:$0xff] }
 0xe90   :  { %v3158_v48 = vpop.eup %3157 }
 0xe91   :  { %v3160_v49 = vpop.eup %3159  ;;  %v1738_v50 = vsel %vm785_vm7, %v3158_v48, 0.0 }
 0xe92   :  { %1739 = vadd.xlane.f32.xlu1 %v1738_v50  ;;  %v1793_v51 = vsel %vm785_vm7, %v3160_v49, 0.0  ;;  %v456_v50 = vld [vmem:[%s4697_s26 + $0x8] sm:$0xff] }
 0xe93   :  { %1794 = vadd.xlane.f32.xlu2 %v1793_v51  ;;  %v455_v51 = vld [vmem:[%s4697_s26] sm:$0xff] }
 0xef7   :  { %v1792_v60 = vpop.xlane.xlu0 %1791 }
 0xef8   :  { %3161 = vrcp.f32 %v1792_v60  ;;  %v475_v60 = vld [vmem:[%s4698_s21 + $0x60] sm:$0xff] }
 0xef9   :  { %1988 = vmatpush.msrb.mxu1 %v475_v60 }
 0xefd   :  { %v1737_v61 = vpop.xlane.xlu2 %1736 }
 0xefe   :  { %v3162_v63 = vpop.eup %3161  ;;  %3163 = vrcp.f32 %v1737_v61 }
 0xeff   :  { %v1798_v0 = vmul.f32 %v3162_v63, %v3154_v37 }
 0xf01   :  { %2991 = vmatmul.msk.f32.vlgmr.msra.gmra.mxu1 %vm785_vm7, %v1798_v0  ;;  %v474_v0 = vld [vmem:[%s4698_s21 + $0x58] sm:$0xff] }
 0xf02   :  { %1989 = vmatpush.msrb.mxu1 %v474_v0  ;;  %v598_v0 = vld [vmem:[#allocation15 + $0x28] sm:$0xff] }
 0xf04   :  { %v3164_v2 = vpop.eup %3163 }
 0xf05   :  { %v1743_v3 = vmul.f32 %v3164_v2, %v3156_v42  ;;  %v1740_v6 = vpop.xlane.xlu1 %1739  ;;  %v462_v42 = vld [vmem:[%s4697_s26 + $0x38] sm:$0xff] }
 0xf06   :  { %v1795_v7 = vpop.xlane.xlu2 %1794  ;;  %3165 = vrcp.f32 %v1740_v6  ;;  %1965 = vmatpush.msrb.mxu0 %v462_v42 }
 0xf07   :  { %3167 = vrcp.f32 %v1795_v7  ;;  %2993 = vmatmul.msk.f32.vlgmr.msra.gmra.mxu2 %vm785_vm7, %v1743_v3  ;;  %v473_v3 = vld [vmem:[%s4698_s21 + $0x50] sm:$0xff]  ;;  %v472_v7 = vld [vmem:[%s4698_s21 + $0x48] sm:$0xff] }
 0xf08   :  { %1966 = vmatpush.msrb.mxu0 %v461_v43  ;;  %1990 = vmatpush.msrb.mxu1 %v473_v3  ;;  %v596_v3 = vld [vmem:[#allocation15 + $0x18] sm:$0xff] }
 0xf0a   :  { %1967 = vmatpush.msrb.mxu0 %v460_v44  ;;  %1991 = vmatpush.msrb.mxu1 %v472_v7  ;;  %v594_v7 = vld [vmem:[#allocation15 + $0x8] sm:$0xff] }
 0xf0c   :  { %v3166_v8 = vpop.eup %3165  ;;  %1968 = vmatpush.msrb.mxu0 %v459_v47 }
 0xf0d   :  { %v3168_v9 = vpop.eup %3167  ;;  %v1744_v10 = vmul.f32 %v3166_v8, %v3158_v48  ;;  %v458_v48 = vld [vmem:[%s4697_s26 + $0x18] sm:$0xff] }
 0xf0e   :  { %v1799_v11 = vmul.f32 %v3168_v9, %v3160_v49  ;;  %1969 = vmatpush.msrb.mxu0 %v458_v48  ;;  %v457_v49 = vld [vmem:[%s4697_s26 + $0x10] sm:$0xff]  ;;  %v471_v9 = vld [vmem:[%s4698_s21 + $0x40] sm:$0xff] }
 0xf0f   :  { %2994 = vmatmul.msk.f32.gmra.mxu2 %vm785_vm7, %v1744_v10  ;;  %1992 = vmatpush.msrb.mxu1 %v471_v9  ;;  %v2194_v9 = vshrl.u32 %v617_v31, 7 }
 0xf10   :  { %2992 = vmatmul.msk.f32.gmra.mxu1 %vm785_vm7, %v1799_v11  ;;  %1970 = vmatpush.msrb.mxu0 %v457_v49 }
 0xf11   :  { %1993 = vmatpush.msrb.mxu1 %v470_v14  ;;  %3074 = vset.pattern.permute.xlu1 %v2194_v9 }
 0xf12   :  { %1971 = vmatpush.msrb.mxu0 %v456_v50  ;;  %3075 = vset.pattern.permute.xlu2 %v2194_v9 }
 0xf13   :  { %1994 = vmatpush.msrb.mxu1 %v469_v17  ;;  %3076 = vset.pattern.permute.xlu0 %v2194_v9 }
 0xf14   :  { %1972 = vmatpush.msrb.mxu0 %v455_v51 }
 0xf17   :  { %2999 = vmatmul.msk.f32.vlgmr.msrb.gmra.mxu2 %vm666_vm2, %v4102_v13  ;;  %v423_v13 = vld [vmem:[%s4695_s23] sm:$0xff] }
 0xf18   :  { %1884 = vmatpush.msrb.mxu3 %v423_v13 }
 0xf1f   :  { %3000 = vmatmul.msk.f32.gmra.mxu2 %vm666_vm2, %v4098_v29 }
 0xf7e   :  { %v1825_v21 = vpop.f32.mrf.mxu1 }
 0xf8a   :  { %v1854_v18 = vpop.f32.mrf.mxu2 }
 0xf8b   :  { %v1855_v29 = vadd.f32 %v1854_v18, %v1825_v21  ;;  %v3101_v21 = vld [vmem:[%s4700_s17] ss:$0 sm:$0xff]  ;;  %v468_v18 = vld [vmem:[%s4698_s21 + $0x28] sm:$0xff] }
 0xf8c   :  { %1995 = vmatpush.msrb.mxu1 %v468_v18 }
 0xf8d   :  { %2995 = vmatmul.msk.f32.vlgmr.msrb.gmra.mxu3 %vm666_vm2, %v1855_v29  ;;  %v1828_v22 = vpop.f32.mrf.mxu1 }
 0xf92   :  { %v1857_v23 = vpop.f32.mrf.mxu2 }
 0xf93   :  { %v1858_v24 = vadd.f32 %v1857_v23, %v1828_v22  ;;  %v467_v23 = vld [vmem:[%s4698_s21 + $0x20] sm:$0xff] }
 0xf94   :  { %1996 = vmatpush.msrb.mxu1 %v467_v23 }
 0xf95   :  { %2996 = vmatmul.msk.f32.gmra.mxu3 %vm666_vm2, %v1858_v24 }
0x1010   :  { %v1886_v25 = vpop.f32.mrf.mxu3 }
0x1011   :  { %v1887_v46 = vadd.f32 %v3099_v45, %v1886_v25  ;;  %v466_v25 = vld [vmem:[%s4698_s21 + $0x18] sm:$0xff] }
0x1012   :  { %1997 = vmatpush.msrb.mxu1 %v466_v25 }
0x1013   :  { %v1892_v26 = vadd.f32 %v1887_v46, %v4240_v62 }
0x1015   :  { %v1894_v27 = vsel %vm666_vm2, %v1892_v26, 0.0 }
0x1016   :  { %1895 = vadd.xlane.f32.xlu0 %v1894_v27 }
0x1018   :  { %v1889_v28 = vpop.f32.mrf.mxu3 }
0x1019   :  { %v1890_v32 = vadd.f32 %v3099_v45, %v1889_v28 }
0x101b   :  { %v1893_v34 = vadd.f32 %v1890_v32, %v4244_v5 }
0x101d   :  { %v1897_v35 = vsel %vm666_vm2, %v1893_v34, 0.0 }
0x101e   :  { %1898 = vadd.xlane.f32.xlu1 %v1897_v35  ;;  %v464_v35 = vld [vmem:[%s4698_s21 + $0x8] sm:$0xff] }
0x1089   :  { %v1896_v1 = vpop.xlane.xlu0 %1895 }
0x108a   :  { %v1900_v36 = vmul.f32 %v1896_v1, %v4048_v12  ;;  %v463_v1 = vld [vmem:[%s4698_s21] sm:$0xff] }
0x108c   :  { %v4291_v37 = vsub.f32 %v1892_v26, %v1900_v36  ;;  %v3102_v36 = vld [vmem:[%s4701_s3] ss:$0 sm:$0xff] }
0x108e   :  { %v1904_v62 = vmul.f32 %v4291_v37, %v4291_v37 }
0x1090   :  { %v1906_v38 = vsel %vm666_vm2, %v1904_v62, 0.0 }
0x1091   :  { %1907 = vadd.xlane.f32.xlu2 %v1906_v38  ;;  %v1899_v4 = vpop.xlane.xlu1 %1898 }
0x1092   :  { %v1901_v5 = vmul.f32 %v1899_v4, %v4048_v12 }
0x1094   :  { %v4297_v39 = vsub.f32 %v1893_v34, %v1901_v5  ;;  %v465_v34 = vld [vmem:[%s4698_s21 + $0x10] sm:$0xff] }
0x1095   :  { %1998 = vmatpush.msrb.mxu1 %v465_v34  ;;  %v3105_v34 = vld [vmem:[%s4705_s12] ss:$0 sm:$0xff] }
0x1096   :  { %v1905_v40 = vmul.f32 %v4297_v39, %v4297_v39 }
0x1097   :  { %1999 = vmatpush.msrb.mxu1 %v464_v35 }
0x1098   :  { %v1909_v41 = vsel %vm666_vm2, %v1905_v40, 0.0 }
0x1099   :  { %1910 = vadd.xlane.f32.xlu0 %v1909_v41  ;;  %2000 = vmatpush.msrb.mxu1 %v463_v1 }
0x1104   :  { %v1908_v52 = vpop.xlane.xlu2 %1907 }
0x1105   :  { %v1912_v53 = vmul.f32 %v1908_v52, %v4048_v12 }
0x1107   :  { %v1914_v54 = vadd.f32 1e-05, %v1912_v53 }
0x1109   :  { %3169 = vrsqrt.f32 %v1914_v54  ;;  %vm1922_vm13 = vweird.f32 %v1914_v54 }
0x110c   :  { %v1911_v58 = vpop.xlane.xlu0 %1910 }
0x110d   :  { %v1913_v59 = vmul.f32 %v1911_v58, %v4048_v12 }
0x110f   :  { %v3170_v61 = vpop.eup %3169  ;;  %v1915_v63 = vadd.f32 1e-05, %v1913_v59 }
0x1110   :  { %v1917_v2 = vmul.f32 %v3170_v61, %v1914_v54  ;;  %vm1923_vm7 = vweird.f32 %v3170_v61 }
0x1111   :  { %3171 = vrsqrt.f32 %v1915_v63  ;;  %vm1924_vm14 = vmor %vm1922_vm13, %vm1923_vm7  ;;  %vm1932_vm0 = vweird.f32 %v1915_v63  ;;  %vm2312_vm7 = vcmask 1045509   ;;  %vm2314_vm13 = vcmask 1046534  }
0x1112   :  { %v1918_v6 = vmul.f32 %v3170_v61, %v1917_v2  ;;  %v597_v2 = vld [vmem:[#allocation15 + $0x20] sm:$0xff] }
0x1114   :  { %v1919_v8 = vmul.f32 0.5, %v1918_v6  ;;  %v595_v6 = vld [vmem:[#allocation15 + $0x10] sm:$0xff] }
0x1116   :  { %v1920_v10 = vsub.f32 1.5, %v1919_v8  ;;  %v593_v8 = vld [vmem:[#allocation15] sm:$0xff] }
0x1117   :  { %v3172_v11 = vpop.eup %3171 }
0x1118   :  { %v1921_v30 = vmul.f32 %v3170_v61, %v1920_v10  ;;  %v1927_v15 = vmul.f32 %v3172_v11, %v1915_v63  ;;  %vm1933_vm15 = vweird.f32 %v3172_v11  ;;  %v599_v63 = vld [vmem:[#allocation15 + $0x30] sm:$0xff] }
0x1119   :  { %vm1934_vm1 = vmor %vm1932_vm0, %vm1933_vm15  ;;  %vm2319_vm15 = vcmask 64512  }
0x111a   :  { %v1925_v19 = vsel %vm1924_vm14, %v3170_v61, %v1921_v30  ;;  %v1928_v20 = vmul.f32 %v3172_v11, %v1927_v15  ;;  %v600_v61 = vld [vmem:[#allocation15 + $0x38] sm:$0xff]  ;;  %v409_v30 = vld [vmem:[%s4703_s19] sm:$0xff]  ;;  %vm2316_vm14 = vcmask 1047559  }
0x111b   :  { %v1936_v13 = vmul.f32 %v1925_v19, %v4291_v37  ;;  %2101 = vmatpush.msra.mxu3 %v600_v61  ;;  %v2192_v15 = vperm.slane %v409_v30, 0  ;;  %v2220_v31 = vperm.slane %v409_v30, 4  ;;  %v2213_v18 = vperm.slane %v409_v30, 3 }
0x111c   :  { %v1929_v29 = vmul.f32 0.5, %v1928_v20  ;;  %v2206_v1 = vperm.slane %v409_v30, 2 }
0x111d   :  { %v1941_v22 = vmul.f32 %v3100_v16, %v1936_v13  ;;  %2102 = vmatpush.msra.mxu3 %v599_v63 }
0x111e   :  { %v1930_v24 = vsub.f32 1.5, %v1929_v29 }
0x111f   :  { %v1946_v45 = vadd.f32 %v3101_v21, %v1941_v22  ;;  %2103 = vmatpush.msra.mxu3 %v598_v0 }
0x1120   :  { %v1931_v46 = vmul.f32 %v3172_v11, %v1930_v24 }
0x1121   :  { %2997 = vmatmul.msk.f32.vlgmr.msrb.gmra.mxu0 %vm666_vm2, %v1946_v45  ;;  %2104 = vmatpush.msra.mxu3 %v597_v2 }
0x1122   :  { %v1935_v26 = vsel %vm1934_vm1, %v3172_v11, %v1931_v46  ;;  %v2227_v46 = vperm.slane %v409_v30, 5 }
0x1123   :  { %v1937_v27 = vmul.f32 %v1935_v26, %v4297_v39  ;;  %v3103_v39 = vld [vmem:[%s4702_s14] ss:$0 sm:$0xff]  ;;  %2105 = vmatpush.msra.mxu3 %v596_v3 }
0x1124   :  { %v3104_v26 = vld [vmem:[%s4704_s30] ss:$0 sm:$0xff] }
0x1125   :  { %v1942_v28 = vmul.f32 %v3100_v16, %v1937_v27  ;;  %2106 = vmatpush.msra.mxu3 %v595_v6  ;;  %v2199_v16 = vperm.slane %v409_v30, 1 }
0x1127   :  { %v1947_v32 = vadd.f32 %v3101_v21, %v1942_v28  ;;  %2107 = vmatpush.msra.mxu3 %v594_v7 }
0x1129   :  { %2998 = vmatmul.msk.f32.gmra.mxu0 %vm666_vm2, %v1947_v32  ;;  %2108 = vmatpush.msra.mxu3 %v593_v8 }
0x119e   :  { %v1974_v37 = vpop.f32.mrf.mxu0 }
0x119f   :  { %v1975_v62 = vadd.f32 %v3102_v36, %v1974_v37  ;;  %v410_v37 = vld [vmem:[%s4703_s19 + $0x8] sm:$0xff] }
0x11a1   :  { %v1980_v38 = vmax.f32 %v1975_v62, 0.0 }
0x11a3   :  { %2001 = vmatmul.f32.vlgmr.msrb.gmra.mxu1 %v1980_v38 }
0x11a6   :  { %v1977_v4 = vpop.f32.mrf.mxu0 }
0x11a7   :  { %v1978_v5 = vadd.f32 %v3102_v36, %v1977_v4 }
0x11a9   :  { %v1981_v40 = vmax.f32 %v1978_v5, 0.0  ;;  %v2523_v5 = vperm.slane %v410_v37, 1 }
0x11ab   :  { %2004 = vmatmul.f32.gmra.mxu1 %v1981_v40  ;;  %v2241_v40 = vperm.slane %v409_v30, 7 }
0x1220   :  { %v2002_v41 = vpop.f32.mrf.mxu1 }
0x1221   :  { %v2003_v42 = vadd.f32 %v3103_v39, %v2002_v41  ;;  %v2516_v41 = vperm.slane %v410_v37, 0 }
0x1223   :  { %v2008_v43 = vadd.f32 %v2003_v42, %v1946_v45 }
0x1225   :  { %v2010_v44 = vsel %vm666_vm2, %v2008_v43, 0.0 }
0x1226   :  { %2011 = vadd.xlane.f32.xlu1 %v2010_v44 }
0x1228   :  { %v2005_v47 = vpop.f32.mrf.mxu1 }
0x1229   :  { %v2006_v48 = vadd.f32 %v3103_v39, %v2005_v47  ;;  %v2537_v47 = vperm.slane %v410_v37, 3 }
0x122b   :  { %v2009_v49 = vadd.f32 %v2006_v48, %v1947_v32  ;;  %v2530_v48 = vperm.slane %v410_v37, 2 }
0x122d   :  { %v2013_v50 = vsel %vm666_vm2, %v2009_v49, 0.0 }
0x122e   :  { %2014 = vadd.xlane.f32.xlu2 %v2013_v50  ;;  %v2551_v50 = vperm.slane %v410_v37, 5 }
0x1246   :  { %2204 = vperm.xlu2 %3075, %v2199_v16  }
0x124e   :  { %2218 = vperm.xlu2 %3075, %v2213_v18  }
0x1256   :  { %2232 = vperm.xlu2 %3075, %v2227_v46  }
0x125e   :  { %2246 = vperm.xlu2 %3075, %v2241_v40  }
0x1266   :  { %2535 = vperm.xlu2 %3075, %v2530_v48  }
0x1299   :  { %v2012_v51 = vpop.xlane.xlu1 %2011 }
0x129a   :  { %v2016_v52 = vmul.f32 %v2012_v51, %v4048_v12  ;;  %v2544_v51 = vperm.slane %v410_v37, 4 }
0x129c   :  { %v4339_v53 = vsub.f32 %v2008_v43, %v2016_v52  ;;  %2549 = vperm.xlu2 %3075, %v2544_v51   ;;  %v2565_v52 = vperm.slane %v410_v37, 7 }
0x129e   :  { %v2020_v54 = vmul.f32 %v4339_v53, %v4339_v53 }
0x12a0   :  { %v2022_v55 = vsel %vm666_vm2, %v2020_v54, 0.0 }
0x12a1   :  { %v2015_v56 = vpop.xlane.xlu2 %2014  ;;  %2023 = vadd.xlane.f32.xlu0 %v2022_v55 }
0x12a2   :  { %v2017_v57 = vmul.f32 %v2015_v56, %v4048_v12 }
0x12a4   :  { %v4345_v58 = vsub.f32 %v2009_v49, %v2017_v57  ;;  %v2558_v49 = vperm.slane %v410_v37, 6 }
0x12a6   :  { %v2021_v59 = vmul.f32 %v4345_v58, %v4345_v58 }
0x12a8   :  { %v2025_v60 = vsel %vm666_vm2, %v2021_v59, 0.0 }
0x12a9   :  { %2026 = vadd.xlane.f32.xlu1 %v2025_v60 }
0x12b5   :  { %2211 = vperm.xlu0 %3076, %v2206_v1  }
0x12bd   :  { %2521 = vperm.xlu0 %3076, %v2516_v41  }
0x12c2   :  { %2197 = vperm.xlu1 %3074, %v2192_v15  }
0x12c5   :  { %2563 = vperm.xlu0 %3076, %v2558_v49  }
0x12ca   :  { %2225 = vperm.xlu1 %3074, %v2220_v31  }
0x1314   :  { %v2024_v10 = vpop.xlane.xlu0 %2023 }
0x1315   :  { %v2028_v11 = vmul.f32 %v2024_v10, %v4048_v12 }
0x1317   :  { %v2030_v14 = vadd.f32 1e-05, %v2028_v11 }
0x1319   :  { %3173 = vrsqrt.f32 %v2030_v14  ;;  %vm2038_vm4 = vweird.f32 %v2030_v14 }
0x131c   :  { %v2027_v17 = vpop.xlane.xlu1 %2026 }
0x131d   :  { %v2029_v19 = vmul.f32 %v2027_v17, %v4048_v12  ;;  %v2234_v12 = vperm.slane %v409_v30, 6  ;;  %v4364_v30 = vld [vmem:[%s4706_s7] ss:$0 sm:$0xff] }
0x131f   :  { %v3174_v20 = vpop.eup %3173  ;;  %v2031_v13 = vadd.f32 1e-05, %v2029_v19  ;;  %2239 = vperm.xlu1 %3074, %v2234_v12  }
0x1320   :  { %v2033_v21 = vmul.f32 %v3174_v20, %v2030_v14  ;;  %vm2039_vm3 = vweird.f32 %v3174_v20 }
0x1321   :  { %3175 = vrsqrt.f32 %v2031_v13  ;;  %vm2040_vm5 = vmor %vm2038_vm4, %vm2039_vm3  ;;  %vm2048_vm8 = vweird.f32 %v2031_v13 }
0x1322   :  { %v2034_v29 = vmul.f32 %v3174_v20, %v2033_v21 }
0x1324   :  { %v2035_v22 = vmul.f32 0.5, %v2034_v29 }
0x1326   :  { %v2036_v23 = vsub.f32 1.5, %v2035_v22 }
0x1327   :  { %v3176_v24 = vpop.eup %3175  ;;  %2528 = vperm.xlu1 %3074, %v2523_v5  }
0x1328   :  { %v2037_v45 = vmul.f32 %v3174_v20, %v2036_v23  ;;  %v2043_v25 = vmul.f32 %v3176_v24, %v2031_v13  ;;  %vm2049_vm6 = vweird.f32 %v3176_v24 }
0x1329   :  { %vm2050_vm9 = vmor %vm2048_vm8, %vm2049_vm6 }
0x132a   :  { %v2041_v27 = vsel %vm2040_vm5, %v3174_v20, %v2037_v45  ;;  %v2044_v28 = vmul.f32 %v3176_v24, %v2043_v25 }
0x132b   :  { %v2052_v32 = vmul.f32 %v2041_v27, %v4339_v53 }
0x132c   :  { %v2045_v35 = vmul.f32 0.5, %v2044_v28 }
0x132d   :  { %v2057_v36 = vmul.f32 %v3104_v26, %v2052_v32 }
0x132e   :  { %v2046_v62 = vsub.f32 1.5, %v2045_v35 }
0x132f   :  { %v2062_v38 = vadd.f32 %v3105_v34, %v2057_v36  ;;  %2542 = vperm.xlu1 %3074, %v2537_v47  }
0x1330   :  { %v2047_v4 = vmul.f32 %v3176_v24, %v2046_v62 }
0x1331   :  { %3001 = vmatmul.msk.f32.vlgmr.msra.gmra.mxu3 %vm666_vm2, %v2062_v38 }
0x1332   :  { %v2051_v39 = vsel %vm2050_vm9, %v3176_v24, %v2047_v4 }
0x1333   :  { %v2053_v42 = vmul.f32 %v2051_v39, %v4345_v58  ;;  %v2081_v58 = vpop.f32.mrf.mxu2 }
0x1335   :  { %v2058_v43 = vmul.f32 %v3104_v26, %v2053_v42 }
0x1337   :  { %v2063_v44 = vadd.f32 %v3105_v34, %v2058_v43  ;;  %2556 = vperm.xlu1 %3074, %v2551_v50  }
0x1339   :  { %3002 = vmatmul.msk.f32.gmra.mxu3 %vm666_vm2, %v2063_v44 }
0x133b   :  { %v4368_v23 = vpop.f32.mrf.mxu2 }
0x133f   :  { %2570 = vperm.xlu1 %3074, %v2565_v52  }
0x13b4   :  { %v2110_v53 = vpop.f32.mrf.mxu3 }
0x13b5   :  { %v2127_v54 = vperm.slane %v2110_v53, 0  ;;  %v2121_v55 = vrot.slane %v2110_v53, 2  ;;  %v2120_v56 = vrot.slane %v2110_v53, 1  ;;  %v2122_v57 = vrot.slane %v2110_v53, 3 }
0x13b6   :  { %v2124_v59 = vrot.slane %v2110_v53, 5  ;;  %v2123_v60 = vrot.slane %v2110_v53, 4  ;;  %v2125_v7 = vrot.slane %v2110_v53, 6  ;;  %v2126_v16 = vrot.slane %v2110_v53, 7 }
0x13b7   :  { %v2143_v61 = vadd.f32 %v2127_v54, %v2081_v58  ;;  %v2129_v63 = vperm.slane %v2121_v55, 0  ;;  %v2128_v0 = vperm.slane %v2120_v56, 0  ;;  %v2130_v2 = vperm.slane %v2122_v57, 0 }
0x13b8   :  { %v2132_v3 = vperm.slane %v2124_v59, 0  ;;  %v2131_v6 = vperm.slane %v2123_v60, 0  ;;  %v2133_v17 = vperm.slane %v2125_v7, 0  ;;  %v2134_v31 = vperm.slane %v2126_v16, 0 }
0x13b9   :  { %3177 = vtanh.f32 %v2143_v61  ;;  %v2145_v8 = vadd.f32 %v2129_v63, %v2081_v58  ;;  %v2144_v9 = vadd.f32 %v2128_v0, %v2081_v58  ;;  %v2146_v10 = vadd.f32 %v2130_v2, %v2081_v58 }
0x13ba   :  { %v2148_v11 = vadd.f32 %v2132_v3, %v2081_v58  ;;  %v2147_v15 = vadd.f32 %v2131_v6, %v2081_v58  ;;  %v2149_v29 = vadd.f32 %v2133_v17, %v2081_v58  ;;  %v2150_v28 = vadd.f32 %v2134_v31, %v2081_v58 }
0x13bb   :  { %3179 = vtanh.f32 %v2145_v8 }
0x13bc   :  { %v4361_v14 = vpop.f32.mrf.mxu3  ;;  %3181 = vtanh.f32 %v2144_v9 }
0x13bd   :  { %3183 = vtanh.f32 %v2146_v10  ;;  %v2444_v19 = vrot.slane %v4361_v14, 1  ;;  %v2445_v26 = vrot.slane %v4361_v14, 2  ;;  %v2451_v35 = vperm.slane %v4361_v14, 0 }
0x13be   :  { %3185 = vtanh.f32 %v2148_v11  ;;  %v2449_v5 = vrot.slane %v4361_v14, 6  ;;  %v2446_v42 = vrot.slane %v4361_v14, 3  ;;  %v2450_v55 = vrot.slane %v4361_v14, 7 }
0x13bf   :  { %v3178_v20 = vpop.eup %3177  ;;  %v2452_v13 = vperm.slane %v2444_v19, 0  ;;  %3187 = vtanh.f32 %v2147_v15  ;;  %v2453_v37 = vperm.slane %v2445_v26, 0  ;;  %v2467_v4 = vadd.f32 %v2451_v35, %v4368_v23  ;;  %v2205_v26 = vpop.permute.xlu2 %2204 }
0x13c0   :  { %v2159_v21 = vmul.f32 %v3178_v20, %v4364_v30  ;;  %3189 = vtanh.f32 %v2149_v29  ;;  %v2457_v48 = vperm.slane %v2449_v5, 0  ;;  %v2454_v51 = vperm.slane %v2446_v42, 0 }
0x13c1   :  { %v3180_v18 = vpop.eup %3179  ;;  %v2468_v46 = vadd.f32 %v2452_v13, %v4368_v23  ;;  %v2469_v41 = vadd.f32 %v2453_v37, %v4368_v23  ;;  %v2447_v59 = vrot.slane %v4361_v14, 4  ;;  %v2458_v0 = vperm.slane %v2450_v55, 0 }
0x13c2   :  { %v3182_v22 = vpop.eup %3181  ;;  %v2167_v24 = vsel %vm666_vm2, %v2159_v21, 0.0  ;;  %v2161_v45 = vmul.f32 %v3180_v18, %v4364_v30  ;;  %v2473_v54 = vadd.f32 %v2457_v48, %v4368_v23  ;;  %v2470_v58 = vadd.f32 %v2454_v51, %v4368_v23 }
0x13c3   :  { %v3184_v25 = vpop.eup %3183  ;;  %2168 = vadd.xlane.f32.xlu2 %v2167_v24  ;;  %v2160_v12 = vmul.f32 %v3182_v22, %v4364_v30  ;;  %3191 = vtanh.f32 %v2468_v46  ;;  %v2455_v3 = vperm.slane %v2447_v59, 0  ;;  %v2474_v7 = vadd.f32 %v2458_v0, %v4368_v23  ;;  %v2198_v46 = vpop.permute.xlu1 %2197 }
0x13c4   :  { %v2173_v27 = vsel %vm666_vm2, %v2161_v45, 0.0  ;;  %v3186_v32 = vpop.eup %3185  ;;  %v2162_v36 = vmul.f32 %v3184_v25, %v4364_v30  ;;  %3193 = vtanh.f32 %v2150_v28  ;;  %v2448_v11 = vrot.slane %v4361_v14, 5 }
0x13c5   :  { %2174 = vadd.xlane.f32.xlu1 %v2173_v27  ;;  %v2170_v34 = vsel %vm666_vm2, %v2160_v12, 0.0  ;;  %v3188_v1 = vpop.eup %3187  ;;  %v2164_v62 = vmul.f32 %v3186_v32, %v4364_v30  ;;  %3195 = vtanh.f32 %v2467_v4  ;;  %v2471_v10 = vadd.f32 %v2455_v3, %v4368_v23 }
0x13c6   :  { %2171 = vadd.xlane.f32.xlu0 %v2170_v34  ;;  %v2163_v38 = vmul.f32 %v3188_v1, %v4364_v30  ;;  %v2176_v40 = vsel %vm666_vm2, %v2162_v36, 0.0  ;;  %v3190_v39 = vpop.eup %3189  ;;  %3197 = vtanh.f32 %v2469_v41  ;;  %v2456_v19 = vperm.slane %v2448_v11, 0 }
0x13c7   :  { %v2182_v43 = vsel %vm666_vm2, %v2164_v62, 0.0  ;;  %v2165_v50 = vmul.f32 %v3190_v39, %v4364_v30  ;;  %3199 = vtanh.f32 %v2473_v54  ;;  %v2219_v28 = vpop.permute.xlu2 %2218  ;;  %v3591_v1 = vmov 0   ;;  %v2212_v62 = vpop.permute.xlu0 %2211 }
0x13c8   :  { %v2179_v47 = vsel %vm666_vm2, %v2163_v38, 0.0  ;;  %3201 = vtanh.f32 %v2470_v58  ;;  %v2472_v31 = vadd.f32 %v2456_v19, %v4368_v23  ;;  %3077 = vset.pattern.permute.xlu1 %v3591_v1  ;;  %3079 = vset.pattern.permute.xlu2 %v3591_v1 }
0x13c9   :  { %v3192_v44 = vpop.eup %3191  ;;  %v2185_v56 = vsel %vm666_vm2, %v2165_v50, 0.0  ;;  %3203 = vtanh.f32 %v2474_v7  ;;  %3078 = vset.pattern.permute.xlu0 %v3591_v1 }
0x13ca   :  { %v3194_v49 = vpop.eup %3193  ;;  %v2484_v52 = vmul.f32 %v3192_v44, %v4364_v30  ;;  %3205 = vtanh.f32 %v2471_v10 }
0x13cb   :  { %2177 = vadd.xlane.f32.xlu2 %v2176_v40  ;;  %v2166_v53 = vmul.f32 %v3194_v49, %v4364_v30  ;;  %v3196_v57 = vpop.eup %3195  ;;  %3207 = vtanh.f32 %v2472_v31  ;;  %v2226_v27 = vpop.permute.xlu1 %2225 }
0x13cc   :  { %v2494_v60 = vsel %vm666_vm2, %v2484_v52, 0.0  ;;  %v3198_v61 = vpop.eup %3197  ;;  %v2483_v2 = vmul.f32 %v3196_v57, %v4364_v30 }
0x13cd   :  { %2183 = vadd.xlane.f32.xlu1 %v2182_v43  ;;  %v2188_v63 = vsel %vm666_vm2, %v2166_v53, 0.0  ;;  %v2485_v6 = vmul.f32 %v3198_v61, %v4364_v30  ;;  %v3200_v9 = vpop.eup %3199 }
0x13ce   :  { %2180 = vadd.xlane.f32.xlu0 %v2179_v47  ;;  %v2491_v8 = vsel %vm666_vm2, %v2483_v2, 0.0  ;;  %v3202_v16 = vpop.eup %3201  ;;  %v2489_v17 = vmul.f32 %v3200_v9, %v4364_v30 }
0x13cf   :  { %v2497_v15 = vsel %vm666_vm2, %v2485_v6, 0.0  ;;  %v2486_v20 = vmul.f32 %v3202_v16, %v4364_v30  ;;  %v3204_v21 = vpop.eup %3203  ;;  %v2233_v34 = vpop.permute.xlu2 %2232 }
0x13d0   :  { %v2509_v13 = vsel %vm666_vm2, %v2489_v17, 0.0  ;;  %v3206_v14 = vpop.eup %3205  ;;  %v2490_v29 = vmul.f32 %v3204_v21, %v4364_v30 }
0x13d1   :  { %v2500_v18 = vsel %vm666_vm2, %v2486_v20, 0.0  ;;  %v2487_v22 = vmul.f32 %v3206_v14, %v4364_v30  ;;  %v3208_v25 = vpop.eup %3207 }
0x13d2   :  { %v2512_v24 = vsel %vm666_vm2, %v2490_v29, 0.0  ;;  %v2488_v12 = vmul.f32 %v3208_v25, %v4364_v30  ;;  %v2522_v30 = vpop.permute.xlu0 %2521 }
0x13d3   :  { %2186 = vadd.xlane.f32.xlu2 %v2185_v56  ;;  %v2503_v45 = vsel %vm666_vm2, %v2487_v22, 0.0  ;;  %v2240_v32 = vpop.permute.xlu1 %2239 }
0x13d4   :  { %v2506_v23 = vsel %vm666_vm2, %v2488_v12, 0.0  ;;  %vm2304_vm2 = vcmask 1041409  }
0x13d5   :  { %2495 = vadd.xlane.f32.xlu1 %v2494_v60 }
0x13d6   :  { %2189 = vadd.xlane.f32.xlu0 %v2188_v63 }
0x13d7   :  { %v2247_v36 = vpop.permute.xlu2 %2246 }
0x13da   :  { %v2564_v39 = vpop.permute.xlu0 %2563 }
0x13db   :  { %2492 = vadd.xlane.f32.xlu2 %v2491_v8  ;;  %v2529_v35 = vpop.permute.xlu1 %2528 }
0x13dd   :  { %2498 = vadd.xlane.f32.xlu1 %v2497_v15 }
0x13df   :  { %v2536_v38 = vpop.permute.xlu2 %2535 }
0x13e3   :  { %2510 = vadd.xlane.f32.xlu2 %v2509_v13  ;;  %v2543_v37 = vpop.permute.xlu1 %2542 }
0x13e5   :  { %2501 = vadd.xlane.f32.xlu1 %v2500_v18 }
0x13e7   :  { %v2550_v5 = vpop.permute.xlu2 %2549 }
0x13eb   :  { %2513 = vadd.xlane.f32.xlu2 %v2512_v24  ;;  %v2557_v4 = vpop.permute.xlu1 %2556 }
0x13ed   :  { %2504 = vadd.xlane.f32.xlu1 %v2503_v45 }
0x13f3   :  { %v2571_v40 = vpop.permute.xlu1 %2570 }
0x13f5   :  { %2507 = vadd.xlane.f32.xlu1 %v2506_v23 }
0x1436   :  { %v2169_v41 = vpop.xlane.xlu2 %2168 }
0x1437   :  { %v4416_v42 = vadd.f32 %v2198_v46, %v2169_v41 }
0x1438   :  { %v2175_v43 = vpop.xlane.xlu1 %2174 }
0x1439   :  { %v2172_v44 = vpop.xlane.xlu0 %2171  ;;  %v4418_v47 = vadd.f32 %v2212_v62, %v2175_v43  ;;  %2273 = vperm.xlu1 %3077, %v4416_v42  }
0x143a   :  { %v4421_v48 = vadd.f32 %v2205_v26, %v2172_v44 }
0x143b   :  { %2279 = vperm.xlu2 %3079, %v4418_v47  }
0x143c   :  { %2276 = vperm.xlu0 %3078, %v4421_v48  }
0x143e   :  { %v2178_v49 = vpop.xlane.xlu2 %2177 }
0x143f   :  { %v4425_v50 = vadd.f32 %v2219_v28, %v2178_v49 }
0x1440   :  { %v2184_v51 = vpop.xlane.xlu1 %2183 }
0x1441   :  { %v2181_v52 = vpop.xlane.xlu0 %2180  ;;  %2282 = vperm.xlu1 %3077, %v4425_v50   ;;  %v4431_v55 = vadd.f32 %v2233_v34, %v2184_v51 }
0x1442   :  { %v4428_v53 = vadd.f32 %v2226_v27, %v2181_v52 }
0x1444   :  { %2285 = vperm.xlu2 %3079, %v4428_v53  }
0x1446   :  { %v2187_v54 = vpop.xlane.xlu2 %2186 }
0x1447   :  { %v4433_v56 = vadd.f32 %v2240_v32, %v2187_v54 }
0x1448   :  { %v2496_v57 = vpop.xlane.xlu1 %2495 }
0x1449   :  { %v2190_v58 = vpop.xlane.xlu0 %2189  ;;  %2291 = vperm.xlu0 %3078, %v4433_v56   ;;  %2288 = vperm.xlu1 %3077, %v4431_v55   ;;  %v4440_v61 = vadd.f32 %v2529_v35, %v2496_v57 }
0x144a   :  { %v4437_v59 = vadd.f32 %v2247_v36, %v2190_v58 }
0x144c   :  { %2294 = vperm.xlu2 %3079, %v4437_v59  }
0x144e   :  { %v2493_v60 = vpop.xlane.xlu2 %2492 }
0x144f   :  { %v4442_v63 = vadd.f32 %v2522_v30, %v2493_v60 }
0x1450   :  { %v2499_v0 = vpop.xlane.xlu1 %2498 }
0x1451   :  { %2597 = vperm.xlu0 %3078, %v4442_v63   ;;  %2600 = vperm.xlu1 %3077, %v4440_v61   ;;  %v4446_v2 = vadd.f32 %v2536_v38, %v2499_v0 }
0x1456   :  { %v2511_v9 = vpop.xlane.xlu2 %2510 }
0x1457   :  { %v4455_v11 = vadd.f32 %v2564_v39, %v2511_v9 }
0x1458   :  { %v2502_v3 = vpop.xlane.xlu1 %2501 }
0x1459   :  { %v4448_v6 = vadd.f32 %v2543_v37, %v2502_v3  ;;  %2603 = vperm.xlu1 %3077, %v4446_v2  }
0x145b   :  { %2606 = vperm.xlu0 %3078, %v4448_v6  }
0x145e   :  { %v2514_v16 = vpop.xlane.xlu2 %2513 }
0x145f   :  { %v4461_v17 = vadd.f32 %v2571_v40, %v2514_v16 }
0x1460   :  { %v2505_v7 = vpop.xlane.xlu1 %2504 }
0x1461   :  { %v4452_v8 = vadd.f32 %v2550_v5, %v2505_v7 }
0x1463   :  { %2609 = vperm.xlu1 %3077, %v4452_v8  }
0x1468   :  { %v2508_v10 = vpop.xlane.xlu1 %2507 }
0x1469   :  { %v4457_v15 = vadd.f32 %v2557_v4, %v2508_v10 }
0x146b   :  { %2615 = vperm.xlu1 %3077, %v4455_v11   ;;  %2612 = vperm.xlu0 %3078, %v4457_v15  }
0x1473   :  { %2618 = vperm.xlu0 %3078, %v4461_v17  }
0x1495   :  { %v2280_v19 = vpop.permute.xlu2 %2279 }
0x1496   :  { %v2298_v24 = vperm.slane %v2280_v19, %v3999_v33 }
0x149e   :  { %v2286_v21 = vpop.permute.xlu2 %2285 }
0x149f   :  { %v2300_v46 = vperm.slane %v2286_v21, %v3999_v33 }
0x14a6   :  { %v2295_v25 = vpop.permute.xlu2 %2294 }
0x14a7   :  { %v2303_v34 = vperm.slane %v2295_v25, %v3999_v33 }
0x14ab   :  { %v2274_v20 = vpop.permute.xlu1 %2273 }
0x14ac   :  { %v2296_v14 = vperm.slane %v2274_v20, %v3999_v33 }
0x14ae   :  { %v2277_v13 = vpop.permute.xlu0 %2276 }
0x14af   :  { %v2297_v31 = vperm.slane %v2277_v13, %v3999_v33 }
0x14b1   :  { %v2305_v29 = vsel %vm2304_vm2, %v2297_v31, %v2296_v14 }
0x14b2   :  { %v2307_v45 = vsel %vm2306_vm10, %v2298_v24, %v2305_v29 }
0x14b3   :  { %v2283_v18 = vpop.permute.xlu1 %2282 }
0x14b4   :  { %v2299_v22 = vperm.slane %v2283_v18, %v3999_v33 }
0x14b6   :  { %v2309_v12 = vsel %vm2308_vm11, %v2299_v22, %v2307_v45 }
0x14b7   :  { %v2311_v32 = vsel %vm2310_vm12, %v2300_v46, %v2309_v12 }
0x14bb   :  { %v2292_v23 = vpop.permute.xlu0 %2291  ;;  %v2289_v26 = vpop.permute.xlu1 %2288 }
0x14bc   :  { %v2302_v27 = vperm.slane %v2292_v23, %v3999_v33  ;;  %v2301_v28 = vperm.slane %v2289_v26, %v3999_v33 }
0x14be   :  { %v2313_v35 = vsel %vm2312_vm7, %v2301_v28, %v2311_v32 }
0x14bf   :  { %v2315_v1 = vsel %vm2314_vm13, %v2302_v27, %v2313_v35 }
0x14c0   :  { %v2317_v36 = vsel %vm2316_vm14, %v2303_v34, %v2315_v1 }
0x14c1   :  { %v2320_v37 = vsel %vm2319_vm15, %v2317_v36, -inf }
0x14c2   :  { %2321 = vmax.xlane.f32.xlu1 %v2320_v37 }
0x14c3   :  { %v2601_v62 = vpop.permute.xlu1 %2600  ;;  %v2598_v38 = vpop.permute.xlu0 %2597 }
0x14c4   :  { %v2620_v40 = vperm.slane %v2598_v38, %v3999_v33  ;;  %v2621_v39 = vperm.slane %v2601_v62, %v3999_v33 }
0x14c6   :  { %v2628_v44 = vsel %vm2304_vm2, %v2621_v39, %v2620_v40 }
0x14cb   :  { %v2604_v4 = vpop.permute.xlu1 %2603 }
0x14cc   :  { %v2622_v41 = vperm.slane %v2604_v4, %v3999_v33 }
0x14cd   :  { %v2607_v30 = vpop.permute.xlu0 %2606 }
0x14ce   :  { %v2623_v49 = vperm.slane %v2607_v30, %v3999_v33  ;;  %v2629_v51 = vsel %vm2306_vm10, %v2622_v41, %v2628_v44 }
0x14d0   :  { %v2630_v58 = vsel %vm2308_vm11, %v2623_v49, %v2629_v51 }
0x14d5   :  { %v2610_v5 = vpop.permute.xlu1 %2609 }
0x14d6   :  { %v2624_v52 = vperm.slane %v2610_v5, %v3999_v33 }
0x14d8   :  { %v2631_v60 = vsel %vm2310_vm12, %v2624_v52, %v2630_v58 }
0x14dd   :  { %v2613_v43 = vpop.permute.xlu0 %2612  ;;  %v2616_v57 = vpop.permute.xlu1 %2615 }
0x14de   :  { %v2625_v54 = vperm.slane %v2613_v43, %v3999_v33  ;;  %v2626_v0 = vperm.slane %v2616_v57, %v3999_v33 }
0x14e0   :  { %v2632_v3 = vsel %vm2312_vm7, %v2625_v54, %v2631_v60 }
0x14e1   :  { %v2633_v10 = vsel %vm2314_vm13, %v2626_v0, %v2632_v3 }
0x14e5   :  { %v2619_v7 = vpop.permute.xlu0 %2618 }
0x14e6   :  { %v2627_v9 = vperm.slane %v2619_v7, %v3999_v33 }
0x14e8   :  { %v2634_v16 = vsel %vm2316_vm14, %v2627_v9, %v2633_v10 }
0x14e9   :  { %v2636_v19 = vsel %vm2319_vm15, %v2634_v16, -inf }
0x14ea   :  { %2637 = vmax.xlane.f32.xlu2 %v2636_v19 }
0x1535   :  { %v4496_v20 = vpop.xlane.xlu1 %2321 }
0x1536   :  { %v2325_v13 = vperm.slane %v4496_v20, 1  ;;  %v2324_v21 = vperm.slane %v4496_v20, 0  ;;  %v2327_v14 = vperm.slane %v4496_v20, 3  ;;  %v2326_v29 = vperm.slane %v4496_v20, 2 }
0x1537   :  { %v2329_v46 = vperm.slane %v4496_v20, 5  ;;  %v2328_v26 = vperm.slane %v4496_v20, 4  ;;  %v2331_v1 = vperm.slane %v4496_v20, 7  ;;  %v2330_v37 = vperm.slane %v4496_v20, 6 }
0x1538   :  { %v2341_v31 = vsub.f32 %v4421_v48, %v2325_v13  ;;  %v2340_v18 = vsub.f32 %v4416_v42, %v2324_v21  ;;  %v2343_v45 = vsub.f32 %v4425_v50, %v2327_v14  ;;  %v2342_v25 = vsub.f32 %v4418_v47, %v2326_v29 }
0x1539   :  { %v2345_v32 = vsub.f32 %v4431_v55, %v2329_v46  ;;  %v2344_v34 = vsub.f32 %v4428_v53, %v2328_v26  ;;  %v2347_v4 = vsub.f32 %v4437_v59, %v2331_v1  ;;  %v2346_v30 = vsub.f32 %v4433_v56, %v2330_v37 }
0x153a   :  { %v2350_v22 = vmul.f32 1.442695, %v2341_v31  ;;  %v2348_v24 = vmul.f32 1.442695, %v2340_v18  ;;  %v2354_v12 = vmul.f32 1.442695, %v2343_v45 }
0x153b   :  { %v2352_v23 = vmul.f32 1.442695, %v2342_v25  ;;  %v2358_v35 = vmul.f32 1.442695, %v2345_v32  ;;  %v2356_v36 = vmul.f32 1.442695, %v2344_v34 }
0x153c   :  { %3209 = vpow2.f32 %v2350_v22  ;;  %v2362_v5 = vmul.f32 1.442695, %v2347_v4  ;;  %v2360_v40 = vmul.f32 1.442695, %v2346_v30 }
0x153d   :  { %3211 = vpow2.f32 %v2348_v24 }
0x153e   :  { %3213 = vpow2.f32 %v2354_v12 }
0x153f   :  { %3215 = vpow2.f32 %v2352_v23 }
0x1540   :  { %3217 = vpow2.f32 %v2358_v35 }
0x1541   :  { %3219 = vpow2.f32 %v2356_v36 }
0x1542   :  { %v3210_v27 = vpop.eup %3209  ;;  %3221 = vpow2.f32 %v2362_v5 }
0x1543   :  { %v3212_v28 = vpop.eup %3211  ;;  %2376 = vperm.xlu2 %3079, %v3210_v27   ;;  %3223 = vpow2.f32 %v2360_v40 }
0x1544   :  { %2373 = vperm.xlu0 %3078, %v3212_v28   ;;  %v3214_v62 = vpop.eup %3213 }
0x1545   :  { %v3216_v38 = vpop.eup %3215 }
0x1546   :  { %v3218_v39 = vpop.eup %3217 }
0x1547   :  { %v3220_v41 = vpop.eup %3219 }
0x1548   :  { %v3222_v43 = vpop.eup %3221 }
0x1549   :  { %v3224_v44 = vpop.eup %3223 }
0x154b   :  { %2382 = vperm.xlu2 %3079, %v3214_v62  }
0x154c   :  { %2379 = vperm.xlu0 %3078, %v3216_v38  }
0x1553   :  { %2388 = vperm.xlu2 %3079, %v3218_v39  }
0x1554   :  { %2385 = vperm.xlu0 %3078, %v3220_v41  }
0x155b   :  { %2394 = vperm.xlu2 %3079, %v3222_v43  }
0x155c   :  { %2391 = vperm.xlu0 %3078, %v3224_v44  }
0x155d   :  { %v4514_v49 = vpop.xlane.xlu2 %2637 }
0x155e   :  { %v2640_v51 = vperm.slane %v4514_v49, 0  ;;  %v2642_v52 = vperm.slane %v4514_v49, 2  ;;  %v2641_v54 = vperm.slane %v4514_v49, 1  ;;  %v2643_v0 = vperm.slane %v4514_v49, 3 }
0x155f   :  { %v2644_v3 = vperm.slane %v4514_v49, 4  ;;  %v2645_v21 = vperm.slane %v4514_v49, 5  ;;  %v2646_v14 = vperm.slane %v4514_v49, 6  ;;  %v2647_v12 = vperm.slane %v4514_v49, 7 }
0x1560   :  { %v2656_v57 = vsub.f32 %v4442_v63, %v2640_v51  ;;  %v2658_v58 = vsub.f32 %v4446_v2, %v2642_v52  ;;  %v2657_v60 = vsub.f32 %v4440_v61, %v2641_v54  ;;  %v2659_v16 = vsub.f32 %v4448_v6, %v2643_v0 }
0x1561   :  { %v2660_v19 = vsub.f32 %v4452_v8, %v2644_v3  ;;  %v2661_v24 = vsub.f32 %v4457_v15, %v2645_v21  ;;  %v2662_v45 = vsub.f32 %v4455_v11, %v2646_v14  ;;  %v2663_v27 = vsub.f32 %v4461_v17, %v2647_v12 }
0x1562   :  { %v2664_v7 = vmul.f32 1.442695, %v2656_v57  ;;  %v2668_v9 = vmul.f32 1.442695, %v2658_v58  ;;  %v2666_v10 = vmul.f32 1.442695, %v2657_v60 }
0x1563   :  { %v2670_v13 = vmul.f32 1.442695, %v2659_v16  ;;  %v2672_v18 = vmul.f32 1.442695, %v2660_v19  ;;  %v2674_v25 = vmul.f32 1.442695, %v2661_v24 }
0x1564   :  { %3225 = vpow2.f32 %v2664_v7  ;;  %v2676_v23 = vmul.f32 1.442695, %v2662_v45  ;;  %v2678_v28 = vmul.f32 1.442695, %v2663_v27 }
0x1565   :  { %3227 = vpow2.f32 %v2668_v9 }
0x1566   :  { %3229 = vpow2.f32 %v2666_v10 }
0x1567   :  { %3231 = vpow2.f32 %v2670_v13 }
0x1568   :  { %3233 = vpow2.f32 %v2672_v18 }
0x1569   :  { %3235 = vpow2.f32 %v2674_v25 }
0x156a   :  { %v3226_v31 = vpop.eup %3225  ;;  %3237 = vpow2.f32 %v2676_v23 }
0x156b   :  { %v3228_v29 = vpop.eup %3227  ;;  %2689 = vperm.xlu1 %3077, %v3226_v31   ;;  %3239 = vpow2.f32 %v2678_v28 }
0x156c   :  { %v3230_v22 = vpop.eup %3229  ;;  %2695 = vperm.xlu2 %3079, %v3228_v29  }
0x156d   :  { %2692 = vperm.xlu0 %3078, %v3230_v22   ;;  %v3232_v46 = vpop.eup %3231 }
0x156e   :  { %v3234_v26 = vpop.eup %3233 }
0x156f   :  { %v3236_v32 = vpop.eup %3235 }
0x1570   :  { %v3238_v34 = vpop.eup %3237 }
0x1571   :  { %v3240_v35 = vpop.eup %3239 }
0x1573   :  { %2698 = vperm.xlu1 %3077, %v3232_v46  }
0x1575   :  { %2701 = vperm.xlu0 %3078, %v3234_v26  }
0x157b   :  { %2704 = vperm.xlu1 %3077, %v3236_v32  }
0x157d   :  { %2707 = vperm.xlu0 %3078, %v3238_v34  }
0x1583   :  { %2710 = vperm.xlu1 %3077, %v3240_v35  }
0x159d   :  { %v2377_v1 = vpop.permute.xlu2 %2376 }
0x159e   :  { %v2397_v5 = vperm.slane %v2377_v1, %v3999_v33 }
0x15a5   :  { %v2383_v37 = vpop.permute.xlu2 %2382 }
0x15a6   :  { %v2399_v44 = vperm.slane %v2383_v37, %v3999_v33 }
0x15ad   :  { %v2389_v38 = vpop.permute.xlu2 %2388 }
0x15ae   :  { %v2401_v57 = vperm.slane %v2389_v38, %v3999_v33 }
0x15b5   :  { %v2395_v52 = vpop.permute.xlu2 %2394 }
0x15b6   :  { %v2374_v36 = vpop.permute.xlu0 %2373  ;;  %v2403_v0 = vperm.slane %v2395_v52, %v3999_v33 }
0x15b7   :  { %v2396_v4 = vperm.slane %v2374_v36, %v3999_v33 }
0x15b9   :  { %v2404_v39 = vsel %vm2304_vm2, %v2397_v5, %v2396_v4 }
0x15be   :  { %v2380_v62 = vpop.permute.xlu0 %2379 }
0x15bf   :  { %v2398_v30 = vperm.slane %v2380_v62, %v3999_v33 }
0x15c1   :  { %v2405_v41 = vsel %vm2306_vm10, %v2398_v30, %v2404_v39 }
0x15c2   :  { %v2406_v51 = vsel %vm2308_vm11, %v2399_v44, %v2405_v41 }
0x15c6   :  { %v2386_v40 = vpop.permute.xlu0 %2385  ;;  %v2696_v14 = vpop.permute.xlu2 %2695 }
0x15c7   :  { %v2400_v43 = vperm.slane %v2386_v40, %v3999_v33  ;;  %v2714_v24 = vperm.slane %v2696_v14, %v3999_v33 }
0x15c9   :  { %v2407_v54 = vsel %vm2310_vm12, %v2400_v43, %v2406_v51 }
0x15ca   :  { %v2408_v3 = vsel %vm2312_vm7, %v2401_v57, %v2407_v54 }
0x15ce   :  { %v2392_v58 = vpop.permute.xlu0 %2391 }
0x15cf   :  { %v2402_v60 = vperm.slane %v2392_v58, %v3999_v33 }
0x15d1   :  { %v2409_v7 = vsel %vm2314_vm13, %v2402_v60, %v2408_v3 }
0x15d2   :  { %v2410_v9 = vsel %vm2316_vm14, %v2403_v0, %v2409_v7 }
0x15d3   :  { %v2412_v10 = vsel %vm2319_vm15, %v2410_v9, 0.0 }
0x15d4   :  { %2413 = vadd.xlane.f32.xlu0 %v2412_v10 }
0x15dd   :  { %v2690_v16 = vpop.permute.xlu1 %2689 }
0x15de   :  { %v2712_v18 = vperm.slane %v2690_v16, %v3999_v33 }
0x15df   :  { %v2693_v19 = vpop.permute.xlu0 %2692 }
0x15e0   :  { %v2713_v31 = vperm.slane %v2693_v19, %v3999_v33 }
0x15e2   :  { %v2720_v29 = vsel %vm2304_vm2, %v2713_v31, %v2712_v18 }
0x15e3   :  { %v2721_v12 = vsel %vm2306_vm10, %v2714_v24, %v2720_v29 }
0x15e5   :  { %v2699_v13 = vpop.permute.xlu1 %2698 }
0x15e6   :  { %v2715_v22 = vperm.slane %v2699_v13, %v3999_v33 }
0x15e7   :  { %v2702_v21 = vpop.permute.xlu0 %2701 }
0x15e8   :  { %v2716_v25 = vperm.slane %v2702_v21, %v3999_v33  ;;  %v2722_v46 = vsel %vm2308_vm11, %v2715_v22, %v2721_v12 }
0x15ea   :  { %v2723_v28 = vsel %vm2310_vm12, %v2716_v25, %v2722_v46 }
0x15ed   :  { %v2705_v45 = vpop.permute.xlu1 %2704 }
0x15ee   :  { %v2717_v26 = vperm.slane %v2705_v45, %v3999_v33 }
0x15ef   :  { %v2708_v23 = vpop.permute.xlu0 %2707 }
0x15f0   :  { %v2718_v27 = vperm.slane %v2708_v23, %v3999_v33  ;;  %v2724_v32 = vsel %vm2312_vm7, %v2717_v26, %v2723_v28 }
0x15f2   :  { %v2725_v1 = vsel %vm2314_vm13, %v2718_v27, %v2724_v32 }
0x15f5   :  { %v2711_v34 = vpop.permute.xlu1 %2710 }
0x15f6   :  { %v2719_v35 = vperm.slane %v2711_v34, %v3999_v33 }
0x15f8   :  { %v2726_v36 = vsel %vm2316_vm14, %v2719_v35, %v2725_v1 }
0x15f9   :  { %v2728_v37 = vsel %vm2319_vm15, %v2726_v36, 0.0 }
0x15fa   :  { %2729 = vadd.xlane.f32.xlu0 %v2728_v37 }
0x1647   :  { %v2414_v62 = vpop.xlane.xlu0 %2413 }
0x1648   :  { %3241 = vlog2.f32 %v2414_v62 }
0x164e   :  { %v3242_v38 = vpop.eup %3241 }
0x164f   :  { %v2416_v4 = vmul.f32 0.6931472, %v3242_v38 }
0x1651   :  { %v2417_v30 = vadd.f32 %v2416_v4, %v4496_v20 }
0x1653   :  { %v2420_v5 = vperm.slane %v2417_v30, 1  ;;  %v2419_v40 = vperm.slane %v2417_v30, 0  ;;  %v2422_v43 = vperm.slane %v2417_v30, 3  ;;  %v2421_v44 = vperm.slane %v2417_v30, 2 }
0x1654   :  { %v2423_v54 = vperm.slane %v2417_v30, 4  ;;  %v2424_v20 = vperm.slane %v2417_v30, 5 }
0x1655   :  { %v2436_v39 = vsub.f32 %v4421_v48, %v2420_v5  ;;  %v2435_v41 = vsub.f32 %v4416_v42, %v2419_v40  ;;  %v2438_v51 = vsub.f32 %v4425_v50, %v2422_v43  ;;  %v2437_v52 = vsub.f32 %v4418_v47, %v2421_v44 }
0x1656   :  { %v2439_v57 = vsub.f32 %v4428_v53, %v2423_v54  ;;  %v2440_v48 = vsub.f32 %v4431_v55, %v2424_v20 }
0x1657   :  { %2771 = vperm.xlu1 %3077, %v2436_v39   ;;  %2768 = vperm.xlu2 %3079, %v2435_v41  }
0x165f   :  { %2777 = vperm.xlu1 %3077, %v2438_v51   ;;  %2774 = vperm.xlu2 %3079, %v2437_v52  }
0x1667   :  { %2780 = vperm.xlu2 %3079, %v2439_v57  }
0x166d   :  { %v2730_v58 = vpop.xlane.xlu0 %2729 }
0x166e   :  { %3243 = vlog2.f32 %v2730_v58 }
0x166f   :  { %2783 = vperm.xlu2 %3079, %v2440_v48  }
0x1674   :  { %v3244_v42 = vpop.eup %3243 }
0x1675   :  { %v2732_v60 = vmul.f32 0.6931472, %v3244_v42 }
0x1677   :  { %v2733_v0 = vadd.f32 %v2732_v60, %v4514_v49 }
0x1679   :  { %v2740_v3 = vperm.slane %v2733_v0, 5  ;;  %v2736_v50 = vperm.slane %v2733_v0, 1  ;;  %v2735_v7 = vperm.slane %v2733_v0, 0  ;;  %v2738_v10 = vperm.slane %v2733_v0, 3 }
0x167a   :  { %v2737_v55 = vperm.slane %v2733_v0, 2  ;;  %v2741_v49 = vperm.slane %v2733_v0, 6  ;;  %v2739_v13 = vperm.slane %v2733_v0, 4 }
0x167b   :  { %v2756_v47 = vsub.f32 %v4457_v15, %v2740_v3  ;;  %v2752_v9 = vsub.f32 %v4440_v61, %v2736_v50  ;;  %v2751_v53 = vsub.f32 %v4442_v63, %v2735_v7  ;;  %v2754_v16 = vsub.f32 %v4448_v6, %v2738_v10 }
0x167c   :  { %v2753_v19 = vsub.f32 %v4446_v2, %v2737_v55  ;;  %v2757_v21 = vsub.f32 %v4455_v11, %v2741_v49  ;;  %v2755_v15 = vsub.f32 %v4452_v8, %v2739_v13  ;;  %v2742_v61 = vperm.slane %v2733_v0, 7 }
0x167d   :  { %2831 = vperm.xlu0 %3078, %v2756_v47   ;;  %2819 = vperm.xlu2 %3079, %v2752_v9   ;;  %v2425_v63 = vperm.slane %v2417_v30, 6  ;;  %v2426_v6 = vperm.slane %v2417_v30, 7 }
0x167e   :  { %2816 = vperm.xlu1 %3077, %v2751_v53   ;;  %v2758_v31 = vsub.f32 %v4461_v17, %v2742_v61 }
0x167f   :  { %v2441_v18 = vsub.f32 %v4433_v56, %v2425_v63  ;;  %v2442_v2 = vsub.f32 %v4437_v59, %v2426_v6 }
0x1685   :  { %2825 = vperm.xlu2 %3079, %v2754_v16  }
0x1686   :  { %2822 = vperm.xlu1 %3077, %v2753_v19  }
0x168d   :  { %2834 = vperm.xlu2 %3079, %v2757_v21  }
0x168e   :  { %2828 = vperm.xlu1 %3077, %v2755_v15  }
0x1695   :  { %2837 = vperm.xlu2 %3079, %v2758_v31  }
0x1696   :  { %2786 = vperm.xlu1 %3077, %v2441_v18  }
0x169e   :  { %2789 = vperm.xlu1 %3077, %v2442_v2  }
0x16b1   :  { %v2769_v14 = vpop.permute.xlu2 %2768 }
0x16b2   :  { %v2791_v40 = vperm.slane %v2769_v14, %v3999_v33 }
0x16b9   :  { %v2775_v29 = vpop.permute.xlu2 %2774 }
0x16ba   :  { %v2793_v51 = vperm.slane %v2775_v29, %v3999_v33 }
0x16c1   :  { %v2781_v22 = vpop.permute.xlu2 %2780 }
0x16c2   :  { %v2795_v20 = vperm.slane %v2781_v22, %v3999_v33 }
0x16c9   :  { %v2784_v11 = vpop.permute.xlu2 %2783  ;;  %v2772_v24 = vpop.permute.xlu1 %2771 }
0x16ca   :  { %v2792_v62 = vperm.slane %v2772_v24, %v3999_v33  ;;  %v2796_v42 = vperm.slane %v2784_v11, %v3999_v33 }
0x16cc   :  { %v2799_v43 = vsel %vm2304_vm2, %v2792_v62, %v2791_v40 }
0x16cd   :  { %v2800_v54 = vsel %vm2306_vm10, %v2793_v51, %v2799_v43 }
0x16d1   :  { %v2778_v45 = vpop.permute.xlu1 %2777 }
0x16d2   :  { %v2794_v44 = vperm.slane %v2778_v45, %v3999_v33 }
0x16d4   :  { %v2801_v57 = vsel %vm2308_vm11, %v2794_v44, %v2800_v54 }
0x16d5   :  { %v2802_v58 = vsel %vm2310_vm12, %v2795_v20, %v2801_v57 }
0x16d6   :  { %v2803_v0 = vsel %vm2312_vm7, %v2796_v42, %v2802_v58 }
0x16d7   :  { %v2820_v8 = vpop.permute.xlu2 %2819 }
0x16d8   :  { %v2840_v26 = vperm.slane %v2820_v8, %v3999_v33 }
0x16df   :  { %v2826_v25 = vpop.permute.xlu2 %2825 }
0x16e0   :  { %v2842_v32 = vperm.slane %v2826_v25, %v3999_v33 }
0x16e7   :  { %v2835_v46 = vpop.permute.xlu2 %2834 }
0x16e8   :  { %v2845_v38 = vperm.slane %v2835_v46, %v3999_v33 }
0x16ef   :  { %v2832_v27 = vpop.permute.xlu0 %2831  ;;  %v2838_v35 = vpop.permute.xlu2 %2837 }
0x16f0   :  { %v2817_v12 = vpop.permute.xlu1 %2816  ;;  %v2844_v36 = vperm.slane %v2832_v27, %v3999_v33  ;;  %v2846_v30 = vperm.slane %v2838_v35, %v3999_v33 }
0x16f1   :  { %v2839_v17 = vperm.slane %v2817_v12, %v3999_v33 }
0x16f3   :  { %v2847_v59 = vsel %vm2304_vm2, %v2840_v26, %v2839_v17 }
0x16f8   :  { %v2823_v23 = vpop.permute.xlu1 %2822 }
0x16f9   :  { %v2841_v56 = vperm.slane %v2823_v23, %v3999_v33 }
0x16fb   :  { %v2848_v28 = vsel %vm2306_vm10, %v2841_v56, %v2847_v59 }
0x16fc   :  { %v2849_v37 = vsel %vm2308_vm11, %v2842_v32, %v2848_v28 }
0x1700   :  { %v2829_v34 = vpop.permute.xlu1 %2828 }
0x1701   :  { %v2843_v1 = vperm.slane %v2829_v34, %v3999_v33 }
0x1703   :  { %v2850_v4 = vsel %vm2310_vm12, %v2843_v1, %v2849_v37 }
0x1704   :  { %v2851_v5 = vsel %vm2312_vm7, %v2844_v36, %v2850_v4 }
0x1705   :  { %v2852_v39 = vsel %vm2314_vm13, %v2845_v38, %v2851_v5 }
0x1706   :  { %v2853_v41 = vsel %vm2316_vm14, %v2846_v30, %v2852_v39 }
0x1707   :  { %2856 = vst.msk [vmem:[%s3875_s6 + $0x8] sm:$0xff] %vm2319_vm15, %v2853_v41 }
0x1708   :  { %v2787_v52 = vpop.permute.xlu1 %2786 }
0x1709   :  { %v2797_v48 = vperm.slane %v2787_v52, %v3999_v33 }
0x170b   :  { %v2804_v50 = vsel %vm2314_vm13, %v2797_v48, %v2803_v0 }
0x1710   :  { %v2790_v60 = vpop.permute.xlu1 %2789 }
0x1711   :  { %v2798_v3 = vperm.slane %v2790_v60, %v3999_v33 }
0x1713   :  { %v2805_v7 = vsel %vm2316_vm14, %v2798_v3, %v2804_v50 }
0x1714   :  { %2855 = vst.msk [vmem:[%s3875_s6] sm:$0xff] %vm2319_vm15, %v2805_v7 }
0x1715   :  { %2861 = vsyncpa [#allocation3], 1 }
0x1716   :  { %2862 = vsyncpa [#allocation5], 1 }
0x1717   :  { %2863 = vsyncpa [#allocation8], 1 }
0x1718   :  { %2864 = vsyncpa [#allocation11], 1 }
0x1719   :  { %2865 = vsyncpa [#allocation14], 1 }
0x171a   :  { %2866 = vsyncpa [#allocation17], 1 }

</bundles_post_ra>
